<compile_context>
chip_gen: v7x
topology: tpu7x:2x2x1
jax: 0.10.0
libtpu: 0.0.40
codegen_flags: <defaults>
</compile_context>

<pallas_src>
import numpy as np

import jax
import jax.numpy as jnp
from jax.experimental import pallas as pl
from jax.experimental.pallas import tpu as pltpu

NDF = 2
ISIZE = 128            # depthwise 4x4 head requires isize // 32 == 4
EPS = 1e-5
LRELU_SLOPE = 0.2
NUM_LAYERS = 5


def _leaky_relu(x):
    return jnp.where(x > 0, x, LRELU_SLOPE * x)


# ----------------------------------------------------------------------------
# Single fused Pallas kernel (whole Discriminator forward, one sample / step)
# ----------------------------------------------------------------------------
def _disc_kernel(x_ref, *refs):
    """Whole Discriminator forward for one sample.

    x_ref: (1, 1, isize, isize) input block (NCHW, C=1).
    refs : for each layer l: R_l (4,Ho,H), M_l (4,W*Cin,Wo*Cout),
           B_l (Wo*Cout,Wo*Cout) same-channel mask; then
           wdw (4, W5o*C) depthwise weight channel-last, A5 (W5o*C, C),
           ln_g/ln_b/lin_w (1,C), lin_b (1,1); then outputs
           pred_ref (1,1,1), feat_ref (1,1,C).
    """
    lrefs = refs[:3 * NUM_LAYERS]
    (wdw_ref, a5_ref, g_ref, be_ref, lw_ref, lb_ref,
     pred_ref, feat_ref) = refs[3 * NUM_LAYERS:]

    act = x_ref[0, 0]                                   # (isize, isize) f32

    for l in range(NUM_LAYERS):
        r_ref, m_ref, b_ref = lrefs[3 * l:3 * l + 3]
        ho = r_ref.shape[1]                             # output rows (= cols)
        # Conv2d(4, stride=2, pad=1, bias=False) as 8 small MXU matmuls:
        #   acc = sum_kh (R[kh] @ act) @ M[kh]         -> (Ho, Wo*Cout)
        acc = None
        for kh in range(4):
            t = jnp.dot(r_ref[kh], act, preferred_element_type=jnp.float32)
            c = jnp.dot(t, m_ref[kh], preferred_element_type=jnp.float32)
            acc = c if acc is None else acc + c
        # InstanceNorm2d (biased var, eps=1e-5, no affine), single pass.
        inv_px = 1.0 / float(ho * ho)                   # Ho*Wo (square maps)
        colsum = jnp.sum(acc, axis=0, keepdims=True)    # (1, Wo*Cout)
        colsq = jnp.sum(acc * acc, axis=0, keepdims=True)
        mean_b = jnp.dot(colsum, b_ref[...],
                         preferred_element_type=jnp.float32) * inv_px
        ex2_b = jnp.dot(colsq, b_ref[...],
                        preferred_element_type=jnp.float32) * inv_px
        var_b = ex2_b - mean_b * mean_b
        act = _leaky_relu((acc - mean_b) * jax.lax.rsqrt(var_b + EPS))

    # act: (4, 4*C) channel-last conv5 output (lane = w*C + c).
    # feat_extract_layer: depthwise 4x4 valid conv == per-channel weighted sum.
    prod = act * wdw_ref[...]
    feat = jnp.dot(jnp.sum(prod, axis=0, keepdims=True), a5_ref[...],
                   preferred_element_type=jnp.float32)  # (1, C)
    feat_ref[0] = feat

    # output_layer: LayerNorm(C) affine + LeakyReLU + Linear(C, 1).
    c = float(feat.shape[1])
    mu = jnp.sum(feat, axis=-1, keepdims=True) / c
    ex2 = jnp.sum(feat * feat, axis=-1, keepdims=True) / c
    yln = (feat - mu) * jax.lax.rsqrt(ex2 - mu * mu + EPS) * g_ref[...] + be_ref[...]
    ya = _leaky_relu(yln)
    pred_ref[0] = jnp.sum(ya * lw_ref[...], axis=-1, keepdims=True) + lb_ref[...]


# ----------------------------------------------------------------------------
# Host-side wrapper (one pallas_call for the whole forward)
# ----------------------------------------------------------------------------
def _zero_map(ndim):
    zeros = (0,) * ndim
    return lambda i: zeros


def discriminator_forward(x, params):
    """x: (N, 1, isize, isize) NCHW f32 -> (pred (N,1), feat (N, ndf*16))."""
    n, _, isize, _ = x.shape
    c_feat = params["a5"].shape[1]

    const_inputs = []
    in_specs = [pl.BlockSpec((1, 1, isize, isize), lambda i: (i, 0, 0, 0))]
    for l in range(NUM_LAYERS):
        for name in ("r", "m", "b"):
            arr = params[f"{name}{l + 1}"]
            const_inputs.append(arr)
            in_specs.append(pl.BlockSpec(arr.shape, _zero_map(arr.ndim)))
    for name in ("wdw", "a5", "ln_g", "ln_b", "lin_w", "lin_b"):
        arr = params[name]
        const_inputs.append(arr)
        in_specs.append(pl.BlockSpec(arr.shape, _zero_map(arr.ndim)))

    pred3, feat3 = pl.pallas_call(
        _disc_kernel,
        out_shape=(jax.ShapeDtypeStruct((n, 1, 1), jnp.float32),
                   jax.ShapeDtypeStruct((n, 1, c_feat), jnp.float32)),
        grid=(n,),
        in_specs=in_specs,
        out_specs=(pl.BlockSpec((1, 1, 1), lambda i: (i, 0, 0)),
                   pl.BlockSpec((1, 1, c_feat), lambda i: (i, 0, 0))),
        compiler_params=pltpu.CompilerParams(
            dimension_semantics=("parallel",)),
    )(x, *const_inputs)
    return pred3.reshape(n, 1), feat3.reshape(n, c_feat)


# ----------------------------------------------------------------------------
# Parameter setup (plain JAX / numpy, init-time only)
# ----------------------------------------------------------------------------
def spectral_normalize(w, key, n_iter=3):
    """Divide a conv weight by its spectral norm (power iteration on
    weight.view(Cout, -1)), like torch.nn.utils.spectral_norm at eval."""
    cout = w.shape[0]
    wmat = w.reshape(cout, -1)
    u = jax.random.normal(key, (cout,), dtype=jnp.float32)
    u = u / (jnp.linalg.norm(u) + 1e-12)
    v = None
    for _ in range(n_iter):
        v = wmat.T @ u
        v = v / (jnp.linalg.norm(v) + 1e-12)
        u = wmat @ v
        u = u / (jnp.linalg.norm(u) + 1e-12)
    sigma = u @ (wmat @ v)
    return w / sigma


def _build_row_select(h):
    """(4, H//2, H): R[kh, oh, r] = 1 iff r == 2*oh + kh - 1 (zero padding)."""
    ho = h // 2
    r = np.zeros((4, ho, h), np.float32)
    for kh in range(4):
        for oh in range(ho):
            src = 2 * oh + kh - 1
            if 0 <= src < h:
                r[kh, oh, src] = 1.0
    return r


def _build_col_weight(w, width):
    """Fold kw column selection + zero padding + conv weight into
    (4, W*Cin, Wo*Cout): M[kh, cw*Cin+ci, ow*Cout+co] = w[co,ci,kh,cw-2ow+1]."""
    cout, cin = w.shape[0], w.shape[1]
    wo = width // 2
    m = np.zeros((4, width * cin, wo * cout), np.float32)
    wnp = np.asarray(w, np.float32)
    for kh in range(4):
        for kw in range(4):
            tap = wnp[:, :, kh, kw].T                    # (cin, cout)
            for ow in range(wo):
                cw = 2 * ow + kw - 1
                if 0 <= cw < width:
                    m[kh, cw * cin:(cw + 1) * cin,
                      ow * cout:(ow + 1) * cout] += tap
    return m


def _build_channel_bcast(wo, cout):
    """(Wo*Cout, Wo*Cout) 0/1 mask: same output channel (lane % Cout)."""
    ch = np.arange(wo * cout) % cout
    return (ch[:, None] == ch[None, :]).astype(np.float32)


def _build_channel_gather(wo, cout):
    """(Wo*Cout, Cout) 0/1 matrix gathering per-channel sums."""
    ch = np.arange(wo * cout) % cout
    return (ch[:, None] == np.arange(cout)[None, :]).astype(np.float32)


def init_params(key, ndf=NDF, isize=ISIZE):
    assert isize // 32 == 4, "feat_extract 4x4 depthwise head requires isize=128"
    keys = jax.random.split(key, 16)
    chans = [(1, ndf), (ndf, ndf * 2), (ndf * 2, ndf * 4),
             (ndf * 4, ndf * 8), (ndf * 8, ndf * 16)]
    params, raw = {}, {}
    for i, (cin, cout) in enumerate(chans):
        w = 0.1 * jax.random.normal(keys[i], (cout, cin, 4, 4), jnp.float32)
        w = spectral_normalize(w, keys[i + 5])
        raw[f"w{i + 1}"] = w
        h = isize >> i                                  # input spatial size
        params[f"r{i + 1}"] = jnp.asarray(_build_row_select(h))
        params[f"m{i + 1}"] = jnp.asarray(_build_col_weight(np.asarray(w), h))
        params[f"b{i + 1}"] = jnp.asarray(_build_channel_bcast(h // 2, cout))
    c = ndf * 16
    w_dw = 0.1 * jax.random.normal(keys[10], (c, 1, 4, 4), jnp.float32)
    w_dw = spectral_normalize(w_dw, keys[11])
    raw["w_dw"] = w_dw
    w5o = isize >> 5                                    # 4
    wdw_cl = np.transpose(np.asarray(w_dw)[:, 0], (1, 2, 0)).reshape(4, w5o * c)
    params["wdw"] = jnp.asarray(wdw_cl.astype(np.float32))
    params["a5"] = jnp.asarray(_build_channel_gather(w5o, c))
    params["ln_g"] = jnp.ones((1, c), jnp.float32)      # LayerNorm default init
    params["ln_b"] = jnp.zeros((1, c), jnp.float32)
    bound = 1.0 / np.sqrt(c)
    params["lin_w"] = jax.random.uniform(keys[12], (1, c), jnp.float32,
                                         -bound, bound)
    params["lin_b"] = jax.random.uniform(keys[13], (1, 1), jnp.float32,
                                         -bound, bound)
    return params, raw


# ----------------------------------------------------------------------------
# Pure-JAX reference of the PyTorch module (used for the self-check only)
# ----------------------------------------------------------------------------
def _reference_forward(x, raw, params):
    act = x
    for i in range(NUM_LAYERS):
        act = jax.lax.conv_general_dilated(
            act, raw[f"w{i + 1}"], window_strides=(2, 2),
            padding=((1, 1), (1, 1)),
            dimension_numbers=("NCHW", "OIHW", "NCHW"),
            precision=jax.lax.Precision.HIGHEST)
        mean = jnp.mean(act, axis=(2, 3), keepdims=True)
        var = jnp.mean((act - mean) ** 2, axis=(2, 3), keepdims=True)
        act = (act - mean) * jax.lax.rsqrt(var + EPS)
        act = jnp.where(act > 0, act, LRELU_SLOPE * act)
    feat = jnp.sum(act * raw["w_dw"][:, 0][None], axis=(2, 3))   # (N, C)
    mu = jnp.mean(feat, axis=-1, keepdims=True)
    var = jnp.mean((feat - mu) ** 2, axis=-1, keepdims=True)
    yln = (feat - mu) * jax.lax.rsqrt(var + EPS) * params["ln_g"] + params["ln_b"]
    ya = jnp.where(yln > 0, yln, LRELU_SLOPE * yln)
    pred = ya @ params["lin_w"].T + params["lin_b"]
    return pred, feat


if __name__ == "__main__":
    key = jax.random.PRNGKey(0)
    k_param, k_x = jax.random.split(key)
    params, raw = init_params(k_param, ndf=NDF, isize=ISIZE)
    # input: (batch=2, channels=1, isize=128, isize=128) NCHW
    x = jax.random.normal(k_x, (2, 1, ISIZE, ISIZE), jnp.float32)

    pred, feat = jax.jit(discriminator_forward)(x, params)
    jax.block_until_ready((pred, feat))

    assert pred.shape == (2, 1), pred.shape
    assert feat.shape == (2, NDF * 16), feat.shape
    assert bool(jnp.all(jnp.isfinite(pred))) and bool(jnp.all(jnp.isfinite(feat)))

    # Cross-check against a pure-JAX reference of the PyTorch module.
    ref_pred, ref_feat = _reference_forward(x, raw, params)
    assert np.allclose(np.asarray(pred), np.asarray(ref_pred),
                       atol=1e-2, rtol=1e-2), "pred mismatch vs reference"
    assert np.allclose(np.asarray(feat), np.asarray(ref_feat),
                       atol=1e-2, rtol=1e-2), "feat mismatch vs reference"
    print("KERNEL_OK")
</pallas_src>

<mosaic_0001>
module attributes {stable_mosaic.version = 11 : i64} {
  func.func @_disc_kernel(%arg0: i32, %arg1: memref<1x1x128x128xf32, #tpu.memory_space<vmem>>, %arg2: memref<4x64x128xf32, #tpu.memory_space<vmem>>, %arg3: memref<4x128x128xf32, #tpu.memory_space<vmem>>, %arg4: memref<128x128xf32, #tpu.memory_space<vmem>>, %arg5: memref<4x32x64xf32, #tpu.memory_space<vmem>>, %arg6: memref<4x128x128xf32, #tpu.memory_space<vmem>>, %arg7: memref<128x128xf32, #tpu.memory_space<vmem>>, %arg8: memref<4x16x32xf32, #tpu.memory_space<vmem>>, %arg9: memref<4x128x128xf32, #tpu.memory_space<vmem>>, %arg10: memref<128x128xf32, #tpu.memory_space<vmem>>, %arg11: memref<4x8x16xf32, #tpu.memory_space<vmem>>, %arg12: memref<4x128x128xf32, #tpu.memory_space<vmem>>, %arg13: memref<128x128xf32, #tpu.memory_space<vmem>>, %arg14: memref<4x4x8xf32, #tpu.memory_space<vmem>>, %arg15: memref<4x128x128xf32, #tpu.memory_space<vmem>>, %arg16: memref<128x128xf32, #tpu.memory_space<vmem>>, %arg17: memref<4x128xf32, #tpu.memory_space<vmem>>, %arg18: memref<128x32xf32, #tpu.memory_space<vmem>>, %arg19: memref<1x32xf32, #tpu.memory_space<vmem>>, %arg20: memref<1x32xf32, #tpu.memory_space<vmem>>, %arg21: memref<1x32xf32, #tpu.memory_space<vmem>>, %arg22: memref<1x1xf32, #tpu.memory_space<vmem>>, %arg23: memref<1x1x1xf32, #tpu.memory_space<vmem>>, %arg24: memref<1x1x32xf32, #tpu.memory_space<vmem>>) attributes {dimension_semantics = [#tpu.dimension_semantics<parallel>], iteration_bounds = array<i64: 2>, scalar_prefetch = 0 : i64, scratch_operands = 0 : i64, tpu.core_type = #tpu.core_type<tc>, window_params = [{transform_indices = @transform_0, window_bounds = array<i64: 1, 1, 128, 128>}, {pipeline_mode = #tpu.pipeline_mode<synchronous>, transform_indices = @transform_1, window_bounds = array<i64: 4, 64, 128>}, {pipeline_mode = #tpu.pipeline_mode<synchronous>, transform_indices = @transform_2, window_bounds = array<i64: 4, 128, 128>}, {pipeline_mode = #tpu.pipeline_mode<synchronous>, transform_indices = @transform_3, window_bounds = array<i64: 128, 128>}, {pipeline_mode = #tpu.pipeline_mode<synchronous>, transform_indices = @transform_4, window_bounds = array<i64: 4, 32, 64>}, {pipeline_mode = #tpu.pipeline_mode<synchronous>, transform_indices = @transform_5, window_bounds = array<i64: 4, 128, 128>}, {pipeline_mode = #tpu.pipeline_mode<synchronous>, transform_indices = @transform_6, window_bounds = array<i64: 128, 128>}, {pipeline_mode = #tpu.pipeline_mode<synchronous>, transform_indices = @transform_7, window_bounds = array<i64: 4, 16, 32>}, {pipeline_mode = #tpu.pipeline_mode<synchronous>, transform_indices = @transform_8, window_bounds = array<i64: 4, 128, 128>}, {pipeline_mode = #tpu.pipeline_mode<synchronous>, transform_indices = @transform_9, window_bounds = array<i64: 128, 128>}, {pipeline_mode = #tpu.pipeline_mode<synchronous>, transform_indices = @transform_10, window_bounds = array<i64: 4, 8, 16>}, {pipeline_mode = #tpu.pipeline_mode<synchronous>, transform_indices = @transform_11, window_bounds = array<i64: 4, 128, 128>}, {pipeline_mode = #tpu.pipeline_mode<synchronous>, transform_indices = @transform_12, window_bounds = array<i64: 128, 128>}, {pipeline_mode = #tpu.pipeline_mode<synchronous>, transform_indices = @transform_13, window_bounds = array<i64: 4, 4, 8>}, {pipeline_mode = #tpu.pipeline_mode<synchronous>, transform_indices = @transform_14, window_bounds = array<i64: 4, 128, 128>}, {pipeline_mode = #tpu.pipeline_mode<synchronous>, transform_indices = @transform_15, window_bounds = array<i64: 128, 128>}, {pipeline_mode = #tpu.pipeline_mode<synchronous>, transform_indices = @transform_16, window_bounds = array<i64: 4, 128>}, {pipeline_mode = #tpu.pipeline_mode<synchronous>, transform_indices = @transform_17, window_bounds = array<i64: 128, 32>}, {pipeline_mode = #tpu.pipeline_mode<synchronous>, transform_indices = @transform_18, window_bounds = array<i64: 1, 32>}, {pipeline_mode = #tpu.pipeline_mode<synchronous>, transform_indices = @transform_19, window_bounds = array<i64: 1, 32>}, {pipeline_mode = #tpu.pipeline_mode<synchronous>, transform_indices = @transform_20, window_bounds = array<i64: 1, 32>}, {pipeline_mode = #tpu.pipeline_mode<synchronous>, transform_indices = @transform_21, window_bounds = array<i64: 1, 1>}, {transform_indices = @transform_22, window_bounds = array<i64: 1, 1, 1>}, {transform_indices = @transform_23, window_bounds = array<i64: 1, 1, 32>}]} {
    %c0 = arith.constant 0 : index
    %c0_0 = arith.constant 0 : index
    %c0_1 = arith.constant 0 : index
    %c0_2 = arith.constant 0 : index
    %0 = vector.load %arg1[%c0, %c0_0, %c0_1, %c0_2] : memref<1x1x128x128xf32, #tpu.memory_space<vmem>>, vector<1x1x128x128xf32>
    %1 = vector.shape_cast %0 : vector<1x1x128x128xf32> to vector<128x128xf32>
    %c0_3 = arith.constant 0 : index
    %c0_4 = arith.constant 0 : index
    %c0_5 = arith.constant 0 : index
    %2 = vector.load %arg2[%c0_3, %c0_4, %c0_5] : memref<4x64x128xf32, #tpu.memory_space<vmem>>, vector<1x64x128xf32>
    %3 = vector.shape_cast %2 : vector<1x64x128xf32> to vector<64x128xf32>
    %cst = arith.constant dense<0.000000e+00> : vector<64x128xf32>
    %4 = tpu.matmul %3, %1, %cst {dimension_numbers = #tpu.dot_dimension_numbers<[1], [0], [0], [1], [0, 0, 1, 1], [], []>} : vector<64x128xf32>, vector<128x128xf32>, vector<64x128xf32> -> vector<64x128xf32>
    %c0_6 = arith.constant 0 : index
    %c0_7 = arith.constant 0 : index
    %c0_8 = arith.constant 0 : index
    %5 = vector.load %arg3[%c0_6, %c0_7, %c0_8] : memref<4x128x128xf32, #tpu.memory_space<vmem>>, vector<1x128x128xf32>
    %6 = vector.shape_cast %5 : vector<1x128x128xf32> to vector<128x128xf32>
    %cst_9 = arith.constant dense<0.000000e+00> : vector<64x128xf32>
    %7 = tpu.matmul %4, %6, %cst_9 {dimension_numbers = #tpu.dot_dimension_numbers<[1], [0], [0], [1], [0, 0, 1, 1], [], []>} : vector<64x128xf32>, vector<128x128xf32>, vector<64x128xf32> -> vector<64x128xf32>
    %c1 = arith.constant 1 : index
    %c0_10 = arith.constant 0 : index
    %c0_11 = arith.constant 0 : index
    %8 = vector.load %arg2[%c1, %c0_10, %c0_11] : memref<4x64x128xf32, #tpu.memory_space<vmem>>, vector<1x64x128xf32>
    %9 = vector.shape_cast %8 : vector<1x64x128xf32> to vector<64x128xf32>
    %cst_12 = arith.constant dense<0.000000e+00> : vector<64x128xf32>
    %10 = tpu.matmul %9, %1, %cst_12 {dimension_numbers = #tpu.dot_dimension_numbers<[1], [0], [0], [1], [0, 0, 1, 1], [], []>} : vector<64x128xf32>, vector<128x128xf32>, vector<64x128xf32> -> vector<64x128xf32>
    %c1_13 = arith.constant 1 : index
    %c0_14 = arith.constant 0 : index
    %c0_15 = arith.constant 0 : index
    %11 = vector.load %arg3[%c1_13, %c0_14, %c0_15] : memref<4x128x128xf32, #tpu.memory_space<vmem>>, vector<1x128x128xf32>
    %12 = vector.shape_cast %11 : vector<1x128x128xf32> to vector<128x128xf32>
    %cst_16 = arith.constant dense<0.000000e+00> : vector<64x128xf32>
    %13 = tpu.matmul %10, %12, %cst_16 {dimension_numbers = #tpu.dot_dimension_numbers<[1], [0], [0], [1], [0, 0, 1, 1], [], []>} : vector<64x128xf32>, vector<128x128xf32>, vector<64x128xf32> -> vector<64x128xf32>
    %14 = arith.addf %7, %13 : vector<64x128xf32>
    %c2 = arith.constant 2 : index
    %c0_17 = arith.constant 0 : index
    %c0_18 = arith.constant 0 : index
    %15 = vector.load %arg2[%c2, %c0_17, %c0_18] : memref<4x64x128xf32, #tpu.memory_space<vmem>>, vector<1x64x128xf32>
    %16 = vector.shape_cast %15 : vector<1x64x128xf32> to vector<64x128xf32>
    %cst_19 = arith.constant dense<0.000000e+00> : vector<64x128xf32>
    %17 = tpu.matmul %16, %1, %cst_19 {dimension_numbers = #tpu.dot_dimension_numbers<[1], [0], [0], [1], [0, 0, 1, 1], [], []>} : vector<64x128xf32>, vector<128x128xf32>, vector<64x128xf32> -> vector<64x128xf32>
    %c2_20 = arith.constant 2 : index
    %c0_21 = arith.constant 0 : index
    %c0_22 = arith.constant 0 : index
    %18 = vector.load %arg3[%c2_20, %c0_21, %c0_22] : memref<4x128x128xf32, #tpu.memory_space<vmem>>, vector<1x128x128xf32>
    %19 = vector.shape_cast %18 : vector<1x128x128xf32> to vector<128x128xf32>
    %cst_23 = arith.constant dense<0.000000e+00> : vector<64x128xf32>
    %20 = tpu.matmul %17, %19, %cst_23 {dimension_numbers = #tpu.dot_dimension_numbers<[1], [0], [0], [1], [0, 0, 1, 1], [], []>} : vector<64x128xf32>, vector<128x128xf32>, vector<64x128xf32> -> vector<64x128xf32>
    %21 = arith.addf %14, %20 : vector<64x128xf32>
    %c3 = arith.constant 3 : index
    %c0_24 = arith.constant 0 : index
    %c0_25 = arith.constant 0 : index
    %22 = vector.load %arg2[%c3, %c0_24, %c0_25] : memref<4x64x128xf32, #tpu.memory_space<vmem>>, vector<1x64x128xf32>
    %23 = vector.shape_cast %22 : vector<1x64x128xf32> to vector<64x128xf32>
    %cst_26 = arith.constant dense<0.000000e+00> : vector<64x128xf32>
    %24 = tpu.matmul %23, %1, %cst_26 {dimension_numbers = #tpu.dot_dimension_numbers<[1], [0], [0], [1], [0, 0, 1, 1], [], []>} : vector<64x128xf32>, vector<128x128xf32>, vector<64x128xf32> -> vector<64x128xf32>
    %c3_27 = arith.constant 3 : index
    %c0_28 = arith.constant 0 : index
    %c0_29 = arith.constant 0 : index
    %25 = vector.load %arg3[%c3_27, %c0_28, %c0_29] : memref<4x128x128xf32, #tpu.memory_space<vmem>>, vector<1x128x128xf32>
    %26 = vector.shape_cast %25 : vector<1x128x128xf32> to vector<128x128xf32>
    %cst_30 = arith.constant dense<0.000000e+00> : vector<64x128xf32>
    %27 = tpu.matmul %24, %26, %cst_30 {dimension_numbers = #tpu.dot_dimension_numbers<[1], [0], [0], [1], [0, 0, 1, 1], [], []>} : vector<64x128xf32>, vector<128x128xf32>, vector<64x128xf32> -> vector<64x128xf32>
    %28 = arith.addf %21, %27 : vector<64x128xf32>
    %cst_31 = arith.constant dense<0.000000e+00> : vector<128xf32>
    %29 = vector.multi_reduction <add>, %28, %cst_31 [0] : vector<64x128xf32> to vector<128xf32>
    %30 = vector.shape_cast %29 : vector<128xf32> to vector<1x128xf32>
    %31 = arith.mulf %28, %28 : vector<64x128xf32>
    %cst_32 = arith.constant dense<0.000000e+00> : vector<128xf32>
    %32 = vector.multi_reduction <add>, %31, %cst_32 [0] : vector<64x128xf32> to vector<128xf32>
    %33 = vector.shape_cast %32 : vector<128xf32> to vector<1x128xf32>
    %c0_33 = arith.constant 0 : index
    %c0_34 = arith.constant 0 : index
    %34 = vector.load %arg4[%c0_33, %c0_34] : memref<128x128xf32, #tpu.memory_space<vmem>>, vector<128x128xf32>
    %cst_35 = arith.constant dense<0.000000e+00> : vector<1x128xf32>
    %35 = tpu.matmul %30, %34, %cst_35 {dimension_numbers = #tpu.dot_dimension_numbers<[1], [0], [0], [1], [0, 0, 1, 1], [], []>} : vector<1x128xf32>, vector<128x128xf32>, vector<1x128xf32> -> vector<1x128xf32>
    %cst_36 = arith.constant 2.44140625E-4 : f32
    %36 = vector.broadcast %cst_36 : f32 to vector<1x128xf32>
    %37 = arith.mulf %35, %36 : vector<1x128xf32>
    %c0_37 = arith.constant 0 : index
    %c0_38 = arith.constant 0 : index
    %38 = vector.load %arg4[%c0_37, %c0_38] : memref<128x128xf32, #tpu.memory_space<vmem>>, vector<128x128xf32>
    %cst_39 = arith.constant dense<0.000000e+00> : vector<1x128xf32>
    %39 = tpu.matmul %33, %38, %cst_39 {dimension_numbers = #tpu.dot_dimension_numbers<[1], [0], [0], [1], [0, 0, 1, 1], [], []>} : vector<1x128xf32>, vector<128x128xf32>, vector<1x128xf32> -> vector<1x128xf32>
    %cst_40 = arith.constant 2.44140625E-4 : f32
    %40 = vector.broadcast %cst_40 : f32 to vector<1x128xf32>
    %41 = arith.mulf %39, %40 : vector<1x128xf32>
    %42 = arith.mulf %37, %37 : vector<1x128xf32>
    %43 = arith.subf %41, %42 : vector<1x128xf32>
    %44 = vector.broadcast %37 : vector<1x128xf32> to vector<64x128xf32>
    %45 = arith.subf %28, %44 : vector<64x128xf32>
    %cst_41 = arith.constant 9.99999974E-6 : f32
    %46 = vector.broadcast %cst_41 : f32 to vector<1x128xf32>
    %47 = arith.addf %43, %46 : vector<1x128xf32>
    %48 = math.rsqrt %47 : vector<1x128xf32>
    %49 = vector.broadcast %48 : vector<1x128xf32> to vector<64x128xf32>
    %50 = arith.mulf %45, %49 : vector<64x128xf32>
    %cst_42 = arith.constant 0.000000e+00 : f32
    %51 = vector.broadcast %cst_42 : f32 to vector<64x128xf32>
    %52 = arith.cmpf ogt, %50, %51 : vector<64x128xf32>
    %cst_43 = arith.constant 2.000000e-01 : f32
    %53 = vector.broadcast %cst_43 : f32 to vector<64x128xf32>
    %54 = arith.mulf %53, %50 : vector<64x128xf32>
    %55 = arith.select %52, %50, %54 : vector<64x128xi1>, vector<64x128xf32>
    %c0_44 = arith.constant 0 : index
    %c0_45 = arith.constant 0 : index
    %c0_46 = arith.constant 0 : index
    %56 = vector.load %arg5[%c0_44, %c0_45, %c0_46] : memref<4x32x64xf32, #tpu.memory_space<vmem>>, vector<1x32x64xf32>
    %57 = vector.shape_cast %56 : vector<1x32x64xf32> to vector<32x64xf32>
    %cst_47 = arith.constant dense<0.000000e+00> : vector<32x128xf32>
    %58 = tpu.matmul %57, %55, %cst_47 {dimension_numbers = #tpu.dot_dimension_numbers<[1], [0], [0], [1], [0, 0, 1, 1], [], []>} : vector<32x64xf32>, vector<64x128xf32>, vector<32x128xf32> -> vector<32x128xf32>
    %c0_48 = arith.constant 0 : index
    %c0_49 = arith.constant 0 : index
    %c0_50 = arith.constant 0 : index
    %59 = vector.load %arg6[%c0_48, %c0_49, %c0_50] : memref<4x128x128xf32, #tpu.memory_space<vmem>>, vector<1x128x128xf32>
    %60 = vector.shape_cast %59 : vector<1x128x128xf32> to vector<128x128xf32>
    %cst_51 = arith.constant dense<0.000000e+00> : vector<32x128xf32>
    %61 = tpu.matmul %58, %60, %cst_51 {dimension_numbers = #tpu.dot_dimension_numbers<[1], [0], [0], [1], [0, 0, 1, 1], [], []>} : vector<32x128xf32>, vector<128x128xf32>, vector<32x128xf32> -> vector<32x128xf32>
    %c1_52 = arith.constant 1 : index
    %c0_53 = arith.constant 0 : index
    %c0_54 = arith.constant 0 : index
    %62 = vector.load %arg5[%c1_52, %c0_53, %c0_54] : memref<4x32x64xf32, #tpu.memory_space<vmem>>, vector<1x32x64xf32>
    %63 = vector.shape_cast %62 : vector<1x32x64xf32> to vector<32x64xf32>
    %cst_55 = arith.constant dense<0.000000e+00> : vector<32x128xf32>
    %64 = tpu.matmul %63, %55, %cst_55 {dimension_numbers = #tpu.dot_dimension_numbers<[1], [0], [0], [1], [0, 0, 1, 1], [], []>} : vector<32x64xf32>, vector<64x128xf32>, vector<32x128xf32> -> vector<32x128xf32>
    %c1_56 = arith.constant 1 : index
    %c0_57 = arith.constant 0 : index
    %c0_58 = arith.constant 0 : index
    %65 = vector.load %arg6[%c1_56, %c0_57, %c0_58] : memref<4x128x128xf32, #tpu.memory_space<vmem>>, vector<1x128x128xf32>
    %66 = vector.shape_cast %65 : vector<1x128x128xf32> to vector<128x128xf32>
    %cst_59 = arith.constant dense<0.000000e+00> : vector<32x128xf32>
    %67 = tpu.matmul %64, %66, %cst_59 {dimension_numbers = #tpu.dot_dimension_numbers<[1], [0], [0], [1], [0, 0, 1, 1], [], []>} : vector<32x128xf32>, vector<128x128xf32>, vector<32x128xf32> -> vector<32x128xf32>
    %68 = arith.addf %61, %67 : vector<32x128xf32>
    %c2_60 = arith.constant 2 : index
    %c0_61 = arith.constant 0 : index
    %c0_62 = arith.constant 0 : index
    %69 = vector.load %arg5[%c2_60, %c0_61, %c0_62] : memref<4x32x64xf32, #tpu.memory_space<vmem>>, vector<1x32x64xf32>
    %70 = vector.shape_cast %69 : vector<1x32x64xf32> to vector<32x64xf32>
    %cst_63 = arith.constant dense<0.000000e+00> : vector<32x128xf32>
    %71 = tpu.matmul %70, %55, %cst_63 {dimension_numbers = #tpu.dot_dimension_numbers<[1], [0], [0], [1], [0, 0, 1, 1], [], []>} : vector<32x64xf32>, vector<64x128xf32>, vector<32x128xf32> -> vector<32x128xf32>
    %c2_64 = arith.constant 2 : index
    %c0_65 = arith.constant 0 : index
    %c0_66 = arith.constant 0 : index
    %72 = vector.load %arg6[%c2_64, %c0_65, %c0_66] : memref<4x128x128xf32, #tpu.memory_space<vmem>>, vector<1x128x128xf32>
    %73 = vector.shape_cast %72 : vector<1x128x128xf32> to vector<128x128xf32>
    %cst_67 = arith.constant dense<0.000000e+00> : vector<32x128xf32>
    %74 = tpu.matmul %71, %73, %cst_67 {dimension_numbers = #tpu.dot_dimension_numbers<[1], [0], [0], [1], [0, 0, 1, 1], [], []>} : vector<32x128xf32>, vector<128x128xf32>, vector<32x128xf32> -> vector<32x128xf32>
    %75 = arith.addf %68, %74 : vector<32x128xf32>
    %c3_68 = arith.constant 3 : index
    %c0_69 = arith.constant 0 : index
    %c0_70 = arith.constant 0 : index
    %76 = vector.load %arg5[%c3_68, %c0_69, %c0_70] : memref<4x32x64xf32, #tpu.memory_space<vmem>>, vector<1x32x64xf32>
    %77 = vector.shape_cast %76 : vector<1x32x64xf32> to vector<32x64xf32>
    %cst_71 = arith.constant dense<0.000000e+00> : vector<32x128xf32>
    %78 = tpu.matmul %77, %55, %cst_71 {dimension_numbers = #tpu.dot_dimension_numbers<[1], [0], [0], [1], [0, 0, 1, 1], [], []>} : vector<32x64xf32>, vector<64x128xf32>, vector<32x128xf32> -> vector<32x128xf32>
    %c3_72 = arith.constant 3 : index
    %c0_73 = arith.constant 0 : index
    %c0_74 = arith.constant 0 : index
    %79 = vector.load %arg6[%c3_72, %c0_73, %c0_74] : memref<4x128x128xf32, #tpu.memory_space<vmem>>, vector<1x128x128xf32>
    %80 = vector.shape_cast %79 : vector<1x128x128xf32> to vector<128x128xf32>
    %cst_75 = arith.constant dense<0.000000e+00> : vector<32x128xf32>
    %81 = tpu.matmul %78, %80, %cst_75 {dimension_numbers = #tpu.dot_dimension_numbers<[1], [0], [0], [1], [0, 0, 1, 1], [], []>} : vector<32x128xf32>, vector<128x128xf32>, vector<32x128xf32> -> vector<32x128xf32>
    %82 = arith.addf %75, %81 : vector<32x128xf32>
    %cst_76 = arith.constant dense<0.000000e+00> : vector<128xf32>
    %83 = vector.multi_reduction <add>, %82, %cst_76 [0] : vector<32x128xf32> to vector<128xf32>
    %84 = vector.shape_cast %83 : vector<128xf32> to vector<1x128xf32>
    %85 = arith.mulf %82, %82 : vector<32x128xf32>
    %cst_77 = arith.constant dense<0.000000e+00> : vector<128xf32>
    %86 = vector.multi_reduction <add>, %85, %cst_77 [0] : vector<32x128xf32> to vector<128xf32>
    %87 = vector.shape_cast %86 : vector<128xf32> to vector<1x128xf32>
    %c0_78 = arith.constant 0 : index
    %c0_79 = arith.constant 0 : index
    %88 = vector.load %arg7[%c0_78, %c0_79] : memref<128x128xf32, #tpu.memory_space<vmem>>, vector<128x128xf32>
    %cst_80 = arith.constant dense<0.000000e+00> : vector<1x128xf32>
    %89 = tpu.matmul %84, %88, %cst_80 {dimension_numbers = #tpu.dot_dimension_numbers<[1], [0], [0], [1], [0, 0, 1, 1], [], []>} : vector<1x128xf32>, vector<128x128xf32>, vector<1x128xf32> -> vector<1x128xf32>
    %cst_81 = arith.constant 9.765625E-4 : f32
    %90 = vector.broadcast %cst_81 : f32 to vector<1x128xf32>
    %91 = arith.mulf %89, %90 : vector<1x128xf32>
    %c0_82 = arith.constant 0 : index
    %c0_83 = arith.constant 0 : index
    %92 = vector.load %arg7[%c0_82, %c0_83] : memref<128x128xf32, #tpu.memory_space<vmem>>, vector<128x128xf32>
    %cst_84 = arith.constant dense<0.000000e+00> : vector<1x128xf32>
    %93 = tpu.matmul %87, %92, %cst_84 {dimension_numbers = #tpu.dot_dimension_numbers<[1], [0], [0], [1], [0, 0, 1, 1], [], []>} : vector<1x128xf32>, vector<128x128xf32>, vector<1x128xf32> -> vector<1x128xf32>
    %cst_85 = arith.constant 9.765625E-4 : f32
    %94 = vector.broadcast %cst_85 : f32 to vector<1x128xf32>
    %95 = arith.mulf %93, %94 : vector<1x128xf32>
    %96 = arith.mulf %91, %91 : vector<1x128xf32>
    %97 = arith.subf %95, %96 : vector<1x128xf32>
    %98 = vector.broadcast %91 : vector<1x128xf32> to vector<32x128xf32>
    %99 = arith.subf %82, %98 : vector<32x128xf32>
    %cst_86 = arith.constant 9.99999974E-6 : f32
    %100 = vector.broadcast %cst_86 : f32 to vector<1x128xf32>
    %101 = arith.addf %97, %100 : vector<1x128xf32>
    %102 = math.rsqrt %101 : vector<1x128xf32>
    %103 = vector.broadcast %102 : vector<1x128xf32> to vector<32x128xf32>
    %104 = arith.mulf %99, %103 : vector<32x128xf32>
    %cst_87 = arith.constant 0.000000e+00 : f32
    %105 = vector.broadcast %cst_87 : f32 to vector<32x128xf32>
    %106 = arith.cmpf ogt, %104, %105 : vector<32x128xf32>
    %cst_88 = arith.constant 2.000000e-01 : f32
    %107 = vector.broadcast %cst_88 : f32 to vector<32x128xf32>
    %108 = arith.mulf %107, %104 : vector<32x128xf32>
    %109 = arith.select %106, %104, %108 : vector<32x128xi1>, vector<32x128xf32>
    %c0_89 = arith.constant 0 : index
    %c0_90 = arith.constant 0 : index
    %c0_91 = arith.constant 0 : index
    %110 = vector.load %arg8[%c0_89, %c0_90, %c0_91] : memref<4x16x32xf32, #tpu.memory_space<vmem>>, vector<1x16x32xf32>
    %111 = vector.shape_cast %110 : vector<1x16x32xf32> to vector<16x32xf32>
    %cst_92 = arith.constant dense<0.000000e+00> : vector<16x128xf32>
    %112 = tpu.matmul %111, %109, %cst_92 {dimension_numbers = #tpu.dot_dimension_numbers<[1], [0], [0], [1], [0, 0, 1, 1], [], []>} : vector<16x32xf32>, vector<32x128xf32>, vector<16x128xf32> -> vector<16x128xf32>
    %c0_93 = arith.constant 0 : index
    %c0_94 = arith.constant 0 : index
    %c0_95 = arith.constant 0 : index
    %113 = vector.load %arg9[%c0_93, %c0_94, %c0_95] : memref<4x128x128xf32, #tpu.memory_space<vmem>>, vector<1x128x128xf32>
    %114 = vector.shape_cast %113 : vector<1x128x128xf32> to vector<128x128xf32>
    %cst_96 = arith.constant dense<0.000000e+00> : vector<16x128xf32>
    %115 = tpu.matmul %112, %114, %cst_96 {dimension_numbers = #tpu.dot_dimension_numbers<[1], [0], [0], [1], [0, 0, 1, 1], [], []>} : vector<16x128xf32>, vector<128x128xf32>, vector<16x128xf32> -> vector<16x128xf32>
    %c1_97 = arith.constant 1 : index
    %c0_98 = arith.constant 0 : index
    %c0_99 = arith.constant 0 : index
    %116 = vector.load %arg8[%c1_97, %c0_98, %c0_99] : memref<4x16x32xf32, #tpu.memory_space<vmem>>, vector<1x16x32xf32>
    %117 = vector.shape_cast %116 : vector<1x16x32xf32> to vector<16x32xf32>
    %cst_100 = arith.constant dense<0.000000e+00> : vector<16x128xf32>
    %118 = tpu.matmul %117, %109, %cst_100 {dimension_numbers = #tpu.dot_dimension_numbers<[1], [0], [0], [1], [0, 0, 1, 1], [], []>} : vector<16x32xf32>, vector<32x128xf32>, vector<16x128xf32> -> vector<16x128xf32>
    %c1_101 = arith.constant 1 : index
    %c0_102 = arith.constant 0 : index
    %c0_103 = arith.constant 0 : index
    %119 = vector.load %arg9[%c1_101, %c0_102, %c0_103] : memref<4x128x128xf32, #tpu.memory_space<vmem>>, vector<1x128x128xf32>
    %120 = vector.shape_cast %119 : vector<1x128x128xf32> to vector<128x128xf32>
    %cst_104 = arith.constant dense<0.000000e+00> : vector<16x128xf32>
    %121 = tpu.matmul %118, %120, %cst_104 {dimension_numbers = #tpu.dot_dimension_numbers<[1], [0], [0], [1], [0, 0, 1, 1], [], []>} : vector<16x128xf32>, vector<128x128xf32>, vector<16x128xf32> -> vector<16x128xf32>
    %122 = arith.addf %115, %121 : vector<16x128xf32>
    %c2_105 = arith.constant 2 : index
    %c0_106 = arith.constant 0 : index
    %c0_107 = arith.constant 0 : index
    %123 = vector.load %arg8[%c2_105, %c0_106, %c0_107] : memref<4x16x32xf32, #tpu.memory_space<vmem>>, vector<1x16x32xf32>
    %124 = vector.shape_cast %123 : vector<1x16x32xf32> to vector<16x32xf32>
    %cst_108 = arith.constant dense<0.000000e+00> : vector<16x128xf32>
    %125 = tpu.matmul %124, %109, %cst_108 {dimension_numbers = #tpu.dot_dimension_numbers<[1], [0], [0], [1], [0, 0, 1, 1], [], []>} : vector<16x32xf32>, vector<32x128xf32>, vector<16x128xf32> -> vector<16x128xf32>
    %c2_109 = arith.constant 2 : index
    %c0_110 = arith.constant 0 : index
    %c0_111 = arith.constant 0 : index
    %126 = vector.load %arg9[%c2_109, %c0_110, %c0_111] : memref<4x128x128xf32, #tpu.memory_space<vmem>>, vector<1x128x128xf32>
    %127 = vector.shape_cast %126 : vector<1x128x128xf32> to vector<128x128xf32>
    %cst_112 = arith.constant dense<0.000000e+00> : vector<16x128xf32>
    %128 = tpu.matmul %125, %127, %cst_112 {dimension_numbers = #tpu.dot_dimension_numbers<[1], [0], [0], [1], [0, 0, 1, 1], [], []>} : vector<16x128xf32>, vector<128x128xf32>, vector<16x128xf32> -> vector<16x128xf32>
    %129 = arith.addf %122, %128 : vector<16x128xf32>
    %c3_113 = arith.constant 3 : index
    %c0_114 = arith.constant 0 : index
    %c0_115 = arith.constant 0 : index
    %130 = vector.load %arg8[%c3_113, %c0_114, %c0_115] : memref<4x16x32xf32, #tpu.memory_space<vmem>>, vector<1x16x32xf32>
    %131 = vector.shape_cast %130 : vector<1x16x32xf32> to vector<16x32xf32>
    %cst_116 = arith.constant dense<0.000000e+00> : vector<16x128xf32>
    %132 = tpu.matmul %131, %109, %cst_116 {dimension_numbers = #tpu.dot_dimension_numbers<[1], [0], [0], [1], [0, 0, 1, 1], [], []>} : vector<16x32xf32>, vector<32x128xf32>, vector<16x128xf32> -> vector<16x128xf32>
    %c3_117 = arith.constant 3 : index
    %c0_118 = arith.constant 0 : index
    %c0_119 = arith.constant 0 : index
    %133 = vector.load %arg9[%c3_117, %c0_118, %c0_119] : memref<4x128x128xf32, #tpu.memory_space<vmem>>, vector<1x128x128xf32>
    %134 = vector.shape_cast %133 : vector<1x128x128xf32> to vector<128x128xf32>
    %cst_120 = arith.constant dense<0.000000e+00> : vector<16x128xf32>
    %135 = tpu.matmul %132, %134, %cst_120 {dimension_numbers = #tpu.dot_dimension_numbers<[1], [0], [0], [1], [0, 0, 1, 1], [], []>} : vector<16x128xf32>, vector<128x128xf32>, vector<16x128xf32> -> vector<16x128xf32>
    %136 = arith.addf %129, %135 : vector<16x128xf32>
    %cst_121 = arith.constant dense<0.000000e+00> : vector<128xf32>
    %137 = vector.multi_reduction <add>, %136, %cst_121 [0] : vector<16x128xf32> to vector<128xf32>
    %138 = vector.shape_cast %137 : vector<128xf32> to vector<1x128xf32>
    %139 = arith.mulf %136, %136 : vector<16x128xf32>
    %cst_122 = arith.constant dense<0.000000e+00> : vector<128xf32>
    %140 = vector.multi_reduction <add>, %139, %cst_122 [0] : vector<16x128xf32> to vector<128xf32>
    %141 = vector.shape_cast %140 : vector<128xf32> to vector<1x128xf32>
    %c0_123 = arith.constant 0 : index
    %c0_124 = arith.constant 0 : index
    %142 = vector.load %arg10[%c0_123, %c0_124] : memref<128x128xf32, #tpu.memory_space<vmem>>, vector<128x128xf32>
    %cst_125 = arith.constant dense<0.000000e+00> : vector<1x128xf32>
    %143 = tpu.matmul %138, %142, %cst_125 {dimension_numbers = #tpu.dot_dimension_numbers<[1], [0], [0], [1], [0, 0, 1, 1], [], []>} : vector<1x128xf32>, vector<128x128xf32>, vector<1x128xf32> -> vector<1x128xf32>
    %cst_126 = arith.constant 3.906250e-03 : f32
    %144 = vector.broadcast %cst_126 : f32 to vector<1x128xf32>
    %145 = arith.mulf %143, %144 : vector<1x128xf32>
    %c0_127 = arith.constant 0 : index
    %c0_128 = arith.constant 0 : index
    %146 = vector.load %arg10[%c0_127, %c0_128] : memref<128x128xf32, #tpu.memory_space<vmem>>, vector<128x128xf32>
    %cst_129 = arith.constant dense<0.000000e+00> : vector<1x128xf32>
    %147 = tpu.matmul %141, %146, %cst_129 {dimension_numbers = #tpu.dot_dimension_numbers<[1], [0], [0], [1], [0, 0, 1, 1], [], []>} : vector<1x128xf32>, vector<128x128xf32>, vector<1x128xf32> -> vector<1x128xf32>
    %cst_130 = arith.constant 3.906250e-03 : f32
    %148 = vector.broadcast %cst_130 : f32 to vector<1x128xf32>
    %149 = arith.mulf %147, %148 : vector<1x128xf32>
    %150 = arith.mulf %145, %145 : vector<1x128xf32>
    %151 = arith.subf %149, %150 : vector<1x128xf32>
    %152 = vector.broadcast %145 : vector<1x128xf32> to vector<16x128xf32>
    %153 = arith.subf %136, %152 : vector<16x128xf32>
    %cst_131 = arith.constant 9.99999974E-6 : f32
    %154 = vector.broadcast %cst_131 : f32 to vector<1x128xf32>
    %155 = arith.addf %151, %154 : vector<1x128xf32>
    %156 = math.rsqrt %155 : vector<1x128xf32>
    %157 = vector.broadcast %156 : vector<1x128xf32> to vector<16x128xf32>
    %158 = arith.mulf %153, %157 : vector<16x128xf32>
    %cst_132 = arith.constant 0.000000e+00 : f32
    %159 = vector.broadcast %cst_132 : f32 to vector<16x128xf32>
    %160 = arith.cmpf ogt, %158, %159 : vector<16x128xf32>
    %cst_133 = arith.constant 2.000000e-01 : f32
    %161 = vector.broadcast %cst_133 : f32 to vector<16x128xf32>
    %162 = arith.mulf %161, %158 : vector<16x128xf32>
    %163 = arith.select %160, %158, %162 : vector<16x128xi1>, vector<16x128xf32>
    %c0_134 = arith.constant 0 : index
    %c0_135 = arith.constant 0 : index
    %c0_136 = arith.constant 0 : index
    %164 = vector.load %arg11[%c0_134, %c0_135, %c0_136] : memref<4x8x16xf32, #tpu.memory_space<vmem>>, vector<1x8x16xf32>
    %165 = vector.shape_cast %164 : vector<1x8x16xf32> to vector<8x16xf32>
    %cst_137 = arith.constant dense<0.000000e+00> : vector<8x128xf32>
    %166 = tpu.matmul %165, %163, %cst_137 {dimension_numbers = #tpu.dot_dimension_numbers<[1], [0], [0], [1], [0, 0, 1, 1], [], []>} : vector<8x16xf32>, vector<16x128xf32>, vector<8x128xf32> -> vector<8x128xf32>
    %c0_138 = arith.constant 0 : index
    %c0_139 = arith.constant 0 : index
    %c0_140 = arith.constant 0 : index
    %167 = vector.load %arg12[%c0_138, %c0_139, %c0_140] : memref<4x128x128xf32, #tpu.memory_space<vmem>>, vector<1x128x128xf32>
    %168 = vector.shape_cast %167 : vector<1x128x128xf32> to vector<128x128xf32>
    %cst_141 = arith.constant dense<0.000000e+00> : vector<8x128xf32>
    %169 = tpu.matmul %166, %168, %cst_141 {dimension_numbers = #tpu.dot_dimension_numbers<[1], [0], [0], [1], [0, 0, 1, 1], [], []>} : vector<8x128xf32>, vector<128x128xf32>, vector<8x128xf32> -> vector<8x128xf32>
    %c1_142 = arith.constant 1 : index
    %c0_143 = arith.constant 0 : index
    %c0_144 = arith.constant 0 : index
    %170 = vector.load %arg11[%c1_142, %c0_143, %c0_144] : memref<4x8x16xf32, #tpu.memory_space<vmem>>, vector<1x8x16xf32>
    %171 = vector.shape_cast %170 : vector<1x8x16xf32> to vector<8x16xf32>
    %cst_145 = arith.constant dense<0.000000e+00> : vector<8x128xf32>
    %172 = tpu.matmul %171, %163, %cst_145 {dimension_numbers = #tpu.dot_dimension_numbers<[1], [0], [0], [1], [0, 0, 1, 1], [], []>} : vector<8x16xf32>, vector<16x128xf32>, vector<8x128xf32> -> vector<8x128xf32>
    %c1_146 = arith.constant 1 : index
    %c0_147 = arith.constant 0 : index
    %c0_148 = arith.constant 0 : index
    %173 = vector.load %arg12[%c1_146, %c0_147, %c0_148] : memref<4x128x128xf32, #tpu.memory_space<vmem>>, vector<1x128x128xf32>
    %174 = vector.shape_cast %173 : vector<1x128x128xf32> to vector<128x128xf32>
    %cst_149 = arith.constant dense<0.000000e+00> : vector<8x128xf32>
    %175 = tpu.matmul %172, %174, %cst_149 {dimension_numbers = #tpu.dot_dimension_numbers<[1], [0], [0], [1], [0, 0, 1, 1], [], []>} : vector<8x128xf32>, vector<128x128xf32>, vector<8x128xf32> -> vector<8x128xf32>
    %176 = arith.addf %169, %175 : vector<8x128xf32>
    %c2_150 = arith.constant 2 : index
    %c0_151 = arith.constant 0 : index
    %c0_152 = arith.constant 0 : index
    %177 = vector.load %arg11[%c2_150, %c0_151, %c0_152] : memref<4x8x16xf32, #tpu.memory_space<vmem>>, vector<1x8x16xf32>
    %178 = vector.shape_cast %177 : vector<1x8x16xf32> to vector<8x16xf32>
    %cst_153 = arith.constant dense<0.000000e+00> : vector<8x128xf32>
    %179 = tpu.matmul %178, %163, %cst_153 {dimension_numbers = #tpu.dot_dimension_numbers<[1], [0], [0], [1], [0, 0, 1, 1], [], []>} : vector<8x16xf32>, vector<16x128xf32>, vector<8x128xf32> -> vector<8x128xf32>
    %c2_154 = arith.constant 2 : index
    %c0_155 = arith.constant 0 : index
    %c0_156 = arith.constant 0 : index
    %180 = vector.load %arg12[%c2_154, %c0_155, %c0_156] : memref<4x128x128xf32, #tpu.memory_space<vmem>>, vector<1x128x128xf32>
    %181 = vector.shape_cast %180 : vector<1x128x128xf32> to vector<128x128xf32>
    %cst_157 = arith.constant dense<0.000000e+00> : vector<8x128xf32>
    %182 = tpu.matmul %179, %181, %cst_157 {dimension_numbers = #tpu.dot_dimension_numbers<[1], [0], [0], [1], [0, 0, 1, 1], [], []>} : vector<8x128xf32>, vector<128x128xf32>, vector<8x128xf32> -> vector<8x128xf32>
    %183 = arith.addf %176, %182 : vector<8x128xf32>
    %c3_158 = arith.constant 3 : index
    %c0_159 = arith.constant 0 : index
    %c0_160 = arith.constant 0 : index
    %184 = vector.load %arg11[%c3_158, %c0_159, %c0_160] : memref<4x8x16xf32, #tpu.memory_space<vmem>>, vector<1x8x16xf32>
    %185 = vector.shape_cast %184 : vector<1x8x16xf32> to vector<8x16xf32>
    %cst_161 = arith.constant dense<0.000000e+00> : vector<8x128xf32>
    %186 = tpu.matmul %185, %163, %cst_161 {dimension_numbers = #tpu.dot_dimension_numbers<[1], [0], [0], [1], [0, 0, 1, 1], [], []>} : vector<8x16xf32>, vector<16x128xf32>, vector<8x128xf32> -> vector<8x128xf32>
    %c3_162 = arith.constant 3 : index
    %c0_163 = arith.constant 0 : index
    %c0_164 = arith.constant 0 : index
    %187 = vector.load %arg12[%c3_162, %c0_163, %c0_164] : memref<4x128x128xf32, #tpu.memory_space<vmem>>, vector<1x128x128xf32>
    %188 = vector.shape_cast %187 : vector<1x128x128xf32> to vector<128x128xf32>
    %cst_165 = arith.constant dense<0.000000e+00> : vector<8x128xf32>
    %189 = tpu.matmul %186, %188, %cst_165 {dimension_numbers = #tpu.dot_dimension_numbers<[1], [0], [0], [1], [0, 0, 1, 1], [], []>} : vector<8x128xf32>, vector<128x128xf32>, vector<8x128xf32> -> vector<8x128xf32>
    %190 = arith.addf %183, %189 : vector<8x128xf32>
    %cst_166 = arith.constant dense<0.000000e+00> : vector<128xf32>
    %191 = vector.multi_reduction <add>, %190, %cst_166 [0] : vector<8x128xf32> to vector<128xf32>
    %192 = vector.shape_cast %191 : vector<128xf32> to vector<1x128xf32>
    %193 = arith.mulf %190, %190 : vector<8x128xf32>
    %cst_167 = arith.constant dense<0.000000e+00> : vector<128xf32>
    %194 = vector.multi_reduction <add>, %193, %cst_167 [0] : vector<8x128xf32> to vector<128xf32>
    %195 = vector.shape_cast %194 : vector<128xf32> to vector<1x128xf32>
    %c0_168 = arith.constant 0 : index
    %c0_169 = arith.constant 0 : index
    %196 = vector.load %arg13[%c0_168, %c0_169] : memref<128x128xf32, #tpu.memory_space<vmem>>, vector<128x128xf32>
    %cst_170 = arith.constant dense<0.000000e+00> : vector<1x128xf32>
    %197 = tpu.matmul %192, %196, %cst_170 {dimension_numbers = #tpu.dot_dimension_numbers<[1], [0], [0], [1], [0, 0, 1, 1], [], []>} : vector<1x128xf32>, vector<128x128xf32>, vector<1x128xf32> -> vector<1x128xf32>
    %cst_171 = arith.constant 1.562500e-02 : f32
    %198 = vector.broadcast %cst_171 : f32 to vector<1x128xf32>
    %199 = arith.mulf %197, %198 : vector<1x128xf32>
    %c0_172 = arith.constant 0 : index
    %c0_173 = arith.constant 0 : index
    %200 = vector.load %arg13[%c0_172, %c0_173] : memref<128x128xf32, #tpu.memory_space<vmem>>, vector<128x128xf32>
    %cst_174 = arith.constant dense<0.000000e+00> : vector<1x128xf32>
    %201 = tpu.matmul %195, %200, %cst_174 {dimension_numbers = #tpu.dot_dimension_numbers<[1], [0], [0], [1], [0, 0, 1, 1], [], []>} : vector<1x128xf32>, vector<128x128xf32>, vector<1x128xf32> -> vector<1x128xf32>
    %cst_175 = arith.constant 1.562500e-02 : f32
    %202 = vector.broadcast %cst_175 : f32 to vector<1x128xf32>
    %203 = arith.mulf %201, %202 : vector<1x128xf32>
    %204 = arith.mulf %199, %199 : vector<1x128xf32>
    %205 = arith.subf %203, %204 : vector<1x128xf32>
    %206 = vector.broadcast %199 : vector<1x128xf32> to vector<8x128xf32>
    %207 = arith.subf %190, %206 : vector<8x128xf32>
    %cst_176 = arith.constant 9.99999974E-6 : f32
    %208 = vector.broadcast %cst_176 : f32 to vector<1x128xf32>
    %209 = arith.addf %205, %208 : vector<1x128xf32>
    %210 = math.rsqrt %209 : vector<1x128xf32>
    %211 = vector.broadcast %210 : vector<1x128xf32> to vector<8x128xf32>
    %212 = arith.mulf %207, %211 : vector<8x128xf32>
    %cst_177 = arith.constant 0.000000e+00 : f32
    %213 = vector.broadcast %cst_177 : f32 to vector<8x128xf32>
    %214 = arith.cmpf ogt, %212, %213 : vector<8x128xf32>
    %cst_178 = arith.constant 2.000000e-01 : f32
    %215 = vector.broadcast %cst_178 : f32 to vector<8x128xf32>
    %216 = arith.mulf %215, %212 : vector<8x128xf32>
    %217 = arith.select %214, %212, %216 : vector<8x128xi1>, vector<8x128xf32>
    %c0_179 = arith.constant 0 : index
    %c0_180 = arith.constant 0 : index
    %c0_181 = arith.constant 0 : index
    %218 = vector.load %arg14[%c0_179, %c0_180, %c0_181] : memref<4x4x8xf32, #tpu.memory_space<vmem>>, vector<1x4x8xf32>
    %219 = vector.shape_cast %218 : vector<1x4x8xf32> to vector<4x8xf32>
    %cst_182 = arith.constant dense<0.000000e+00> : vector<4x128xf32>
    %220 = tpu.matmul %219, %217, %cst_182 {dimension_numbers = #tpu.dot_dimension_numbers<[1], [0], [0], [1], [0, 0, 1, 1], [], []>} : vector<4x8xf32>, vector<8x128xf32>, vector<4x128xf32> -> vector<4x128xf32>
    %c0_183 = arith.constant 0 : index
    %c0_184 = arith.constant 0 : index
    %c0_185 = arith.constant 0 : index
    %221 = vector.load %arg15[%c0_183, %c0_184, %c0_185] : memref<4x128x128xf32, #tpu.memory_space<vmem>>, vector<1x128x128xf32>
    %222 = vector.shape_cast %221 : vector<1x128x128xf32> to vector<128x128xf32>
    %cst_186 = arith.constant dense<0.000000e+00> : vector<4x128xf32>
    %223 = tpu.matmul %220, %222, %cst_186 {dimension_numbers = #tpu.dot_dimension_numbers<[1], [0], [0], [1], [0, 0, 1, 1], [], []>} : vector<4x128xf32>, vector<128x128xf32>, vector<4x128xf32> -> vector<4x128xf32>
    %c1_187 = arith.constant 1 : index
    %c0_188 = arith.constant 0 : index
    %c0_189 = arith.constant 0 : index
    %224 = vector.load %arg14[%c1_187, %c0_188, %c0_189] : memref<4x4x8xf32, #tpu.memory_space<vmem>>, vector<1x4x8xf32>
    %225 = vector.shape_cast %224 : vector<1x4x8xf32> to vector<4x8xf32>
    %cst_190 = arith.constant dense<0.000000e+00> : vector<4x128xf32>
    %226 = tpu.matmul %225, %217, %cst_190 {dimension_numbers = #tpu.dot_dimension_numbers<[1], [0], [0], [1], [0, 0, 1, 1], [], []>} : vector<4x8xf32>, vector<8x128xf32>, vector<4x128xf32> -> vector<4x128xf32>
    %c1_191 = arith.constant 1 : index
    %c0_192 = arith.constant 0 : index
    %c0_193 = arith.constant 0 : index
    %227 = vector.load %arg15[%c1_191, %c0_192, %c0_193] : memref<4x128x128xf32, #tpu.memory_space<vmem>>, vector<1x128x128xf32>
    %228 = vector.shape_cast %227 : vector<1x128x128xf32> to vector<128x128xf32>
    %cst_194 = arith.constant dense<0.000000e+00> : vector<4x128xf32>
    %229 = tpu.matmul %226, %228, %cst_194 {dimension_numbers = #tpu.dot_dimension_numbers<[1], [0], [0], [1], [0, 0, 1, 1], [], []>} : vector<4x128xf32>, vector<128x128xf32>, vector<4x128xf32> -> vector<4x128xf32>
    %230 = arith.addf %223, %229 : vector<4x128xf32>
    %c2_195 = arith.constant 2 : index
    %c0_196 = arith.constant 0 : index
    %c0_197 = arith.constant 0 : index
    %231 = vector.load %arg14[%c2_195, %c0_196, %c0_197] : memref<4x4x8xf32, #tpu.memory_space<vmem>>, vector<1x4x8xf32>
    %232 = vector.shape_cast %231 : vector<1x4x8xf32> to vector<4x8xf32>
    %cst_198 = arith.constant dense<0.000000e+00> : vector<4x128xf32>
    %233 = tpu.matmul %232, %217, %cst_198 {dimension_numbers = #tpu.dot_dimension_numbers<[1], [0], [0], [1], [0, 0, 1, 1], [], []>} : vector<4x8xf32>, vector<8x128xf32>, vector<4x128xf32> -> vector<4x128xf32>
    %c2_199 = arith.constant 2 : index
    %c0_200 = arith.constant 0 : index
    %c0_201 = arith.constant 0 : index
    %234 = vector.load %arg15[%c2_199, %c0_200, %c0_201] : memref<4x128x128xf32, #tpu.memory_space<vmem>>, vector<1x128x128xf32>
    %235 = vector.shape_cast %234 : vector<1x128x128xf32> to vector<128x128xf32>
    %cst_202 = arith.constant dense<0.000000e+00> : vector<4x128xf32>
    %236 = tpu.matmul %233, %235, %cst_202 {dimension_numbers = #tpu.dot_dimension_numbers<[1], [0], [0], [1], [0, 0, 1, 1], [], []>} : vector<4x128xf32>, vector<128x128xf32>, vector<4x128xf32> -> vector<4x128xf32>
    %237 = arith.addf %230, %236 : vector<4x128xf32>
    %c3_203 = arith.constant 3 : index
    %c0_204 = arith.constant 0 : index
    %c0_205 = arith.constant 0 : index
    %238 = vector.load %arg14[%c3_203, %c0_204, %c0_205] : memref<4x4x8xf32, #tpu.memory_space<vmem>>, vector<1x4x8xf32>
    %239 = vector.shape_cast %238 : vector<1x4x8xf32> to vector<4x8xf32>
    %cst_206 = arith.constant dense<0.000000e+00> : vector<4x128xf32>
    %240 = tpu.matmul %239, %217, %cst_206 {dimension_numbers = #tpu.dot_dimension_numbers<[1], [0], [0], [1], [0, 0, 1, 1], [], []>} : vector<4x8xf32>, vector<8x128xf32>, vector<4x128xf32> -> vector<4x128xf32>
    %c3_207 = arith.constant 3 : index
    %c0_208 = arith.constant 0 : index
    %c0_209 = arith.constant 0 : index
    %241 = vector.load %arg15[%c3_207, %c0_208, %c0_209] : memref<4x128x128xf32, #tpu.memory_space<vmem>>, vector<1x128x128xf32>
    %242 = vector.shape_cast %241 : vector<1x128x128xf32> to vector<128x128xf32>
    %cst_210 = arith.constant dense<0.000000e+00> : vector<4x128xf32>
    %243 = tpu.matmul %240, %242, %cst_210 {dimension_numbers = #tpu.dot_dimension_numbers<[1], [0], [0], [1], [0, 0, 1, 1], [], []>} : vector<4x128xf32>, vector<128x128xf32>, vector<4x128xf32> -> vector<4x128xf32>
    %244 = arith.addf %237, %243 : vector<4x128xf32>
    %cst_211 = arith.constant dense<0.000000e+00> : vector<128xf32>
    %245 = vector.multi_reduction <add>, %244, %cst_211 [0] : vector<4x128xf32> to vector<128xf32>
    %246 = vector.shape_cast %245 : vector<128xf32> to vector<1x128xf32>
    %247 = arith.mulf %244, %244 : vector<4x128xf32>
    %cst_212 = arith.constant dense<0.000000e+00> : vector<128xf32>
    %248 = vector.multi_reduction <add>, %247, %cst_212 [0] : vector<4x128xf32> to vector<128xf32>
    %249 = vector.shape_cast %248 : vector<128xf32> to vector<1x128xf32>
    %c0_213 = arith.constant 0 : index
    %c0_214 = arith.constant 0 : index
    %250 = vector.load %arg16[%c0_213, %c0_214] : memref<128x128xf32, #tpu.memory_space<vmem>>, vector<128x128xf32>
    %cst_215 = arith.constant dense<0.000000e+00> : vector<1x128xf32>
    %251 = tpu.matmul %246, %250, %cst_215 {dimension_numbers = #tpu.dot_dimension_numbers<[1], [0], [0], [1], [0, 0, 1, 1], [], []>} : vector<1x128xf32>, vector<128x128xf32>, vector<1x128xf32> -> vector<1x128xf32>
    %cst_216 = arith.constant 6.250000e-02 : f32
    %252 = vector.broadcast %cst_216 : f32 to vector<1x128xf32>
    %253 = arith.mulf %251, %252 : vector<1x128xf32>
    %c0_217 = arith.constant 0 : index
    %c0_218 = arith.constant 0 : index
    %254 = vector.load %arg16[%c0_217, %c0_218] : memref<128x128xf32, #tpu.memory_space<vmem>>, vector<128x128xf32>
    %cst_219 = arith.constant dense<0.000000e+00> : vector<1x128xf32>
    %255 = tpu.matmul %249, %254, %cst_219 {dimension_numbers = #tpu.dot_dimension_numbers<[1], [0], [0], [1], [0, 0, 1, 1], [], []>} : vector<1x128xf32>, vector<128x128xf32>, vector<1x128xf32> -> vector<1x128xf32>
    %cst_220 = arith.constant 6.250000e-02 : f32
    %256 = vector.broadcast %cst_220 : f32 to vector<1x128xf32>
    %257 = arith.mulf %255, %256 : vector<1x128xf32>
    %258 = arith.mulf %253, %253 : vector<1x128xf32>
    %259 = arith.subf %257, %258 : vector<1x128xf32>
    %260 = vector.broadcast %253 : vector<1x128xf32> to vector<4x128xf32>
    %261 = arith.subf %244, %260 : vector<4x128xf32>
    %cst_221 = arith.constant 9.99999974E-6 : f32
    %262 = vector.broadcast %cst_221 : f32 to vector<1x128xf32>
    %263 = arith.addf %259, %262 : vector<1x128xf32>
    %264 = math.rsqrt %263 : vector<1x128xf32>
    %265 = vector.broadcast %264 : vector<1x128xf32> to vector<4x128xf32>
    %266 = arith.mulf %261, %265 : vector<4x128xf32>
    %cst_222 = arith.constant 0.000000e+00 : f32
    %267 = vector.broadcast %cst_222 : f32 to vector<4x128xf32>
    %268 = arith.cmpf ogt, %266, %267 : vector<4x128xf32>
    %cst_223 = arith.constant 2.000000e-01 : f32
    %269 = vector.broadcast %cst_223 : f32 to vector<4x128xf32>
    %270 = arith.mulf %269, %266 : vector<4x128xf32>
    %271 = arith.select %268, %266, %270 : vector<4x128xi1>, vector<4x128xf32>
    %c0_224 = arith.constant 0 : index
    %c0_225 = arith.constant 0 : index
    %272 = vector.load %arg17[%c0_224, %c0_225] : memref<4x128xf32, #tpu.memory_space<vmem>>, vector<4x128xf32>
    %273 = arith.mulf %271, %272 : vector<4x128xf32>
    %cst_226 = arith.constant dense<0.000000e+00> : vector<128xf32>
    %274 = vector.multi_reduction <add>, %273, %cst_226 [0] : vector<4x128xf32> to vector<128xf32>
    %275 = vector.shape_cast %274 : vector<128xf32> to vector<1x128xf32>
    %c0_227 = arith.constant 0 : index
    %c0_228 = arith.constant 0 : index
    %276 = vector.load %arg18[%c0_227, %c0_228] : memref<128x32xf32, #tpu.memory_space<vmem>>, vector<128x32xf32>
    %cst_229 = arith.constant dense<0.000000e+00> : vector<1x32xf32>
    %277 = tpu.matmul %275, %276, %cst_229 {dimension_numbers = #tpu.dot_dimension_numbers<[1], [0], [0], [1], [0, 0, 1, 1], [], []>} : vector<1x128xf32>, vector<128x32xf32>, vector<1x32xf32> -> vector<1x32xf32>
    %c0_230 = arith.constant 0 : index
    %c0_231 = arith.constant 0 : index
    %c0_232 = arith.constant 0 : index
    %278 = vector.load %arg24[%c0_230, %c0_231, %c0_232] : memref<1x1x32xf32, #tpu.memory_space<vmem>>, vector<1x1x32xf32>
    %279 = vector.shape_cast %278 : vector<1x1x32xf32> to vector<1x32xf32>
    %280 = vector.shape_cast %277 : vector<1x32xf32> to vector<1x1x32xf32>
    tpu.vector_store %arg24[%c0_230, %c0_231, %c0_232], %280 {strides = array<i32>} : memref<1x1x32xf32, #tpu.memory_space<vmem>>, vector<1x1x32xf32>,
    %cst_233 = arith.constant dense<0.000000e+00> : vector<1xf32>
    %281 = vector.multi_reduction <add>, %277, %cst_233 [1] : vector<1x32xf32> to vector<1xf32>
    %282 = vector.shape_cast %281 : vector<1xf32> to vector<1x1xf32>
    %cst_234 = arith.constant 3.200000e+01 : f32
    %283 = vector.broadcast %cst_234 : f32 to vector<1x1xf32>
    %284 = arith.divf %282, %283 : vector<1x1xf32>
    %285 = arith.mulf %277, %277 : vector<1x32xf32>
    %cst_235 = arith.constant dense<0.000000e+00> : vector<1xf32>
    %286 = vector.multi_reduction <add>, %285, %cst_235 [1] : vector<1x32xf32> to vector<1xf32>
    %287 = vector.shape_cast %286 : vector<1xf32> to vector<1x1xf32>
    %cst_236 = arith.constant 3.200000e+01 : f32
    %288 = vector.broadcast %cst_236 : f32 to vector<1x1xf32>
    %289 = arith.divf %287, %288 : vector<1x1xf32>
    %290 = vector.broadcast %284 : vector<1x1xf32> to vector<1x32xf32>
    %291 = arith.subf %277, %290 : vector<1x32xf32>
    %292 = arith.mulf %284, %284 : vector<1x1xf32>
    %293 = arith.subf %289, %292 : vector<1x1xf32>
    %cst_237 = arith.constant 9.99999974E-6 : f32
    %294 = vector.broadcast %cst_237 : f32 to vector<1x1xf32>
    %295 = arith.addf %293, %294 : vector<1x1xf32>
    %296 = math.rsqrt %295 : vector<1x1xf32>
    %297 = vector.broadcast %296 : vector<1x1xf32> to vector<1x32xf32>
    %298 = arith.mulf %291, %297 : vector<1x32xf32>
    %c0_238 = arith.constant 0 : index
    %c0_239 = arith.constant 0 : index
    %299 = vector.load %arg19[%c0_238, %c0_239] : memref<1x32xf32, #tpu.memory_space<vmem>>, vector<1x32xf32>
    %300 = arith.mulf %298, %299 : vector<1x32xf32>
    %c0_240 = arith.constant 0 : index
    %c0_241 = arith.constant 0 : index
    %301 = vector.load %arg20[%c0_240, %c0_241] : memref<1x32xf32, #tpu.memory_space<vmem>>, vector<1x32xf32>
    %302 = arith.addf %300, %301 : vector<1x32xf32>
    %cst_242 = arith.constant 0.000000e+00 : f32
    %303 = vector.broadcast %cst_242 : f32 to vector<1x32xf32>
    %304 = arith.cmpf ogt, %302, %303 : vector<1x32xf32>
    %cst_243 = arith.constant 2.000000e-01 : f32
    %305 = vector.broadcast %cst_243 : f32 to vector<1x32xf32>
    %306 = arith.mulf %305, %302 : vector<1x32xf32>
    %307 = arith.select %304, %302, %306 : vector<1x32xi1>, vector<1x32xf32>
    %c0_244 = arith.constant 0 : index
    %c0_245 = arith.constant 0 : index
    %308 = vector.load %arg21[%c0_244, %c0_245] : memref<1x32xf32, #tpu.memory_space<vmem>>, vector<1x32xf32>
    %309 = arith.mulf %307, %308 : vector<1x32xf32>
    %cst_246 = arith.constant dense<0.000000e+00> : vector<1xf32>
    %310 = vector.multi_reduction <add>, %309, %cst_246 [1] : vector<1x32xf32> to vector<1xf32>
    %311 = vector.shape_cast %310 : vector<1xf32> to vector<1x1xf32>
    %c0_247 = arith.constant 0 : index
    %c0_248 = arith.constant 0 : index
    %312 = vector.load %arg22[%c0_247, %c0_248] : memref<1x1xf32, #tpu.memory_space<vmem>>, vector<1x1xf32>
    %313 = arith.addf %311, %312 : vector<1x1xf32>
    %c0_249 = arith.constant 0 : index
    %c0_250 = arith.constant 0 : index
    %c0_251 = arith.constant 0 : index
    %314 = vector.load %arg23[%c0_249, %c0_250, %c0_251] : memref<1x1x1xf32, #tpu.memory_space<vmem>>, vector<1x1x1xf32>
    %315 = vector.shape_cast %314 : vector<1x1x1xf32> to vector<1x1xf32>
    %316 = vector.shape_cast %313 : vector<1x1xf32> to vector<1x1x1xf32>
    tpu.vector_store %arg23[%c0_249, %c0_250, %c0_251], %316 {strides = array<i32>} : memref<1x1x1xf32, #tpu.memory_space<vmem>>, vector<1x1x1xf32>,
    return
  }
  func.func @transform_0(%arg0: i32) -> (i32, i32, i32, i32) {
    %c0_i32 = arith.constant 0 : i32
    %c0_i32_0 = arith.constant 0 : i32
    %c0_i32_1 = arith.constant 0 : i32
    %c0_i32_2 = arith.constant 0 : i32
    return %arg0, %c0_i32, %c0_i32_0, %c0_i32_1 : i32, i32, i32, i32
  }
  func.func @transform_1(%arg0: i32) -> (i32, i32, i32) {
    %c0_i32 = arith.constant 0 : i32
    %c0_i32_0 = arith.constant 0 : i32
    %c0_i32_1 = arith.constant 0 : i32
    %c0_i32_2 = arith.constant 0 : i32
    return %c0_i32, %c0_i32_0, %c0_i32_1 : i32, i32, i32
  }
  func.func @transform_2(%arg0: i32) -> (i32, i32, i32) {
    %c0_i32 = arith.constant 0 : i32
    %c0_i32_0 = arith.constant 0 : i32
    %c0_i32_1 = arith.constant 0 : i32
    %c0_i32_2 = arith.constant 0 : i32
    return %c0_i32, %c0_i32_0, %c0_i32_1 : i32, i32, i32
  }
  func.func @transform_3(%arg0: i32) -> (i32, i32) {
    %c0_i32 = arith.constant 0 : i32
    %c0_i32_0 = arith.constant 0 : i32
    %c0_i32_1 = arith.constant 0 : i32
    return %c0_i32, %c0_i32_0 : i32, i32
  }
  func.func @transform_4(%arg0: i32) -> (i32, i32, i32) {
    %c0_i32 = arith.constant 0 : i32
    %c0_i32_0 = arith.constant 0 : i32
    %c0_i32_1 = arith.constant 0 : i32
    %c0_i32_2 = arith.constant 0 : i32
    return %c0_i32, %c0_i32_0, %c0_i32_1 : i32, i32, i32
  }
  func.func @transform_5(%arg0: i32) -> (i32, i32, i32) {
    %c0_i32 = arith.constant 0 : i32
    %c0_i32_0 = arith.constant 0 : i32
    %c0_i32_1 = arith.constant 0 : i32
    %c0_i32_2 = arith.constant 0 : i32
    return %c0_i32, %c0_i32_0, %c0_i32_1 : i32, i32, i32
  }
  func.func @transform_6(%arg0: i32) -> (i32, i32) {
    %c0_i32 = arith.constant 0 : i32
    %c0_i32_0 = arith.constant 0 : i32
    %c0_i32_1 = arith.constant 0 : i32
    return %c0_i32, %c0_i32_0 : i32, i32
  }
  func.func @transform_7(%arg0: i32) -> (i32, i32, i32) {
    %c0_i32 = arith.constant 0 : i32
    %c0_i32_0 = arith.constant 0 : i32
    %c0_i32_1 = arith.constant 0 : i32
    %c0_i32_2 = arith.constant 0 : i32
    return %c0_i32, %c0_i32_0, %c0_i32_1 : i32, i32, i32
  }
  func.func @transform_8(%arg0: i32) -> (i32, i32, i32) {
    %c0_i32 = arith.constant 0 : i32
    %c0_i32_0 = arith.constant 0 : i32
    %c0_i32_1 = arith.constant 0 : i32
    %c0_i32_2 = arith.constant 0 : i32
    return %c0_i32, %c0_i32_0, %c0_i32_1 : i32, i32, i32
  }
  func.func @transform_9(%arg0: i32) -> (i32, i32) {
    %c0_i32 = arith.constant 0 : i32
    %c0_i32_0 = arith.constant 0 : i32
    %c0_i32_1 = arith.constant 0 : i32
    return %c0_i32, %c0_i32_0 : i32, i32
  }
  func.func @transform_10(%arg0: i32) -> (i32, i32, i32) {
    %c0_i32 = arith.constant 0 : i32
    %c0_i32_0 = arith.constant 0 : i32
    %c0_i32_1 = arith.constant 0 : i32
    %c0_i32_2 = arith.constant 0 : i32
    return %c0_i32, %c0_i32_0, %c0_i32_1 : i32, i32, i32
  }
  func.func @transform_11(%arg0: i32) -> (i32, i32, i32) {
    %c0_i32 = arith.constant 0 : i32
    %c0_i32_0 = arith.constant 0 : i32
    %c0_i32_1 = arith.constant 0 : i32
    %c0_i32_2 = arith.constant 0 : i32
    return %c0_i32, %c0_i32_0, %c0_i32_1 : i32, i32, i32
  }
  func.func @transform_12(%arg0: i32) -> (i32, i32) {
    %c0_i32 = arith.constant 0 : i32
    %c0_i32_0 = arith.constant 0 : i32
    %c0_i32_1 = arith.constant 0 : i32
    return %c0_i32, %c0_i32_0 : i32, i32
  }
  func.func @transform_13(%arg0: i32) -> (i32, i32, i32) {
    %c0_i32 = arith.constant 0 : i32
    %c0_i32_0 = arith.constant 0 : i32
    %c0_i32_1 = arith.constant 0 : i32
    %c0_i32_2 = arith.constant 0 : i32
    return %c0_i32, %c0_i32_0, %c0_i32_1 : i32, i32, i32
  }
  func.func @transform_14(%arg0: i32) -> (i32, i32, i32) {
    %c0_i32 = arith.constant 0 : i32
    %c0_i32_0 = arith.constant 0 : i32
    %c0_i32_1 = arith.constant 0 : i32
    %c0_i32_2 = arith.constant 0 : i32
    return %c0_i32, %c0_i32_0, %c0_i32_1 : i32, i32, i32
  }
  func.func @transform_15(%arg0: i32) -> (i32, i32) {
    %c0_i32 = arith.constant 0 : i32
    %c0_i32_0 = arith.constant 0 : i32
    %c0_i32_1 = arith.constant 0 : i32
    return %c0_i32, %c0_i32_0 : i32, i32
  }
  func.func @transform_16(%arg0: i32) -> (i32, i32) {
    %c0_i32 = arith.constant 0 : i32
    %c0_i32_0 = arith.constant 0 : i32
    %c0_i32_1 = arith.constant 0 : i32
    return %c0_i32, %c0_i32_0 : i32, i32
  }
  func.func @transform_17(%arg0: i32) -> (i32, i32) {
    %c0_i32 = arith.constant 0 : i32
    %c0_i32_0 = arith.constant 0 : i32
    %c0_i32_1 = arith.constant 0 : i32
    return %c0_i32, %c0_i32_0 : i32, i32
  }
  func.func @transform_18(%arg0: i32) -> (i32, i32) {
    %c0_i32 = arith.constant 0 : i32
    %c0_i32_0 = arith.constant 0 : i32
    %c0_i32_1 = arith.constant 0 : i32
    return %c0_i32, %c0_i32_0 : i32, i32
  }
  func.func @transform_19(%arg0: i32) -> (i32, i32) {
    %c0_i32 = arith.constant 0 : i32
    %c0_i32_0 = arith.constant 0 : i32
    %c0_i32_1 = arith.constant 0 : i32
    return %c0_i32, %c0_i32_0 : i32, i32
  }
  func.func @transform_20(%arg0: i32) -> (i32, i32) {
    %c0_i32 = arith.constant 0 : i32
    %c0_i32_0 = arith.constant 0 : i32
    %c0_i32_1 = arith.constant 0 : i32
    return %c0_i32, %c0_i32_0 : i32, i32
  }
  func.func @transform_21(%arg0: i32) -> (i32, i32) {
    %c0_i32 = arith.constant 0 : i32
    %c0_i32_0 = arith.constant 0 : i32
    %c0_i32_1 = arith.constant 0 : i32
    return %c0_i32, %c0_i32_0 : i32, i32
  }
  func.func @transform_22(%arg0: i32) -> (i32, i32, i32) {
    %c0_i32 = arith.constant 0 : i32
    %c0_i32_0 = arith.constant 0 : i32
    %c0_i32_1 = arith.constant 0 : i32
    return %arg0, %c0_i32, %c0_i32_0 : i32, i32, i32
  }
  func.func @transform_23(%arg0: i32) -> (i32, i32, i32) {
    %c0_i32 = arith.constant 0 : i32
    %c0_i32_0 = arith.constant 0 : i32
    %c0_i32_1 = arith.constant 0 : i32
    return %arg0, %c0_i32, %c0_i32_0 : i32, i32, i32
  }
}

</mosaic_0001>

<bundles_post_ra>
// kernel: discriminator_forward.1
= control target key start
LH: loop header
LB: loop body
LE: loop exit
PB: predicated region body
PF: predicated region fallthrough
CT: control target
= control target key end

     0   :  { %s11835_s0 = inlined_call_operand.hbm [shape: f32[2,1,128,128], index: 0, kind: input, shape index: {}]   ;;  %s11836_s1 = inlined_call_operand.hbm [shape: f32[4,64,128], index: 1, kind: input, shape index: {}]   ;;  %s11837_s2 = inlined_call_operand.hbm [shape: f32[4,128,128], index: 2, kind: input, shape index: {}]   ;;  %s11838_s3 = inlined_call_operand.vmem [shape: f32[128,128], index: 3, kind: input, shape index: {}]   ;;  %s11839_s4 = inlined_call_operand.hbm [shape: f32[4,32,64], index: 4, kind: input, shape index: {}]   ;;  %s11840_s5 = inlined_call_operand.hbm [shape: f32[4,128,128], index: 5, kind: input, shape index: {}]   ;;  %s11841_s6 = inlined_call_operand.hbm [shape: f32[128,128], index: 6, kind: input, shape index: {}]   ;;  %s11842_s7 = inlined_call_operand.vmem [shape: f32[4,16,32], index: 7, kind: input, shape index: {}]   ;;  %s11843_s8 = inlined_call_operand.hbm [shape: f32[4,128,128], index: 8, kind: input, shape index: {}]   ;;  %s11844_s9 = inlined_call_operand.hbm [shape: f32[128,128], index: 9, kind: input, shape index: {}]   ;;  %s11845_s10 = inlined_call_operand.vmem [shape: f32[4,8,16], index: 10, kind: input, shape index: {}]   ;;  %s11846_s11 = inlined_call_operand.hbm [shape: f32[4,128,128], index: 11, kind: input, shape index: {}]   ;;  %s11847_s12 = inlined_call_operand.hbm [shape: f32[128,128], index: 12, kind: input, shape index: {}]   ;;  %s11848_s13 = inlined_call_operand.hbm [shape: f32[4,4,8], index: 13, kind: input, shape index: {}]   ;;  %s11849_s14 = inlined_call_operand.hbm [shape: f32[4,128,128], index: 14, kind: input, shape index: {}]   ;;  %s11850_s15 = inlined_call_operand.hbm [shape: f32[128,128], index: 15, kind: input, shape index: {}]   ;;  %s11851_s16 = inlined_call_operand.vmem [shape: f32[4,128], index: 16, kind: input, shape index: {}]   ;;  %s11852_s17 = inlined_call_operand.vmem [shape: f32[128,32], index: 17, kind: input, shape index: {}]   ;;  %s11853_s18 = inlined_call_operand.hbm [shape: f32[1,32], index: 18, kind: input, shape index: {}]   ;;  %s11854_s19 = inlined_call_operand.hbm [shape: f32[1,32], index: 19, kind: input, shape index: {}]   ;;  %s11855_s20 = inlined_call_operand.hbm [shape: f32[1,32], index: 20, kind: input, shape index: {}]   ;;  %s11856_s21 = inlined_call_operand.<no memory space> [shape: f32[1,1], index: 21, kind: input, shape index: {}]   ;;  %s11857_s22 = inlined_call_operand.vmem [shape: f32[2,1,1], index: 22, kind: output, shape index: {0}]   ;;  %s11858_s23 = inlined_call_operand.hbm [shape: f32[2,1,32], index: 23, kind: output, shape index: {1}]  }
   0x1   :  { %11888 = sst [smem:[#allocation43_spill]] %s11835_s0  ;;  %v29_v0 = vstv %s11856_s21 }
   0x2   :  { %11889 = sst [smem:[#allocation44_spill]] %s11836_s1  ;;  %30 = vst [vmem:[#allocation2] sm:$0x1] %v29_v0 }
   0x3   :  { %11890 = sst [smem:[#allocation45_spill]] %s11837_s2 }
   0x4   :  { %11891 = sst [smem:[#allocation46_spill]] %s11838_s3 }
   0x5   :  { %11892 = sst [smem:[#allocation47_spill]] %s11839_s4 }
   0x6   :  { %11893 = sst [smem:[#allocation48_spill]] %s11840_s5 }
   0x7   :  { %11894 = sst [smem:[#allocation49_spill]] %s11841_s6 }
   0x8   :  { %11895 = sst [smem:[#allocation50_spill]] %s11842_s7 }
   0x9   :  { %11896 = sst [smem:[#allocation51_spill]] %s11843_s8 }
   0xa   :  { %11897 = sst [smem:[#allocation52_spill]] %s11844_s9 }
   0xb   :  { %11898 = sst [smem:[#allocation53_spill]] %s11845_s10 }
   0xc   :  { %11899 = sst [smem:[#allocation54_spill]] %s11846_s11 }
   0xd   :  { %11900 = sst [smem:[#allocation55_spill]] %s11851_s16 }
   0xe   :  { %11901 = sst [smem:[#allocation56_spill]] %s11852_s17 }
   0xf   :  { %11902 = sst [smem:[#allocation57_spill]] %s11857_s22 }
  0x10   :  { %11903 = sst [smem:[#allocation58_spill]] %s11858_s23 }
  0x11   :  { %31 = vsyncpa [#allocation4], 0 }
  0x12   :  { %33 = vsyncpa [#allocation4 + $0x1], 0 }
  0x13   :  { %34 = vsyncpa [#allocation7], 0 }
  0x14   :  { %35 = vsyncpa [#allocation10], 0 }
  0x15   :  { %36 = vsyncpa [#allocation13], 0 }
  0x16   :  { %37 = vsyncpa [#allocation16], 0 }
  0x17   :  { %38 = vsyncpa [#allocation19], 0 }
  0x18   :  { %39 = vsyncpa [#allocation22], 0 }
  0x19   :  { %40 = vsyncpa [#allocation25], 0 }
  0x1a   :  { %41 = vsyncpa [#allocation28], 0 }
  0x1b   :  { %42 = vsyncpa [#allocation5], 0 }
  0x1c   :  { %44 = vsyncpa [#allocation5 + $0x1], 0  ;;  %s10534_s24 = smov 0   ;;  %s10536_s25 = smov 0  }
  0x1d   :  { %s10538_s5 = smov 0   ;;  %s10540_s21 = smov 0  }
  0x1e LB: > { %11904 = sst [smem:[#allocation40_spill]] %s10373_s24  ;;  %s10387_s1 = smov [#allocation6]   ;;  %s10385_s21 = sphi %s10540_s21, %s11961_s21   ;;  %s10381_s5 = sphi %s10538_s5, %s11960_s5   ;;  %s10377_s25 = sphi %s10536_s25, %s11959_s25   ;;  %s10373_s24 = sphi %s10534_s24, %s11958_s24  }
  0x1f   : > { %s586_s26 = sshll.u32 %s10387_s1, 4  ;;  %s10555_s2 = sadd.s32 4294967295, %s10385_s21   ;;  %s10560_s26 = int_to_ptr.vmem [resolvable:$true] %s586_s26 }
  0x20   : > { %11905 = sst [smem:[#allocation41_spill]] %s10555_s2  ;;  %p6161_p0 = scmp.ge.s32.totalorder %s10385_s21, 1 }
  0x21   : > { %p11876_p1 = scmp.eq.s32.totalorder %s10555_s2, 0  ;;  %p574_p2 = scmp.lt.s32.totalorder %s10385_s21, 3 }
  0x22   : > { %s10388_s27 = smov [#allocation9]   ;;  %s10389_s29 = smov [#allocation12]  }
  0x23   : > { %p10562_p3 = pnand %p6161_p0, %p574_p2  ;;  %s615_s7 = sshll.u32 %s10388_s27, 4  ;;  %s10575_s7 = int_to_ptr.vmem [resolvable:$true] %s615_s7 }
  0x24   : > { %s641_s3 = sshll.u32 %s10389_s29, 4  ;;  %s11909_s30 = sld [smem:[#allocation44_spill]]  ;;  %s10577_s3 = int_to_ptr.vmem [resolvable:$true] %s641_s3 }
  0x25   : > { %s11906_s6 = scalar_select %p10562_p3, 1, 0 }
  0x26   : > { %p9685_p5 = pneg %p10562_p3 }
  0x27   : > { %11907 = sst [smem:[#allocation42_spill]] %s11906_s6 }
  0x28   : > { %p10571_p6 = pnand %p9685_p5, %p11876_p1 }
  0x2a   : > { %s9837_s1 = scalar_lea.hbm %s11909_s30, 4096  ;;  %p10587_p8 = pneg %p10571_p6 }
  0x2b   : > { %p9838_p7 = scmp.ne.s32.totalorder %s11909_s30, %s9837_s1  ;;  %p9844_p11 = scmp.lt.u32.totalorder %s9837_s1, %s11909_s30 }
  0x2d   : > { %p9840_p9 = pnand %p10587_p8, %p9838_p7 }
  0x2f   : > { %p9841_p10 = pneg %p9840_p9 }
  0x31   : > { %p9846_p12 = pnand %p9844_p11, %p9841_p10 }
  0x33   : > { %9849 = shalt.err (!%p9846_p12)
}
  0x34   : > { %s9850_s22 = scalar_lea.vmem %s10560_s26, 4096  ;;  %p9858_p5 = scmp.lt.s32.totalorder %s10560_s26, %s10560_s26 }
  0x35   : > { %p9851_p13 = scmp.ne.s32.totalorder %s10560_s26, %s9850_s22  ;;  %p9859_p4 = scmp.lt.s32.totalorder %s9850_s22, %s9850_s22 }
  0x37   : > { %p9853_p0 = pnand %p9851_p13, %p10587_p8  ;;  %p9860_p7 = por %p9859_p4, %p9858_p5 }
  0x39   : > { %p9854_p2 = pneg %p9853_p0 }
  0x3b   : > { %p9861_p9 = pnand %p9860_p7, %p9854_p2 }
  0x3d   : > { %9864 = shalt.err (!%p9861_p9)
}
  0x3e   : > { %s11878_s23 = smov 128   ;;  %s11882_s16 = smov 8  }
  0x3f   : > { %9688 = dma.hbm_to_vmem [thread:$0]  (!%p10571_p6), %s11909_s30, 4096, %s10560_s26, [#allocation7], %s11878_s23, %s11878_s23, %s11882_s16  }
  0x40   : > { %s11911_s17 = sld [smem:[#allocation47_spill]] }
  0x46   : > { %s9865_s22 = scalar_lea.hbm %s11911_s17, 2048 }
  0x47   : > { %p9866_p4 = scmp.ne.s32.totalorder %s11911_s17, %s9865_s22  ;;  %p9872_p12 = scmp.lt.u32.totalorder %s9865_s22, %s11911_s17 }
  0x49   : > { %p9868_p10 = pnand %p9866_p4, %p10587_p8 }
  0x4b   : > { %p9869_p11 = pneg %p9868_p10 }
  0x4d   : > { %p9874_p13 = pnand %p9872_p12, %p9869_p11 }
  0x4f   : > { %9877 = shalt.err (!%p9874_p13)
}
  0x50   : > { %s9878_s26 = scalar_lea.vmem %s10575_s7, 2048  ;;  %p9886_p7 = scmp.lt.s32.totalorder %s10575_s7, %s10575_s7 }
  0x51   : > { %p9879_p0 = scmp.ne.s32.totalorder %s10575_s7, %s9878_s26  ;;  %p9887_p9 = scmp.lt.s32.totalorder %s9878_s26, %s9878_s26 }
  0x53   : > { %p9881_p2 = pnand %p9879_p0, %p10587_p8  ;;  %p9888_p4 = por %p9887_p9, %p9886_p7 }
  0x55   : > { %p9882_p5 = pneg %p9881_p2 }
  0x57   : > { %p9889_p10 = pnand %p9888_p4, %p9882_p5 }
  0x59   : > { %9892 = shalt.err (!%p9889_p10)
}
  0x5a   : > { %9694 = dma.hbm_to_vmem [thread:$0]  (!%p10571_p6), %s11911_s17, 2048, %s10575_s7, [#allocation10], %s11878_s23, %s11878_s23, %s11882_s16  }
  0x5b   : > { %s11912_s0 = sld [smem:[#allocation49_spill]] }
  0x61   : > { %s9893_s4 = scalar_lea.hbm %s11912_s0, 2048 }
  0x62   : > { %p9894_p11 = scmp.ne.s32.totalorder %s11912_s0, %s9893_s4  ;;  %p9900_p0 = scmp.lt.u32.totalorder %s9893_s4, %s11912_s0 }
  0x64   : > { %p9896_p12 = pnand %p9894_p11, %p10587_p8 }
  0x66   : > { %p9897_p13 = pneg %p9896_p12 }
  0x68   : > { %p9902_p2 = pnand %p9900_p0, %p9897_p13 }
  0x6a   : > { %9905 = shalt.err (!%p9902_p2)
}
  0x6b   : > { %s9906_s7 = scalar_lea.vmem %s10577_s3, 2048  ;;  %p9914_p4 = scmp.lt.s32.totalorder %s10577_s3, %s10577_s3 }
  0x6c   : > { %p9907_p5 = scmp.ne.s32.totalorder %s10577_s3, %s9906_s7  ;;  %p9915_p10 = scmp.lt.s32.totalorder %s9906_s7, %s9906_s7 }
  0x6e   : > { %p9909_p7 = pnand %p9907_p5, %p10587_p8  ;;  %p9916_p11 = por %p9915_p10, %p9914_p4 }
  0x70   : > { %p9910_p9 = pneg %p9909_p7 }
  0x72   : > { %p9917_p12 = pnand %p9916_p11, %p9910_p9 }
  0x74   : > { %9920 = shalt.err (!%p9917_p12)
}
  0x75   : > { %9700 = dma.hbm_to_vmem [thread:$0]  (!%p10571_p6), %s11912_s0, 2048, %s10577_s3, [#allocation13], %s11878_s23, %s11878_s23, %s11882_s16  }
  0x76   : > { %s10392_s2 = smov [#allocation15]   ;;  %s10393_s4 = smov [#allocation18]  }
  0x77   : > { %s670_s6 = sshll.u32 %s10392_s2, 4  ;;  %s699_s1 = sshll.u32 %s10393_s4, 4  ;;  %s671_s6 = int_to_ptr.vmem [resolvable:$true] %s670_s6  ;;  %s700_s1 = int_to_ptr.vmem [resolvable:$true] %s699_s1 }
  0x78   : > { %s11913_s9 = sld [smem:[#allocation52_spill]] }
  0x7e   : > { %s9921_s26 = scalar_lea.hbm %s11913_s9, 2048 }
  0x7f   : > { %p9922_p13 = scmp.ne.s32.totalorder %s11913_s9, %s9921_s26  ;;  %p9928_p5 = scmp.lt.u32.totalorder %s9921_s26, %s11913_s9 }
  0x81   : > { %p9924_p0 = pnand %p9922_p13, %p10587_p8 }
  0x83   : > { %p9925_p2 = pneg %p9924_p0 }
  0x85   : > { %p9930_p7 = pnand %p9928_p5, %p9925_p2 }
  0x87   : > { %9933 = shalt.err (!%p9930_p7)
}
  0x88   : > { %s9934_s3 = scalar_lea.vmem %s671_s6, 2048  ;;  %p9942_p11 = scmp.lt.s32.totalorder %s671_s6, %s671_s6 }
  0x89   : > { %p9935_p9 = scmp.ne.s32.totalorder %s671_s6, %s9934_s3  ;;  %p9943_p12 = scmp.lt.s32.totalorder %s9934_s3, %s9934_s3 }
  0x8b   : > { %p9937_p4 = pnand %p9935_p9, %p10587_p8  ;;  %p9944_p1 = por %p9943_p12, %p9942_p11 }
  0x8d   : > { %p9938_p10 = pneg %p9937_p4 }
  0x8f   : > { %p9945_p3 = pnand %p9944_p1, %p9938_p10 }
  0x91   : > { %9948 = shalt.err (!%p9945_p3)
}
  0x92   : > { %9706 = dma.hbm_to_vmem [thread:$0]  (!%p10571_p6), %s11913_s9, 2048, %s671_s6, [#allocation16], %s11878_s23, %s11878_s23, %s11882_s16  }
  0x93   : > { %s9949_s4 = scalar_lea.hbm %s11847_s12, 2048 }
  0x94   : > { %p9950_p1 = scmp.ne.s32.totalorder %s11847_s12, %s9949_s4  ;;  %p9956_p0 = scmp.lt.u32.totalorder %s9949_s4, %s11847_s12 }
  0x96   : > { %p9952_p3 = pnand %p9950_p1, %p10587_p8 }
  0x98   : > { %p9953_p13 = pneg %p9952_p3 }
  0x9a   : > { %p9958_p2 = pnand %p9956_p0, %p9953_p13 }
  0x9c   : > { %9961 = shalt.err (!%p9958_p2)
}
  0x9d   : > { %s9962_s10 = scalar_lea.vmem %s700_s1, 2048  ;;  %p9970_p4 = scmp.lt.s32.totalorder %s700_s1, %s700_s1 }
  0x9e   : > { %p9963_p5 = scmp.ne.s32.totalorder %s700_s1, %s9962_s10  ;;  %p9971_p10 = scmp.lt.s32.totalorder %s9962_s10, %s9962_s10 }
  0xa0   : > { %p9965_p7 = pnand %p9963_p5, %p10587_p8  ;;  %p9972_p11 = por %p9971_p10, %p9970_p4 }
  0xa2   : > { %p9966_p9 = pneg %p9965_p7 }
  0xa4   : > { %p9973_p12 = pnand %p9972_p11, %p9966_p9 }
  0xa6   : > { %9976 = shalt.err (!%p9973_p12)
}
  0xa7   : > { %9712 = dma.hbm_to_vmem [thread:$0]  (!%p10571_p6), %s11847_s12, 2048, %s700_s1, [#allocation19], %s11878_s23, %s11878_s23, %s11882_s16  }
  0xa8   : > { %s10394_s17 = smov [#allocation21]   ;;  %s10395_s24 = smov [#allocation24]  }
  0xa9   : > { %s725_s30 = sshll.u32 %s10394_s17, 4  ;;  %s758_s2 = sshll.u32 %s10395_s24, 4  ;;  %s726_s30 = int_to_ptr.vmem [resolvable:$true] %s725_s30  ;;  %s759_s2 = int_to_ptr.vmem [resolvable:$true] %s758_s2 }
  0xaa   : > { %s9977_s22 = scalar_lea.hbm %s11849_s14, 8192 }
  0xab   : > { %p9978_p1 = scmp.ne.s32.totalorder %s11849_s14, %s9977_s22  ;;  %p9984_p0 = scmp.lt.u32.totalorder %s9977_s22, %s11849_s14 }
  0xad   : > { %p9980_p3 = pnand %p9978_p1, %p10587_p8 }
  0xaf   : > { %p9981_p13 = pneg %p9980_p3 }
  0xb1   : > { %p9986_p2 = pnand %p9984_p0, %p9981_p13 }
  0xb3   : > { %9989 = shalt.err (!%p9986_p2)
}
  0xb4   : > { %s9990_s1 = scalar_lea.vmem %s726_s30, 8192  ;;  %p9998_p4 = scmp.lt.s32.totalorder %s726_s30, %s726_s30 }
  0xb5   : > { %p9991_p5 = scmp.ne.s32.totalorder %s726_s30, %s9990_s1  ;;  %p9999_p10 = scmp.lt.s32.totalorder %s9990_s1, %s9990_s1 }
  0xb7   : > { %p9993_p7 = pnand %p9991_p5, %p10587_p8  ;;  %p10000_p11 = por %p9999_p10, %p9998_p4 }
  0xb9   : > { %p9994_p9 = pneg %p9993_p7 }
  0xbb   : > { %p10001_p12 = pnand %p10000_p11, %p9994_p9 }
  0xbd   : > { %10004 = shalt.err (!%p10001_p12)
}
  0xbe   : > { %9718 = dma.hbm_to_vmem [thread:$0]  (!%p10571_p6), %s11849_s14, 8192, %s726_s30, [#allocation22], %s11878_s23, %s11878_s23, %s11882_s16  }
  0xbf   : > { %s10005_s29 = scalar_lea.hbm %s11853_s18, 16 }
  0xc0   : > { %p10006_p1 = scmp.ne.s32.totalorder %s11853_s18, %s10005_s29  ;;  %p10012_p0 = scmp.lt.u32.totalorder %s10005_s29, %s11853_s18 }
  0xc2   : > { %p10008_p3 = pnand %p10006_p1, %p10587_p8 }
  0xc4   : > { %p10009_p13 = pneg %p10008_p3 }
  0xc6   : > { %p10014_p2 = pnand %p10012_p0, %p10009_p13 }
  0xc8   : > { %10017 = shalt.err (!%p10014_p2)
}
  0xc9   : > { %s10018_s6 = scalar_lea.vmem %s759_s2, 16  ;;  %s10025_s30 = scalar_lea.vmem %s759_s2, 32 }
  0xca   : > { %p10019_p5 = scmp.ne.s32.totalorder %s759_s2, %s10018_s6  ;;  %p10026_p4 = scmp.lt.s32.totalorder %s759_s2, %s759_s2 }
  0xcb   : > { %p10027_p10 = scmp.lt.s32.totalorder %s10025_s30, %s10018_s6 }
  0xcc   : > { %p10021_p7 = pnand %p10019_p5, %p10587_p8 }
  0xcd   : > { %p10028_p11 = por %p10027_p10, %p10026_p4 }
  0xce   : > { %p10022_p9 = pneg %p10021_p7 }
  0xd0   : > { %p10029_p12 = pnand %p10028_p11, %p10022_p9 }
  0xd2   : > { %10032 = shalt.err (!%p10029_p12)
}
  0xd3   : > { %9724 = dma.hbm_to_vmem [thread:$0]  (!%p10571_p6), %s11853_s18, 16, %s759_s2, [#allocation25]  }
  0xd4   : > { %s10396_s17 = smov [#allocation8]   ;;  %s10397_s4 = smov [#allocation11]  }
  0xd5   : > { %s599_s24 = sshll.u32 %s10396_s17, 4  ;;  %s628_s29 = sshll.u32 %s10397_s4, 4  ;;  %s600_s24 = int_to_ptr.vmem [resolvable:$true] %s599_s24  ;;  %s629_s29 = int_to_ptr.vmem [resolvable:$true] %s628_s29 }
  0xd6   : > { %s11914_s7 = sld [smem:[#allocation45_spill]] }
  0xdc   : > { %s10033_s10 = scalar_lea.hbm %s11914_s7, 8192 }
  0xdd   : > { %p10034_p1 = scmp.ne.s32.totalorder %s11914_s7, %s10033_s10  ;;  %p10040_p0 = scmp.lt.u32.totalorder %s10033_s10, %s11914_s7 }
  0xdf   : > { %p10036_p3 = pnand %p10034_p1, %p10587_p8 }
  0xe1   : > { %p10037_p13 = pneg %p10036_p3 }
  0xe3   : > { %p10042_p2 = pnand %p10040_p0, %p10037_p13 }
  0xe5   : > { %10045 = shalt.err (!%p10042_p2)
}
  0xe6   : > { %s10046_s2 = scalar_lea.vmem %s600_s24, 8192  ;;  %p10054_p4 = scmp.lt.s32.totalorder %s600_s24, %s600_s24 }
  0xe7   : > { %p10047_p5 = scmp.ne.s32.totalorder %s600_s24, %s10046_s2  ;;  %p10055_p10 = scmp.lt.s32.totalorder %s10046_s2, %s10046_s2 }
  0xe9   : > { %p10049_p7 = pnand %p10047_p5, %p10587_p8  ;;  %p10056_p11 = por %p10055_p10, %p10054_p4 }
  0xeb   : > { %p10050_p9 = pneg %p10049_p7 }
  0xed   : > { %p10057_p12 = pnand %p10056_p11, %p10050_p9 }
  0xef   : > { %10060 = shalt.err (!%p10057_p12)
}
  0xf0   : > { %s11915_s3 = smov 128   ;;  %s11916_s26 = sld [smem:[#allocation48_spill]] }
  0xf1   : > { %9691 = dma.hbm_to_vmem [thread:$0]  (!%p10571_p6), %s11914_s7, 8192, %s600_s24, [#allocation7], %s11915_s3, %s11915_s3, %s11882_s16  }
  0xf6   : > { %s10061_s10 = scalar_lea.hbm %s11916_s26, 8192 }
  0xf7   : > { %p10062_p1 = scmp.ne.s32.totalorder %s11916_s26, %s10061_s10  ;;  %p10068_p0 = scmp.lt.u32.totalorder %s10061_s10, %s11916_s26 }
  0xf9   : > { %p10064_p3 = pnand %p10062_p1, %p10587_p8 }
  0xfb   : > { %p10065_p13 = pneg %p10064_p3 }
  0xfd   : > { %p10070_p2 = pnand %p10068_p0, %p10065_p13 }
  0xff   : > { %10073 = shalt.err (!%p10070_p2)
}
 0x100   : > { %s10074_s23 = scalar_lea.vmem %s629_s29, 8192  ;;  %p10082_p4 = scmp.lt.s32.totalorder %s629_s29, %s629_s29 }
 0x101   : > { %p10075_p5 = scmp.ne.s32.totalorder %s629_s29, %s10074_s23  ;;  %p10083_p10 = scmp.lt.s32.totalorder %s10074_s23, %s10074_s23 }
 0x103   : > { %p10077_p7 = pnand %p10075_p5, %p10587_p8  ;;  %p10084_p11 = por %p10083_p10, %p10082_p4 }
 0x105   : > { %p10078_p9 = pneg %p10077_p7 }
 0x107   : > { %p10085_p12 = pnand %p10084_p11, %p10078_p9 }
 0x109   : > { %10088 = shalt.err (!%p10085_p12)
}
 0x10a   : > { %9697 = dma.hbm_to_vmem [thread:$0]  (!%p10571_p6), %s11916_s26, 8192, %s629_s29, [#allocation10], %s11915_s3, %s11915_s3, %s11882_s16  }
 0x10b   : > { %s10398_s4 = smov [#allocation14]   ;;  %s10399_s10 = smov [#allocation17]  }
 0x10c   : > { %s657_s22 = sshll.u32 %s10398_s4, 4  ;;  %s686_s6 = sshll.u32 %s10399_s10, 4  ;;  %s658_s22 = int_to_ptr.vmem [resolvable:$true] %s657_s22  ;;  %s687_s6 = int_to_ptr.vmem [resolvable:$true] %s686_s6 }
 0x10d   : > { %s11917_s8 = sld [smem:[#allocation51_spill]] }
 0x113   : > { %s10089_s2 = scalar_lea.hbm %s11917_s8, 8192 }
 0x114   : > { %p10090_p1 = scmp.ne.s32.totalorder %s11917_s8, %s10089_s2  ;;  %p10096_p0 = scmp.lt.u32.totalorder %s10089_s2, %s11917_s8 }
 0x116   : > { %p10092_p3 = pnand %p10090_p1, %p10587_p8 }
 0x118   : > { %p10093_p13 = pneg %p10092_p3 }
 0x11a   : > { %p10098_p2 = pnand %p10096_p0, %p10093_p13 }
 0x11c   : > { %10101 = shalt.err (!%p10098_p2)
}
 0x11d   : > { %s10102_s29 = scalar_lea.vmem %s658_s22, 8192  ;;  %p10110_p4 = scmp.lt.s32.totalorder %s658_s22, %s658_s22 }
 0x11e   : > { %p10103_p5 = scmp.ne.s32.totalorder %s658_s22, %s10102_s29  ;;  %p10111_p10 = scmp.lt.s32.totalorder %s10102_s29, %s10102_s29 }
 0x120   : > { %p10105_p7 = pnand %p10103_p5, %p10587_p8  ;;  %p10112_p11 = por %p10111_p10, %p10110_p4 }
 0x122   : > { %p10106_p9 = pneg %p10105_p7 }
 0x124   : > { %p10113_p12 = pnand %p10112_p11, %p10106_p9 }
 0x126   : > { %10116 = shalt.err (!%p10113_p12)
}
 0x127   : > { %9703 = dma.hbm_to_vmem [thread:$0]  (!%p10571_p6), %s11917_s8, 8192, %s658_s22, [#allocation13], %s11915_s3, %s11915_s3, %s11882_s16  }
 0x128   : > { %s11918_s11 = sld [smem:[#allocation54_spill]] }
 0x12e   : > { %s10117_s10 = scalar_lea.hbm %s11918_s11, 8192 }
 0x12f   : > { %p10118_p1 = scmp.ne.s32.totalorder %s11918_s11, %s10117_s10  ;;  %p10124_p0 = scmp.lt.u32.totalorder %s10117_s10, %s11918_s11 }
 0x131   : > { %p10120_p3 = pnand %p10118_p1, %p10587_p8 }
 0x133   : > { %p10121_p13 = pneg %p10120_p3 }
 0x135   : > { %p10126_p2 = pnand %p10124_p0, %p10121_p13 }
 0x137   : > { %10129 = shalt.err (!%p10126_p2)
}
 0x138   : > { %s10130_s24 = scalar_lea.vmem %s687_s6, 8192  ;;  %p10138_p4 = scmp.lt.s32.totalorder %s687_s6, %s687_s6 }
 0x139   : > { %p10131_p5 = scmp.ne.s32.totalorder %s687_s6, %s10130_s24  ;;  %p10139_p10 = scmp.lt.s32.totalorder %s10130_s24, %s10130_s24 }
 0x13b   : > { %p10133_p7 = pnand %p10131_p5, %p10587_p8  ;;  %p10140_p11 = por %p10139_p10, %p10138_p4 }
 0x13d   : > { %p10134_p9 = pneg %p10133_p7 }
 0x13f   : > { %p10141_p12 = pnand %p10140_p11, %p10134_p9 }
 0x141   : > { %10144 = shalt.err (!%p10141_p12)
}
 0x142   : > { %9709 = dma.hbm_to_vmem [thread:$0]  (!%p10571_p6), %s11918_s11, 8192, %s687_s6, [#allocation16], %s11915_s3, %s11915_s3, %s11882_s16  }
 0x143   : > { %s10400_s0 = smov [#allocation20]   ;;  %s10145_s10 = scalar_lea.hbm %s11848_s13, 256 }
 0x144   : > { %s712_s7 = sshll.u32 %s10400_s0, 4  ;;  %p10146_p1 = scmp.ne.s32.totalorder %s11848_s13, %s10145_s10  ;;  %s713_s7 = int_to_ptr.vmem [resolvable:$true] %s712_s7 }
 0x145   : > { %p10152_p0 = scmp.lt.u32.totalorder %s10145_s10, %s11848_s13 }
 0x146   : > { %p10148_p3 = pnand %p10146_p1, %p10587_p8 }
 0x148   : > { %p10149_p13 = pneg %p10148_p3 }
 0x14a   : > { %p10154_p2 = pnand %p10152_p0, %p10149_p13 }
 0x14c   : > { %10157 = shalt.err (!%p10154_p2)
}
 0x14d   : > { %s10158_s6 = scalar_lea.vmem %s713_s7, 256  ;;  %p10166_p4 = scmp.lt.s32.totalorder %s713_s7, %s713_s7 }
 0x14e   : > { %p10159_p5 = scmp.ne.s32.totalorder %s713_s7, %s10158_s6  ;;  %p10167_p10 = scmp.lt.s32.totalorder %s10158_s6, %s10158_s6 }
 0x150   : > { %p10161_p7 = pnand %p10159_p5, %p10587_p8  ;;  %p10168_p11 = por %p10167_p10, %p10166_p4 }
 0x152   : > { %p10162_p9 = pneg %p10161_p7 }
 0x154   : > { %p10169_p12 = pnand %p10168_p11, %p10162_p9 }
 0x156   : > { %10172 = shalt.err (!%p10169_p12)
}
 0x157   : > { %s10401_s24 = smov 64   ;;  %s10402_s22 = smov 4  }
 0x158   : > { %9715 = dma.hbm_to_vmem [thread:$0]  (!%p10571_p6), %s11848_s13, 256, %s713_s7, [#allocation19], %s10401_s24, %s10401_s24, %s10402_s22  }
 0x159   : > { %s10403_s17 = smov [#allocation23]   ;;  %s10404_s10 = smov [#allocation26]  }
 0x15a   : > { %s738_s4 = sshll.u32 %s10403_s17, 4  ;;  %s769_s30 = sshll.u32 %s10404_s10, 4  ;;  %s739_s4 = int_to_ptr.vmem [resolvable:$true] %s738_s4  ;;  %s10846_s30 = int_to_ptr.vmem [resolvable:$true] %s769_s30 }
 0x15b   : > { %s10173_s23 = scalar_lea.hbm %s11850_s15, 2048 }
 0x15c   : > { %p10174_p1 = scmp.ne.s32.totalorder %s11850_s15, %s10173_s23  ;;  %p10180_p0 = scmp.lt.u32.totalorder %s10173_s23, %s11850_s15 }
 0x15e   : > { %p10176_p3 = pnand %p10174_p1, %p10587_p8 }
 0x160   : > { %p10177_p13 = pneg %p10176_p3 }
 0x162   : > { %p10182_p2 = pnand %p10180_p0, %p10177_p13 }
 0x164   : > { %10185 = shalt.err (!%p10182_p2)
}
 0x165   : > { %s10186_s24 = scalar_lea.vmem %s739_s4, 2048  ;;  %p10194_p4 = scmp.lt.s32.totalorder %s739_s4, %s739_s4 }
 0x166   : > { %p10187_p5 = scmp.ne.s32.totalorder %s739_s4, %s10186_s24  ;;  %p10195_p10 = scmp.lt.s32.totalorder %s10186_s24, %s10186_s24 }
 0x168   : > { %p10189_p7 = pnand %p10187_p5, %p10587_p8  ;;  %p10196_p11 = por %p10195_p10, %p10194_p4 }
 0x16a   : > { %p10190_p9 = pneg %p10189_p7 }
 0x16c   : > { %p10197_p12 = pnand %p10196_p11, %p10190_p9 }
 0x16e   : > { %10200 = shalt.err (!%p10197_p12)
}
 0x16f   : > { %s11919_s16 = smov 8   ;;  %s10201_s1 = scalar_lea.hbm %s11854_s19, 16 }
 0x170   : > { %9721 = dma.hbm_to_vmem [thread:$0]  (!%p10571_p6), %s11850_s15, 2048, %s739_s4, [#allocation22], %s11915_s3, %s11915_s3, %s11919_s16  }
 0x171   : > { %p10202_p1 = scmp.ne.s32.totalorder %s11854_s19, %s10201_s1  ;;  %p10208_p0 = scmp.lt.u32.totalorder %s10201_s1, %s11854_s19 }
 0x173   : > { %p10204_p3 = pnand %p10202_p1, %p10587_p8 }
 0x175   : > { %p10205_p13 = pneg %p10204_p3 }
 0x177   : > { %p10210_p2 = pnand %p10208_p0, %p10205_p13 }
 0x179   : > { %10213 = shalt.err (!%p10210_p2)
}
 0x17a   : > { %s10214_s4 = scalar_lea.vmem %s10846_s30, 16  ;;  %s10221_s7 = scalar_lea.vmem %s10846_s30, 32 }
 0x17b   : > { %p10215_p5 = scmp.ne.s32.totalorder %s10846_s30, %s10214_s4  ;;  %p10222_p4 = scmp.lt.s32.totalorder %s10846_s30, %s10846_s30 }
 0x17c   : > { %p10223_p10 = scmp.lt.s32.totalorder %s10221_s7, %s10214_s4 }
 0x17d   : > { %p10217_p7 = pnand %p10215_p5, %p10587_p8 }
 0x17e   : > { %p10224_p11 = por %p10223_p10, %p10222_p4 }
 0x17f   : > { %p10218_p9 = pneg %p10217_p7 }
 0x181   : > { %p10225_p12 = pnand %p10224_p11, %p10218_p9 }
 0x183   : > { %10228 = shalt.err (!%p10225_p12)
}
 0x184   : > { %9727 = dma.hbm_to_vmem [thread:$0]  (!%p10571_p6), %s11854_s19, 16, %s10846_s30, [#allocation25]  }
 0x185   : > { %s10405_s0 = smov [#allocation27]   ;;  %s10229_s2 = scalar_lea.hbm %s11855_s20, 16 }
 0x186   : > { %s780_s17 = sshll.u32 %s10405_s0, 4  ;;  %p10230_p1 = scmp.ne.s32.totalorder %s11855_s20, %s10229_s2  ;;  %s781_s17 = int_to_ptr.vmem [resolvable:$true] %s780_s17 }
 0x187   : > { %p10236_p0 = scmp.lt.u32.totalorder %s10229_s2, %s11855_s20 }
 0x188   : > { %p10232_p3 = pnand %p10230_p1, %p10587_p8 }
 0x18a   : > { %p10233_p13 = pneg %p10232_p3 }
 0x18c   : > { %p10238_p2 = pnand %p10236_p0, %p10233_p13 }
 0x18e   : > { %10241 = shalt.err (!%p10238_p2)
}
 0x18f   : > { %s10242_s30 = scalar_lea.vmem %s781_s17, 16  ;;  %s10249_s7 = scalar_lea.vmem %s781_s17, 32 }
 0x190   : > { %p10243_p5 = scmp.ne.s32.totalorder %s781_s17, %s10242_s30  ;;  %p10250_p4 = scmp.lt.s32.totalorder %s781_s17, %s781_s17 }
 0x191   : > { %p10251_p10 = scmp.lt.s32.totalorder %s10249_s7, %s10242_s30 }
 0x192   : > { %p10245_p7 = pnand %p10243_p5, %p10587_p8 }
 0x193   : > { %p10252_p11 = por %p10251_p10, %p10250_p4 }
 0x194   : > { %p10246_p9 = pneg %p10245_p7 }
 0x196   : > { %p10253_p12 = pnand %p10252_p11, %p10246_p9 }
 0x198   : > { %10256 = shalt.err (!%p10253_p12)
}
 0x199   : > { %s11920_s27 = sld [smem:[#allocation40_spill]]  ;;  %s11921_s0 = sld [smem:[#allocation41_spill]] }
 0x19a   : > { %9730 = dma.hbm_to_vmem [thread:$0]  (!%p10571_p6), %s11855_s20, 16, %s781_s17, [#allocation28]  }
 0x19b   : > { %s6160_s10 = sadd.s32 4294967294, %s10385_s21   ;;  %s10913_s28 = sadd.s32 1, %s10385_s21  }
 0x19c   : > { %s57_s1 = sadd.s32 1, %s10381_s5  ;;  %s54_s2 = ssub.s32 %s10385_s21, %s10913_s28 }
 0x19d   : > { %p64_p8 = scmp.ne.s32.totalorder %s10381_s5, %s10377_s25  ;;  %p55_p1 = scmp.eq.s32.totalorder %s54_s2, 0 }
 0x19e   : > { %p65_p3 = scmp.eq.s32.totalorder %s10385_s21, 0  ;;  %p567_p9 = scmp.eq.s32.totalorder %s6160_s10, 1 }
 0x19f   : > { %p70_p13 = scmp.ne.s32.totalorder %s10377_s25, %s11920_s27  ;;  %p561_p0 = scmp.eq.s32.totalorder %s11921_s0, 1 }
 0x1a0   : > { %s10925_s23 = scalar_select %p55_p1, %s10381_s5, %s57_s1  }
 0x1a1   : > { %p66_p2 = por %p65_p3, %p64_p8  ;;  %p11922_p5 = scmp.eq.s32.totalorder %s11921_s0, 0 }
 0x1a2   : > { %p10933_p6 = por %p561_p0, %p64_p8  ;;  %p9754_p4 = scmp.lt.s32.totalorder %s10385_s21, 2 }
 0x1a3   : > { %p10929_p7 = por %p11922_p5, %p70_p13  ;;  %s794_s29 = sand.u32 1, %s10381_s5  }
 0x1a4   : > { %s11924_s17 = scalar_select %p10933_p6, 1, 0 }
 0x1a5   : > { %p10939_p10 = por %p567_p9, %p70_p13  ;;  %s6178_s30 = sshll.u32 %s794_s29, 7 }
 0x1a6   : > { %s6242_s7 = sshll.u32 %s10385_s21, 11  ;;  %s11926_s27 = sld [smem:[#allocation43_spill]] }
 0x1a7   : > { %s11925_s4 = scalar_select %p10939_p10, 1, 0 }
 0x1a8   : > { %s798_s1 = scalar_lea.vmem [#allocation3], %s6178_s30  ;;  %p10949_p11 = pnand %p9754_p4, %p66_p2 }
 0x1a9   : > { %s805_s2 = sshll.u32 %s798_s1, 4  ;;  %s10955_s8 = scalar_lea.sflag [#allocation4], %s794_s29  ;;  %s10953_s2 = int_to_ptr.vmem [resolvable:$true] %s805_s2 }
 0x1aa   : > { %p10259_p8 = pneg %p10949_p11 }
 0x1ac   : > { %s10947_s0 = scalar_lea.hbm %s11926_s27, %s6242_s7  ;;  %s10262_s24 = scalar_lea.hbm %s11926_s27, 4096 }
 0x1ad   : > { %s10257_s9 = scalar_lea.hbm %s10947_s0, 2048  ;;  %p10263_p13 = scmp.lt.u32.totalorder %s10947_s0, %s11926_s27 }
 0x1ae   : > { %p10258_p12 = scmp.ne.s32.totalorder %s10947_s0, %s10257_s9  ;;  %p10264_p0 = scmp.lt.u32.totalorder %s10262_s24, %s10257_s9 }
 0x1af   : > { %p10266_p5 = scmp.lt.u32.totalorder %s10257_s9, %s10947_s0 }
 0x1b0   : > { %p10260_p1 = pnand %p10259_p8, %p10258_p12  ;;  %p10265_p2 = por %p10264_p0, %p10263_p13 }
 0x1b2   : > { %p10261_p3 = pneg %p10260_p1  ;;  %p10267_p9 = por %p10266_p5, %p10265_p2 }
 0x1b4   : > { %p10268_p4 = pnand %p10267_p9, %p10261_p3 }
 0x1b6   : > { %10271 = shalt.err (!%p10268_p4)
}
 0x1b7   : > { %s10272_s29 = scalar_lea.vmem %s10953_s2, 2048  ;;  %s10406_s30 = smov [#allocation3]  }
 0x1b8   : > { %p10273_p12 = scmp.ne.s32.totalorder %s10953_s2, %s10272_s29  ;;  %s10277_s7 = sshll.u32 %s10406_s30, 4  ;;  %s10278_s7 = int_to_ptr.vmem [resolvable:$false] %s10277_s7 }
 0x1b9   : > { %s10279_s22 = scalar_lea.vmem %s10278_s7, 4096  ;;  %p10280_p6 = scmp.lt.s32.totalorder %s10953_s2, %s10278_s7 }
 0x1ba   : > { %p10275_p1 = pnand %p10273_p12, %p10259_p8  ;;  %p10281_p13 = scmp.lt.s32.totalorder %s10279_s22, %s10272_s29 }
 0x1bc   : > { %p10276_p10 = pneg %p10275_p1  ;;  %p10282_p0 = por %p10281_p13, %p10280_p6 }
 0x1be   : > { %p10283_p2 = pnand %p10282_p0, %p10276_p10 }
 0x1c0   : > { %10286 = shalt.err (!%p10283_p2)
}
 0x1c1   : > { %9734 = dma.hbm_to_vmem [thread:$0]  (!%p10949_p11), %s10947_s0, 2048, %s10953_s2, %s10955_s8, %s11915_s3, %s11915_s3, %s11919_s16  }
 0x1c2   : > { %s11928_s9 = sld [smem:[#allocation42_spill]] }
 0x1c8   : > { %p11929_p8 = scmp.ne.s32.totalorder %s11928_s9, 0 }
 0x1c9   : > { %s10989_s24 = sand.u32 (!%p11929_p8), 1, %s10377_s25  }
 0x1ca   : > { %817 = sbr.rel (%p11929_p8) target bundleno = 5167 (0x142f), region = 108  ;;  %s6182_s1 = sshll.u32 (!%p11929_p8), %s10989_s24, 7 }
 0x1cb   : > { %s820_s29 = scalar_lea.sflag (!%p11929_p8), [#allocation4], %s10989_s24  ;;  %s10993_s30 = scalar_lea.vmem (!%p11929_p8), [#allocation3], %s6182_s1 }
 0x1d1   : > { %10332 = dma.done.wait (%p10929_p7), %s820_s29, 2048  }
 0x1d2   : > { %10334 = vsyncadd (%p10929_p7), %s820_s29, 4294965248  ;;  %s11930_s10 = sld [smem:[#allocation41_spill]] }
 0x1d8   : > { %p11931_p6 = scmp.eq.s32.totalorder %s11930_s10, 0 }
 0x1da   : > { %10336 = dma.done.wait (%p11931_p6), [#allocation7], 12288   ;;  %p11932_p10 = pmov %p11931_p6 }
 0x1db   : > { %p11933_p11 = pmov %p11931_p6 }
 0x1dc   : > { %10338 = vsyncadd (%p11932_p10), [#allocation7], 4294955008 }
 0x1dd   : > { %10340 = dma.done.wait (%p11933_p11), [#allocation10], 10240   ;;  %p11934_p3 = pmov %p11931_p6 }
 0x1df   : > { %10342 = vsyncadd (%p11934_p3), [#allocation10], 4294957056  ;;  %p11935_p5 = pmov %p11934_p3 }
 0x1e0   : > { %p11936_p9 = pmov %p11934_p3 }
 0x1e1   : > { %10344 = dma.done.wait (%p11935_p5), [#allocation13], 10240  }
 0x1e2   : > { %10346 = vsyncadd (%p11936_p9), [#allocation13], 4294957056  ;;  %p11937_p7 = pmov %p11934_p3 }
 0x1e3   : > { %p11938_p4 = pmov %p11934_p3 }
 0x1e4   : > { %10348 = dma.done.wait (%p11937_p7), [#allocation16], 10240  }
 0x1e5   : > { %10350 = vsyncadd (%p11938_p4), [#allocation16], 4294957056  ;;  %p11939_p12 = pmov %p11934_p3 }
 0x1e6   : > { %p11940_p1 = pmov %p11934_p3 }
 0x1e7   : > { %10352 = dma.done.wait (%p11939_p12), [#allocation19], 2304  }
 0x1e8   : > { %10354 = vsyncadd (%p11940_p1), [#allocation19], 4294964992  ;;  %p11941_p13 = pmov %p11940_p1 }
 0x1e9   : > { %p11942_p0 = pmov %p11940_p1 }
 0x1ea   : > { %10356 = dma.done.wait (%p11941_p13), [#allocation22], 10240  }
 0x1eb   : > { %10358 = vsyncadd (%p11942_p0), [#allocation22], 4294957056  ;;  %p11943_p2 = pmov %p11942_p0 }
 0x1ec   : > { %p11944_p8 = pmov %p11942_p0 }
 0x1ed   : > { %10360 = dma.done.wait (%p11943_p2), [#allocation25], 32  }
 0x1ee   : > { %10362 = vsyncadd (%p11944_p8), [#allocation25], 4294967264  ;;  %p11945_p6 = pmov %p11942_p0 }
 0x1ef   : > { %p11946_p10 = pmov %p11942_p0 }
 0x1f0   : > { %10364 = dma.done.wait (%p11945_p6), [#allocation28], 16  }
 0x1f1   : > { %10366 = vsyncadd (%p11946_p10), [#allocation28], 4294967280  ;;  %v951_v1 = vld [vmem:[%s10993_s30] sm:$0xff]  ;;  %v952_v2 = vld [vmem:[%s10993_s30 + $0x8] sm:$0xff]  ;;  %s11947_s16 = sld [smem:[#allocation46_spill]]  ;;  %vm10408_vm0 = vmmov 0  }
 0x1f2   : > { %v953_v3 = vld [vmem:[%s10993_s30 + $0x10] sm:$0xff]  ;;  %v11034_v4 = vpack.c.bf16 %v952_v2, %v951_v1  ;;  %v954_v5 = vld [vmem:[%s10993_s30 + $0x18] sm:$0xff]  ;;  %v955_v7 = vld [vmem:[%s10993_s30 + $0x20] sm:$0xff]  ;;  %vm2173_vm1 = vcmask 523264   ;;  %s11948_s3 = sld [smem:[#allocation50_spill]]  ;;  %vm3206_vm10 = vcmask 261120  }
 0x1f3   : > { %v11037_v6 = vpack.c.bf16 %v954_v5, %v953_v3  ;;  %v956_v8 = vld [vmem:[%s10993_s30 + $0x28] sm:$0xff]  ;;  %v1097_v10 = vld [vmem:[#allocation6 + $0x40] sm:$0xff]  ;;  %v957_v11 = vld [vmem:[%s10993_s30 + $0x30] sm:$0xff]  ;;  %s11949_s1 = sld [smem:[#allocation53_spill]]  ;;  %s11950_s9 = sld [smem:[#allocation56_spill]] }
 0x1f4   : > { %8524 = vmatprep.subr.bf16.mxu1 %v11034_v4  ;;  %8492 = vmatprep.subr.bf16.mxu0 %v11034_v4  ;;  %v11046_v9 = vpack.c.bf16 %v956_v8, %v955_v7  ;;  %v958_v12 = vld [vmem:[%s10993_s30 + $0x38] sm:$0xff]  ;;  %v967_v13 = vld [vmem:[#allocation6] sm:$0xff]  ;;  %v960_v16 = vld [vmem:[%s10993_s30 + $0x48] sm:$0xff]  ;;  %s11951_s2 = sld [smem:[#allocation55_spill]]  ;;  %s947_s7 = scalar_lea.vmem [#allocation29], %s10989_s24 }
 0x1f5   : > { %8526 = vmatpush3.bf16.msra.mxu1 %v11034_v4  ;;  %8494 = vmatpush3.bf16.msra.mxu0 %v11034_v4  ;;  %v11054_v14 = vpack.c.bf16 %v958_v12, %v957_v11  ;;  %v959_v15 = vld [vmem:[%s10993_s30 + $0x40] sm:$0xff]  ;;  %v961_v18 = vld [vmem:[%s10993_s30 + $0x50] sm:$0xff]  ;;  %v962_v19 = vld [vmem:[%s10993_s30 + $0x58] sm:$0xff]  ;;  %s6239_s22 = sshll.u32 %s11930_s10, 4  ;;  %s5932_s29 = sshll.u32 %s947_s7, 4  ;;  %s5933_s29 = int_to_ptr.vmem [resolvable:$true] %s5932_s29 }
 0x1f6   : > { %8528 = vmatprep.subr.bf16.mxu1 %v11037_v6  ;;  %8496 = vmatprep.subr.bf16.mxu0 %v11037_v6  ;;  %v11062_v17 = vpack.c.bf16 %v960_v16, %v959_v15  ;;  %v11070_v20 = vpack.c.bf16 %v962_v19, %v961_v18  ;;  %v963_v21 = vld [vmem:[%s10993_s30 + $0x60] sm:$0xff]  ;;  %v964_v22 = vld [vmem:[%s10993_s30 + $0x68] sm:$0xff]  ;;  %v965_v24 = vld [vmem:[%s10993_s30 + $0x70] sm:$0xff]  ;;  %s11952_s6 = sld [smem:[#allocation58_spill]]  ;;  %p11953_p3 = scmp.ne.s32.totalorder %s11924_s17, 0 }
 0x1f7   : > { %7078 = vmatprep.mubr.f32.mxu1 %v1097_v10  ;;  %7034 = vmatprep.mubr.f32.mxu0 %v967_v13  ;;  %v11078_v23 = vpack.c.bf16 %v964_v22, %v963_v21  ;;  %v966_v25 = vld [vmem:[%s10993_s30 + $0x78] sm:$0xff]  ;;  %v1211_v27 = vld [vmem:[#allocation8 + $0x80] sm:$0xff]  ;;  %v1212_v28 = vld [vmem:[#allocation8 + $0x88] sm:$0xff]  ;;  %v10407_v22 = vmov 0.0|0.0  }
 0x1f8   : > { %v11086_v26 = vpack.c.bf16 %v966_v25, %v965_v24  ;;  %v8555_v29 = vpack.c.bf16 %v1212_v28, %v1211_v27  ;;  %v1098_v30 = vld [vmem:[#allocation6 + $0x48] sm:$0xff]  ;;  %v1099_v32 = vld [vmem:[#allocation6 + $0x50] sm:$0xff]  ;;  %v1214_v35 = vld [vmem:[#allocation8 + $0x98] sm:$0xff] }
 0x1f9   : > { %8530 = vmatpush3.bf16.msra.mxu1 %v11037_v6  ;;  %8498 = vmatpush3.bf16.msra.mxu0 %v11037_v6  ;;  %v968_v31 = vld [vmem:[#allocation6 + $0x8] sm:$0xff]  ;;  %v969_v33 = vld [vmem:[#allocation6 + $0x10] sm:$0xff]  ;;  %v1100_v36 = vld [vmem:[#allocation6 + $0x58] sm:$0xff] }
 0x1fa   : > { %8532 = vmatprep.subr.bf16.mxu1 %v11046_v9  ;;  %8500 = vmatprep.subr.bf16.mxu0 %v11046_v9  ;;  %v1213_v34 = vld [vmem:[#allocation8 + $0x90] sm:$0xff]  ;;  %v970_v37 = vld [vmem:[#allocation6 + $0x18] sm:$0xff]  ;;  %v1101_v38 = vld [vmem:[#allocation6 + $0x60] sm:$0xff] }
 0x1fb   : > { %v971_v39 = vld [vmem:[#allocation6 + $0x20] sm:$0xff]  ;;  %v8559_v40 = vpack.c.bf16 %v1214_v35, %v1213_v34  ;;  %v1102_v41 = vld [vmem:[#allocation6 + $0x68] sm:$0xff]  ;;  %v1103_v43 = vld [vmem:[#allocation6 + $0x70] sm:$0xff] }
 0x1fc   : > { %v972_v42 = vld [vmem:[#allocation6 + $0x28] sm:$0xff]  ;;  %v973_v44 = vld [vmem:[#allocation6 + $0x30] sm:$0xff]  ;;  %v1215_v45 = vld [vmem:[#allocation8 + $0xa0] sm:$0xff]  ;;  %s11792_s0 = scalar_lea.hbm %s11952_s6, %s6239_s22 }
 0x1fd   : > { %8534 = vmatpush3.bf16.msra.mxu1 %v11046_v9  ;;  %8502 = vmatpush3.bf16.msra.mxu0 %v11046_v9  ;;  %v1216_v46 = vld [vmem:[#allocation8 + $0xa8] sm:$0xff]  ;;  %v1104_v47 = vld [vmem:[#allocation6 + $0x78] sm:$0xff]  ;;  %v1217_v49 = vld [vmem:[#allocation8 + $0xb0] sm:$0xff] }
 0x1fe   : > { %8536 = vmatprep.subr.bf16.mxu1 %v11054_v14  ;;  %8504 = vmatprep.subr.bf16.mxu0 %v11054_v14  ;;  %v974_v48 = vld [vmem:[#allocation6 + $0x38] sm:$0xff]  ;;  %v1438_v51 = vld [vmem:[#allocation6 + $0x80] sm:$0xff]  ;;  %v8563_v52 = vpack.c.bf16 %v1216_v46, %v1215_v45  ;;  %v1220_v55 = vld [vmem:[#allocation8 + $0xc8] sm:$0xff] }
 0x1ff   : > { %v1218_v50 = vld [vmem:[#allocation8 + $0xb8] sm:$0xff]  ;;  %v1219_v54 = vld [vmem:[#allocation8 + $0xc0] sm:$0xff]  ;;  %v1221_v57 = vld [vmem:[#allocation8 + $0xd0] sm:$0xff] }
 0x200   : > { %v8567_v53 = vpack.c.bf16 %v1218_v50, %v1217_v49  ;;  %v8571_v56 = vpack.c.bf16 %v1220_v55, %v1219_v54  ;;  %v1222_v58 = vld [vmem:[#allocation8 + $0xd8] sm:$0xff]  ;;  %v1223_v60 = vld [vmem:[#allocation8 + $0xe0] sm:$0xff]  ;;  %v1224_v61 = vld [vmem:[#allocation8 + $0xe8] sm:$0xff] }
 0x201   : > { %8538 = vmatpush3.bf16.msra.mxu1 %v11054_v14  ;;  %8506 = vmatpush3.bf16.msra.mxu0 %v11054_v14  ;;  %v8575_v59 = vpack.c.bf16 %v1222_v58, %v1221_v57  ;;  %v8579_v62 = vpack.c.bf16 %v1224_v61, %v1223_v60  ;;  %v1225_v63 = vld [vmem:[#allocation8 + $0xf0] sm:$0xff]  ;;  %v1226_v0 = vld [vmem:[#allocation8 + $0xf8] sm:$0xff]  ;;  %v1439_v2 = vld [vmem:[#allocation6 + $0x88] sm:$0xff] }
 0x202   : > { %8540 = vmatprep.subr.bf16.mxu1 %v11062_v17  ;;  %8508 = vmatprep.subr.bf16.mxu0 %v11062_v17  ;;  %v8583_v1 = vpack.c.bf16 %v1226_v0, %v1225_v63  ;;  %v1440_v3 = vld [vmem:[#allocation6 + $0x90] sm:$0xff]  ;;  %v1441_v5 = vld [vmem:[#allocation6 + $0x98] sm:$0xff]  ;;  %v1442_v7 = vld [vmem:[#allocation6 + $0xa0] sm:$0xff] }
 0x203   : > { %v1443_v8 = vld [vmem:[#allocation6 + $0xa8] sm:$0xff]  ;;  %v1444_v10 = vld [vmem:[#allocation6 + $0xb0] sm:$0xff]  ;;  %v1445_v11 = vld [vmem:[#allocation6 + $0xb8] sm:$0xff] }
 0x204   : > { %v1685_v12 = vld [vmem:[#allocation6 + $0xd8] sm:$0xff]  ;;  %v1686_v13 = vld [vmem:[#allocation6 + $0xe0] sm:$0xff]  ;;  %v1688_v15 = vld [vmem:[#allocation6 + $0xf0] sm:$0xff] }
 0x205   : > { %8542 = vmatpush3.bf16.msra.mxu1 %v11062_v17  ;;  %8510 = vmatpush3.bf16.msra.mxu0 %v11062_v17  ;;  %v1689_v16 = vld [vmem:[#allocation6 + $0xf8] sm:$0xff]  ;;  %v1081_v18 = vld [vmem:[#allocation8 + $0x8] sm:$0xff]  ;;  %v1082_v24 = vld [vmem:[#allocation8 + $0x10] sm:$0xff] }
 0x206   : > { %8544 = vmatprep.subr.bf16.mxu1 %v11070_v20  ;;  %8512 = vmatprep.subr.bf16.mxu0 %v11070_v20  ;;  %v1960_v21 = vld [vmem:[%s11947_s16 + $0x8] sm:$0xff]  ;;  %v1083_v25 = vld [vmem:[#allocation8 + $0x18] sm:$0xff]  ;;  %v1094_v58 = vld [vmem:[#allocation8 + $0x70] sm:$0xff] }
 0x207   : > { %v1088_v45 = vld [vmem:[#allocation8 + $0x40] sm:$0xff]  ;;  %v1089_v46 = vld [vmem:[#allocation8 + $0x48] sm:$0xff]  ;;  %v1554_v0 = vld [vmem:[#allocation8 + $0x110] sm:$0xff] }
 0x208   : > { %v8603_v49 = vpack.c.bf16 %v1089_v46, %v1088_v45  ;;  %v1092_v55 = vld [vmem:[#allocation8 + $0x60] sm:$0xff]  ;;  %v1803_v45 = vld [vmem:[#allocation8 + $0x1b8] sm:$0xff] }
 0x209   : > { %8546 = vmatpush3.bf16.msra.mxu1 %v11070_v20  ;;  %8514 = vmatpush3.bf16.msra.mxu0 %v11070_v20  ;;  %v1552_v61 = vld [vmem:[#allocation8 + $0x100] sm:$0xff] }
 0x20a   : > { %8548 = vmatprep.subr.bf16.mxu1 %v11078_v23  ;;  %8516 = vmatprep.subr.bf16.mxu0 %v11078_v23 }
 0x20d   : > { %8550 = vmatpush3.bf16.msra.mxu1 %v11078_v23  ;;  %8518 = vmatpush3.bf16.msra.mxu0 %v11078_v23 }
 0x20e   : > { %8552 = vmatprep.subr.bf16.mxu1 %v11086_v26  ;;  %8520 = vmatprep.subr.bf16.mxu0 %v11086_v26 }
 0x211   : > { %8554 = vmatpush3.bf16.msra.mxu1 %v11086_v26  ;;  %8522 = vmatpush3.bf16.msra.mxu0 %v11086_v26 }
 0x212   : > { %8620 = vmatprep.subr.bf16.mxu1 %v11034_v4  ;;  %8556 = vmatprep.subr.bf16.mxu0 %v8555_v29 }
 0x214   : > { %7079 = vmatmul.mubr.f32.vlgmr.msra.gmra.mrb[0].mxu1 %v1098_v30  ;;  %7035 = vmatmul.mubr.f32.vlgmr.msra.gmra.mrb[0].mxu0 %v968_v31  ;;  %v1084_v31 = vld [vmem:[#allocation8 + $0x20] sm:$0xff] }
 0x215   : > { %7081 = vmatprep.mubr.f32.mxu1 %v1099_v32  ;;  %8622 = vmatpush3.bf16.msra.mxu1 %v11034_v4  ;;  %v1085_v32 = vld [vmem:[#allocation8 + $0x28] sm:$0xff] }
 0x216   : > { %8624 = vmatprep.subr.bf16.mxu1 %v11037_v6  ;;  %7037 = vmatprep.mubr.f32.mxu0 %v969_v33  ;;  %v8595_v35 = vpack.c.bf16 %v1085_v32, %v1084_v31  ;;  %v1796_v31 = vld [vmem:[#allocation8 + $0x180] sm:$0xff]  ;;  %v1797_v32 = vld [vmem:[#allocation8 + $0x188] sm:$0xff] }
 0x217   : > { %8558 = vmatpush3.bf16.msra.mxu0 %v8555_v29  ;;  %v8591_v29 = vpack.c.bf16 %v1083_v25, %v1082_v24  ;;  %v1564_v25 = vld [vmem:[#allocation8 + $0x160] sm:$0xff] }
 0x218   : > { %7082 = vmatmul.mubr.f32.gmra.mrb[2].mxu1 %v1100_v36  ;;  %7038 = vmatmul.mubr.f32.gmra.mrb[2].mxu0 %v970_v37 }
 0x219   : > { %7084 = vmatprep.mubr.f32.mxu1 %v1101_v38  ;;  %8626 = vmatpush3.bf16.msra.mxu1 %v11037_v6  ;;  %v1086_v38 = vld [vmem:[#allocation8 + $0x30] sm:$0xff] }
 0x21a   : > { %8628 = vmatprep.subr.bf16.mxu1 %v11046_v9  ;;  %7040 = vmatprep.mubr.f32.mxu0 %v971_v39  ;;  %v1087_v39 = vld [vmem:[#allocation8 + $0x38] sm:$0xff] }
 0x21b   : > { %8560 = vmatprep.subr.bf16.mxu0 %v8559_v40 }
 0x21c   : > { %7085 = vmatmul.mubr.f32.gmra.mrb[4].mxu1 %v1102_v41  ;;  %7041 = vmatmul.mubr.f32.gmra.mrb[4].mxu0 %v972_v42  ;;  %v8599_v42 = vpack.c.bf16 %v1087_v39, %v1086_v38  ;;  %v1800_v39 = vld [vmem:[#allocation8 + $0x1a0] sm:$0xff] }
 0x21d   : > { %7087 = vmatprep.mubr.f32.mxu1 %v1103_v43  ;;  %8630 = vmatpush3.bf16.msra.mxu1 %v11046_v9 }
 0x21e   : > { %8632 = vmatprep.subr.bf16.mxu1 %v11054_v14  ;;  %7043 = vmatprep.mubr.f32.mxu0 %v973_v44 }
 0x21f   : > { %8562 = vmatpush3.bf16.msra.mxu0 %v8559_v40 }
 0x220   : > { %7088 = vmatmul.mubr.f32.gmra.mrb[6].mxu1 %v1104_v47  ;;  %7044 = vmatmul.mubr.f32.gmra.mrb[6].mxu0 %v974_v48 }
 0x221   : > { %8634 = vmatpush3.bf16.msra.mxu1 %v11054_v14  ;;  %7210 = vmatprep.mubr.f32.mxu1 %v1438_v51 }
 0x222   : > { %8636 = vmatprep.subr.bf16.mxu1 %v11062_v17  ;;  %8564 = vmatprep.subr.bf16.mxu0 %v8563_v52 }
 0x223   : > { %8566 = vmatpush3.bf16.msra.mxu0 %v8563_v52  ;;  %v1090_v52 = vld [vmem:[#allocation8 + $0x50] sm:$0xff] }
 0x224   : > { %8568 = vmatprep.subr.bf16.mxu0 %v8567_v53 }
 0x225   : > { %8638 = vmatpush3.bf16.msra.mxu1 %v11062_v17 }
 0x226   : > { %8640 = vmatprep.subr.bf16.mxu1 %v11070_v20 }
 0x227   : > { %8570 = vmatpush3.bf16.msra.mxu0 %v8567_v53  ;;  %v1091_v53 = vld [vmem:[#allocation8 + $0x58] sm:$0xff] }
 0x228   : > { %8572 = vmatprep.subr.bf16.mxu0 %v8571_v56  ;;  %v8607_v54 = vpack.c.bf16 %v1091_v53, %v1090_v52 }
 0x229   : > { %8642 = vmatpush3.bf16.msra.mxu1 %v11070_v20 }
 0x22a   : > { %8644 = vmatprep.subr.bf16.mxu1 %v11078_v23 }
 0x22b   : > { %8574 = vmatpush3.bf16.msra.mxu0 %v8571_v56  ;;  %v1093_v56 = vld [vmem:[#allocation8 + $0x68] sm:$0xff] }
 0x22c   : > { %8576 = vmatprep.subr.bf16.mxu0 %v8575_v59  ;;  %v8611_v57 = vpack.c.bf16 %v1093_v56, %v1092_v55  ;;  %v1807_v55 = vld [vmem:[#allocation8 + $0x1d8] sm:$0xff] }
 0x22d   : > { %8646 = vmatpush3.bf16.msra.mxu1 %v11078_v23 }
 0x22e   : > { %8648 = vmatprep.subr.bf16.mxu1 %v11086_v26 }
 0x22f   : > { %8578 = vmatpush3.bf16.msra.mxu0 %v8575_v59  ;;  %v1095_v59 = vld [vmem:[#allocation8 + $0x78] sm:$0xff] }
 0x230   : > { %8580 = vmatprep.subr.bf16.mxu0 %v8579_v62  ;;  %v8615_v60 = vpack.c.bf16 %v1095_v59, %v1094_v58  ;;  %v1809_v58 = vld [vmem:[#allocation8 + $0x1e8] sm:$0xff] }
 0x231   : > { %8650 = vmatpush3.bf16.msra.mxu1 %v11086_v26 }
 0x232   : > { %8684 = vmatprep.subr.bf16.mxu1 %v11034_v4 }
 0x233   : > { %8582 = vmatpush3.bf16.msra.mxu0 %v8579_v62  ;;  %v1553_v62 = vld [vmem:[#allocation8 + $0x108] sm:$0xff] }
 0x234   : > { %7211 = vmatmul.mubr.f32.vlgmr.msra.gmra.mrb[8].mxu1 %v1439_v2  ;;  %8584 = vmatprep.subr.bf16.mxu0 %v8583_v1  ;;  %v8651_v63 = vpack.c.bf16 %v1553_v62, %v1552_v61  ;;  %v1811_v61 = vld [vmem:[#allocation8 + $0x1f8] sm:$0xff] }
 0x235   : > { %8686 = vmatpush3.bf16.msra.mxu1 %v11034_v4  ;;  %7213 = vmatprep.mubr.f32.mxu1 %v1440_v3  ;;  %v1682_v4 = vld [vmem:[#allocation6 + $0xc0] sm:$0xff] }
 0x236   : > { %8688 = vmatprep.subr.bf16.mxu1 %v11037_v6 }
 0x237   : > { %8586 = vmatpush3.bf16.msra.mxu0 %v8583_v1  ;;  %v1555_v1 = vld [vmem:[#allocation8 + $0x118] sm:$0xff] }
 0x238   : > { %7214 = vmatmul.mubr.f32.gmra.mrb[10].mxu1 %v1441_v5  ;;  %v8655_v3 = vpack.c.bf16 %v1555_v1, %v1554_v0  ;;  %v1962_v0 = vld [vmem:[%s11947_s16 + $0x18] sm:$0xff] }
 0x239   : > { %8690 = vmatpush3.bf16.msra.mxu1 %v11037_v6  ;;  %7216 = vmatprep.mubr.f32.mxu1 %v1442_v7  ;;  %v1683_v6 = vld [vmem:[#allocation6 + $0xc8] sm:$0xff]  ;;  %v1556_v7 = vld [vmem:[#allocation8 + $0x120] sm:$0xff] }
 0x23a   : > { %8692 = vmatprep.subr.bf16.mxu1 %v11046_v9 }
 0x23c   : > { %7217 = vmatmul.mubr.f32.gmra.mrb[12].mxu1 %v1443_v8  ;;  %v1557_v8 = vld [vmem:[#allocation8 + $0x128] sm:$0xff] }
 0x23d   : > { %8694 = vmatpush3.bf16.msra.mxu1 %v11046_v9  ;;  %7219 = vmatprep.mubr.f32.mxu1 %v1444_v10  ;;  %v1684_v9 = vld [vmem:[#allocation6 + $0xd0] sm:$0xff] }
 0x23e   : > { %8696 = vmatprep.subr.bf16.mxu1 %v11054_v14 }
 0x240   : > { %7220 = vmatmul.mubr.f32.gmra.mrb[14].mxu1 %v1445_v11  ;;  %v8659_v11 = vpack.c.bf16 %v1557_v8, %v1556_v7  ;;  %v1965_v7 = vld [vmem:[%s11947_s16 + $0x30] sm:$0xff]  ;;  %v1966_v8 = vld [vmem:[%s11947_s16 + $0x38] sm:$0xff] }
 0x241   : > { %8698 = vmatpush3.bf16.msra.mxu1 %v11054_v14  ;;  %7298 = vmatprep.mubr.f32.mxu1 %v1682_v4  ;;  %v1687_v14 = vld [vmem:[#allocation6 + $0xe8] sm:$0xff] }
 0x242   : > { %8700 = vmatprep.subr.bf16.mxu1 %v11062_v17 }
 0x245   : > { %8702 = vmatpush3.bf16.msra.mxu1 %v11062_v17  ;;  %v1080_v17 = vld [vmem:[#allocation8] sm:$0xff] }
 0x246   : > { %8704 = vmatprep.subr.bf16.mxu1 %v11070_v20  ;;  %v8587_v19 = vpack.c.bf16 %v1081_v18, %v1080_v17 }
 0x248   : > { %8588 = vmatprep.subr.bf16.mxu0 %v8587_v19 }
 0x249   : > { %8706 = vmatpush3.bf16.msra.mxu1 %v11070_v20  ;;  %v1959_v20 = vld [vmem:[%s11947_s16] sm:$0xff] }
 0x24a   : > { %8708 = vmatprep.subr.bf16.mxu1 %v11078_v23 }
 0x24d   : > { %8710 = vmatpush3.bf16.msra.mxu1 %v11078_v23  ;;  %v11134_v23 = vpack.c.bf16 %v1960_v21, %v1959_v20  ;;  %v1562_v20 = vld [vmem:[#allocation8 + $0x150] sm:$0xff]  ;;  %v1563_v21 = vld [vmem:[#allocation8 + $0x158] sm:$0xff] }
 0x24e   : > { %8712 = vmatprep.subr.bf16.mxu1 %v11086_v26  ;;  %v8671_v24 = vpack.c.bf16 %v1563_v21, %v1562_v20  ;;  %v10409_v20 = vmov 0.0  }
 0x251   : > { %8714 = vmatpush3.bf16.msra.mxu1 %v11086_v26 }
 0x252   : > { %8747 = vmatprep.subr.bf16.mxu1 %v10407_v22 }
 0x254   : > { %7299 = vmatmul.mubr.f32.vlgmr.msra.gmra.mrb[16].mxu1 %v1683_v6  ;;  %v1558_v6 = vld [vmem:[#allocation8 + $0x130] sm:$0xff] }
 0x255   : > { %7301 = vmatprep.mubr.f32.mxu1 %v1684_v9  ;;  %8749 = vmatpush3.bf16.msra.mxu1 %v11134_v23  ;;  %v1559_v9 = vld [vmem:[#allocation8 + $0x138] sm:$0xff] }
 0x256   : > { %8750 = vmatprep.subr.bf16.mxu1 %v10407_v22 }
 0x258   : > { %7302 = vmatmul.mubr.f32.gmra.mrb[18].mxu1 %v1685_v12 }
 0x259   : > { %7304 = vmatprep.mubr.f32.mxu1 %v1686_v13  ;;  %v8663_v13 = vpack.c.bf16 %v1559_v9, %v1558_v6  ;;  %v1969_v9 = vld [vmem:[%s11947_s16 + $0x50] sm:$0xff] }
 0x25c   : > { %7305 = vmatmul.mubr.f32.gmra.mrb[20].mxu1 %v1687_v14 }
 0x25d   : > { %7307 = vmatprep.mubr.f32.mxu1 %v1688_v15  ;;  %v1560_v15 = vld [vmem:[#allocation8 + $0x140] sm:$0xff] }
 0x260   : > { %7308 = vmatmul.mubr.f32.gmra.mrb[22].mxu1 %v1689_v16  ;;  %v1561_v16 = vld [vmem:[#allocation8 + $0x148] sm:$0xff] }
 0x261   : > { %v8667_v18 = vpack.c.bf16 %v1561_v16, %v1560_v15  ;;  %v1972_v15 = vld [vmem:[%s11947_s16 + $0x68] sm:$0xff]  ;;  %7386 = vmatprep.mubr.msk.f32.mxu1 %vm10408_vm0, %v10409_v20 }
 0x2e7   : > { %v7080_v26 = vpop.f32.mrb[0].mxu1  ;;  %v11138_v27 = vpop.f32.mrb[0].mxu0 }
 0x2e8   : > { %v1171_v28 = vpop.f32.mrb[1].mxu1  ;;  %v1041_v30 = vpop.f32.mrb[1].mxu0 }
 0x2e9   : > { %7122 = vmatprep.mubr.f32.mxu0 %v1171_v28  ;;  %v1566_v28 = vld [vmem:[#allocation8 + $0x170] sm:$0xff] }
 0x2ea   : > { %7123 = vmatmul.mubr.f32.vlgmr.msra.gmra.mrb[8].mxu0 %v7080_v26  ;;  %v1565_v26 = vld [vmem:[#allocation8 + $0x168] sm:$0xff] }
 0x2eb   : > { %8590 = vmatpush3.bf16.msra.mxu0 %v8587_v19  ;;  %v7083_v33 = vpop.f32.mrb[2].mxu1  ;;  %v11140_v34 = vpop.f32.mrb[2].mxu0 }
 0x2ec   : > { %8592 = vmatprep.subr.bf16.mxu0 %v8591_v29  ;;  %v1181_v36 = vpop.f32.mrb[3].mxu1  ;;  %v1051_v37 = vpop.f32.mrb[3].mxu0 }
 0x2ed   : > { %7125 = vmatprep.mubr.f32.mxu0 %v1181_v36 }
 0x2ee   : > { %7126 = vmatmul.mubr.f32.gmra.mrb[10].mxu0 %v7083_v33  ;;  %v8715_v33 = vpack.c.bf16 %v1797_v32, %v1796_v31 }
 0x2ef   : > { %8594 = vmatpush3.bf16.msra.mxu0 %v8591_v29  ;;  %v7086_v40 = vpop.f32.mrb[4].mxu1  ;;  %v11142_v41 = vpop.f32.mrb[4].mxu0  ;;  %v1567_v29 = vld [vmem:[#allocation8 + $0x178] sm:$0xff] }
 0x2f0   : > { %8596 = vmatprep.subr.bf16.mxu0 %v8595_v35  ;;  %v1191_v43 = vpop.f32.mrb[5].mxu1  ;;  %v1061_v44 = vpop.f32.mrb[5].mxu0 }
 0x2f1   : > { %7128 = vmatprep.mubr.f32.mxu0 %v1191_v43 }
 0x2f2   : > { %7129 = vmatmul.mubr.f32.gmra.mrb[12].mxu0 %v7086_v40  ;;  %v1801_v40 = vld [vmem:[#allocation8 + $0x1a8] sm:$0xff] }
 0x2f3   : > { %8598 = vmatpush3.bf16.msra.mxu0 %v8595_v35  ;;  %v7089_v47 = vpop.f32.mrb[6].mxu1  ;;  %v11144_v48 = vpop.f32.mrb[6].mxu0  ;;  %v1799_v35 = vld [vmem:[#allocation8 + $0x198] sm:$0xff] }
 0x2f4   : > { %8600 = vmatprep.subr.bf16.mxu0 %v8599_v42  ;;  %v1201_v50 = vpop.f32.mrb[7].mxu1  ;;  %v1071_v51 = vpop.f32.mrb[7].mxu0 }
 0x2f5   : > { %7131 = vmatprep.mubr.f32.mxu0 %v1201_v50  ;;  %v1805_v50 = vld [vmem:[#allocation8 + $0x1c8] sm:$0xff] }
 0x2f6   : > { %7132 = vmatmul.mubr.f32.gmra.mrb[14].mxu0 %v7089_v47 }
 0x2f7   : > { %8602 = vmatpush3.bf16.msra.mxu0 %v8599_v42  ;;  %7166 = vmatprep.mubr.f32.mxu0 %v1041_v30  ;;  %v8679_v30 = vpack.c.bf16 %v1567_v29, %v1566_v28  ;;  %v8723_v42 = vpack.c.bf16 %v1801_v40, %v1800_v39 }
 0x2f8   : > { %8604 = vmatprep.subr.bf16.mxu0 %v8603_v49 }
 0x2fb   : > { %8606 = vmatpush3.bf16.msra.mxu0 %v8603_v49  ;;  %v1804_v49 = vld [vmem:[#allocation8 + $0x1c0] sm:$0xff] }
 0x2fc   : > { %8608 = vmatprep.subr.bf16.mxu0 %v8607_v54  ;;  %v8731_v52 = vpack.c.bf16 %v1805_v50, %v1804_v49 }
 0x2ff   : > { %8610 = vmatpush3.bf16.msra.mxu0 %v8607_v54  ;;  %v1806_v54 = vld [vmem:[#allocation8 + $0x1d0] sm:$0xff] }
 0x300   : > { %8612 = vmatprep.subr.bf16.mxu0 %v8611_v57  ;;  %v8735_v56 = vpack.c.bf16 %v1807_v55, %v1806_v54 }
 0x303   : > { %8614 = vmatpush3.bf16.msra.mxu0 %v8611_v57  ;;  %v1808_v57 = vld [vmem:[#allocation8 + $0x1e0] sm:$0xff] }
 0x304   : > { %8616 = vmatprep.subr.bf16.mxu0 %v8615_v60  ;;  %v8739_v59 = vpack.c.bf16 %v1809_v58, %v1808_v57 }
 0x307   : > { %8618 = vmatpush3.bf16.msra.mxu0 %v8615_v60  ;;  %v7212_v2 = vpop.f32.mrb[8].mxu1  ;;  %v1810_v60 = vld [vmem:[#allocation8 + $0x1f0] sm:$0xff] }
 0x308   : > { %8652 = vmatprep.subr.bf16.mxu0 %v8651_v63  ;;  %v1512_v5 = vpop.f32.mrb[9].mxu1  ;;  %v8743_v62 = vpack.c.bf16 %v1811_v61, %v1810_v60 }
 0x30a   : > { %7167 = vmatmul.mubr.f32.vlgmr.msra.gmra.mrb[8].mxu0 %v11138_v27  ;;  %v8675_v27 = vpack.c.bf16 %v1565_v26, %v1564_v25 }
 0x30b   : > { %8654 = vmatpush3.bf16.msra.mxu0 %v8651_v63  ;;  %7169 = vmatprep.mubr.f32.mxu0 %v1051_v37  ;;  %v7215_v10 = vpop.f32.mrb[10].mxu1  ;;  %v1961_v63 = vld [vmem:[%s11947_s16 + $0x10] sm:$0xff] }
 0x30c   : > { %8656 = vmatprep.subr.bf16.mxu0 %v8655_v3  ;;  %v1522_v4 = vpop.f32.mrb[11].mxu1  ;;  %v11156_v1 = vpack.c.bf16 %v1962_v0, %v1961_v63  ;;  %v2288_v0 = vld [vmem:[#allocation9 + $0x20] sm:$0xff] }
 0x30e   : > { %7170 = vmatmul.mubr.f32.gmra.mrb[10].mxu0 %v11140_v34  ;;  %v1798_v34 = vld [vmem:[#allocation8 + $0x190] sm:$0xff]  ;;  %8752 = vmatpush3.bf16.msra.mxu1 %v11156_v1 }
 0x30f   : > { %8658 = vmatpush3.bf16.msra.mxu0 %v8655_v3  ;;  %7172 = vmatprep.mubr.f32.mxu0 %v1061_v44  ;;  %v7218_v12 = vpop.f32.mrb[12].mxu1  ;;  %v8719_v37 = vpack.c.bf16 %v1799_v35, %v1798_v34  ;;  %v1802_v44 = vld [vmem:[#allocation8 + $0x1b0] sm:$0xff]  ;;  %v1964_v3 = vld [vmem:[%s11947_s16 + $0x28] sm:$0xff] }
 0x310   : > { %8660 = vmatprep.subr.bf16.mxu0 %v8659_v11  ;;  %v1532_v14 = vpop.f32.mrb[13].mxu1  ;;  %v8727_v47 = vpack.c.bf16 %v1803_v45, %v1802_v44  ;;  %8753 = vmatprep.subr.bf16.mxu1 %v10407_v22 }
 0x312   : > { %7173 = vmatmul.mubr.f32.gmra.mrb[12].mxu0 %v11142_v41 }
 0x313   : > { %8662 = vmatpush3.bf16.msra.mxu0 %v8659_v11  ;;  %7175 = vmatprep.mubr.f32.mxu0 %v1071_v51  ;;  %v7221_v17 = vpop.f32.mrb[14].mxu1  ;;  %v1967_v11 = vld [vmem:[%s11947_s16 + $0x40] sm:$0xff] }
 0x314   : > { %8664 = vmatprep.subr.bf16.mxu0 %v8663_v13  ;;  %v1542_v19 = vpop.f32.mrb[15].mxu1 }
 0x316   : > { %7176 = vmatmul.mubr.f32.gmra.mrb[14].mxu0 %v11144_v48 }
 0x317   : > { %8666 = vmatpush3.bf16.msra.mxu0 %v8663_v13  ;;  %7254 = vmatprep.mubr.f32.mxu0 %v1512_v5 }
 0x318   : > { %8668 = vmatprep.subr.bf16.mxu0 %v8667_v18 }
 0x31b   : > { %8670 = vmatpush3.bf16.msra.mxu0 %v8667_v18  ;;  %v1974_v18 = vld [vmem:[%s11947_s16 + $0x78] sm:$0xff] }
 0x31c   : > { %8672 = vmatprep.subr.bf16.mxu0 %v8671_v24 }
 0x31f   : > { %8674 = vmatpush3.bf16.msra.mxu0 %v8671_v24 }
 0x320   : > { %8676 = vmatprep.subr.bf16.mxu0 %v8675_v27 }
 0x323   : > { %8678 = vmatpush3.bf16.msra.mxu0 %v8675_v27 }
 0x324   : > { %8680 = vmatprep.subr.bf16.mxu0 %v8679_v30 }
 0x327   : > { %8682 = vmatpush3.bf16.msra.mxu0 %v8679_v30  ;;  %v7300_v36 = vpop.f32.mrb[16].mxu1 }
 0x328   : > { %8716 = vmatprep.subr.bf16.mxu0 %v8715_v33  ;;  %v1756_v38 = vpop.f32.mrb[17].mxu1 }
 0x32a   : > { %7255 = vmatmul.mubr.f32.vlgmr.msra.gmra.mrb[8].mxu0 %v7212_v2  ;;  %v1963_v2 = vld [vmem:[%s11947_s16 + $0x20] sm:$0xff] }
 0x32b   : > { %8718 = vmatpush3.bf16.msra.mxu0 %v8715_v33  ;;  %7257 = vmatprep.mubr.f32.mxu0 %v1522_v4  ;;  %v7303_v41 = vpop.f32.mrb[18].mxu1  ;;  %v11166_v5 = vpack.c.bf16 %v1964_v3, %v1963_v2  ;;  %v1968_v4 = vld [vmem:[%s11947_s16 + $0x48] sm:$0xff]  ;;  %v2119_v2 = vlaneseq }
 0x32c   : > { %8720 = vmatprep.subr.bf16.mxu0 %v8719_v37  ;;  %v1766_v43 = vpop.f32.mrb[19].mxu1  ;;  %v11186_v6 = vpack.c.bf16 %v1968_v4, %v1967_v11 }
 0x32d   : > { %8755 = vmatpush3.bf16.msra.mxu1 %v11166_v5  ;;  %v2120_v3 = vshrl.u32 %v2119_v2, 7  ;;  %v2394_v2 = vld [vmem:[#allocation11 + $0xa0] sm:$0xff] }
 0x32e   : > { %7258 = vmatmul.mubr.f32.gmra.mrb[10].mxu0 %v7215_v10  ;;  %8756 = vmatprep.subr.bf16.mxu1 %v10407_v22  ;;  %v11176_v10 = vpack.c.bf16 %v1966_v8, %v1965_v7 }
 0x32f   : > { %8722 = vmatpush3.bf16.msra.mxu0 %v8719_v37  ;;  %7260 = vmatprep.mubr.f32.mxu0 %v1532_v14  ;;  %v7306_v46 = vpop.f32.mrb[20].mxu1  ;;  %v1971_v14 = vld [vmem:[%s11947_s16 + $0x60] sm:$0xff] }
 0x330   : > { %8724 = vmatprep.subr.bf16.mxu0 %v8723_v42  ;;  %v1776_v48 = vpop.f32.mrb[21].mxu1  ;;  %v11206_v16 = vpack.c.bf16 %v1972_v15, %v1971_v14 }
 0x331   : > { %8758 = vmatpush3.bf16.msra.mxu1 %v11176_v10 }
 0x332   : > { %7261 = vmatmul.mubr.f32.gmra.mrb[12].mxu0 %v7218_v12  ;;  %8759 = vmatprep.subr.bf16.mxu1 %v10407_v22  ;;  %v1970_v12 = vld [vmem:[%s11947_s16 + $0x58] sm:$0xff] }
 0x333   : > { %8726 = vmatpush3.bf16.msra.mxu0 %v8723_v42  ;;  %7263 = vmatprep.mubr.f32.mxu0 %v1542_v19  ;;  %v7309_v51 = vpop.f32.mrb[22].mxu1  ;;  %v11196_v13 = vpack.c.bf16 %v1970_v12, %v1969_v9 }
 0x334   : > { %8728 = vmatprep.subr.bf16.mxu0 %v8727_v47  ;;  %v1786_v53 = vpop.f32.mrb[23].mxu1 }
 0x335   : > { %8761 = vmatpush3.bf16.msra.mxu1 %v11186_v6 }
 0x336   : > { %7264 = vmatmul.mubr.f32.gmra.mrb[14].mxu0 %v7221_v17  ;;  %8762 = vmatprep.subr.bf16.mxu1 %v10407_v22  ;;  %v1973_v17 = vld [vmem:[%s11947_s16 + $0x70] sm:$0xff] }
 0x337   : > { %8730 = vmatpush3.bf16.msra.mxu0 %v8727_v47  ;;  %7342 = vmatprep.mubr.f32.mxu0 %v1756_v38  ;;  %v8769_v19 = vpack.c.bf16 %v1974_v18, %v1973_v17 }
 0x338   : > { %8732 = vmatprep.subr.bf16.mxu0 %v8731_v52 }
 0x339   : > { %8764 = vmatpush3.bf16.msra.mxu1 %v11196_v13 }
 0x33a   : > { %8765 = vmatprep.subr.bf16.mxu1 %v10407_v22 }
 0x33b   : > { %8734 = vmatpush3.bf16.msra.mxu0 %v8731_v52 }
 0x33c   : > { %8736 = vmatprep.subr.bf16.mxu0 %v8735_v56 }
 0x33d   : > { %8767 = vmatpush3.bf16.msra.mxu1 %v11206_v16 }
 0x33e   : > { %8768 = vmatprep.subr.bf16.mxu1 %v10407_v22 }
 0x33f   : > { %8738 = vmatpush3.bf16.msra.mxu0 %v8735_v56 }
 0x340   : > { %8740 = vmatprep.subr.bf16.mxu0 %v8739_v59 }
 0x341   : > { %8770 = vmatpush3.bf16.msra.mxu1 %v8769_v19 }
 0x342   : > { %8771 = vmatprep.subr.bf16.mxu1 %v10407_v22 }
 0x343   : > { %8742 = vmatpush3.bf16.msra.mxu0 %v8739_v59 }
 0x344   : > { %8744 = vmatprep.subr.bf16.mxu0 %v8743_v62 }
 0x347   : > { %8746 = vmatpush3.bf16.msra.mxu0 %v8743_v62 }
 0x34a   : > { %7343 = vmatmul.mubr.f32.vlgmr.msra.gmra.mrb[8].mxu0 %v7300_v36 }
 0x34b   : > { %7345 = vmatprep.mubr.f32.mxu0 %v1766_v43 }
 0x34e   : > { %7346 = vmatmul.mubr.f32.gmra.mrb[10].mxu0 %v7303_v41 }
 0x34f   : > { %7348 = vmatprep.mubr.f32.mxu0 %v1776_v48 }
 0x352   : > { %7349 = vmatmul.mubr.f32.gmra.mrb[12].mxu0 %v7306_v46 }
 0x353   : > { %7351 = vmatprep.mubr.f32.mxu0 %v1786_v53 }
 0x356   : > { %7352 = vmatmul.mubr.f32.gmra.mrb[14].mxu0 %v7309_v51 }
 0x41d   : > { %v11219_v21 = vpop.f32.mrb[8].mxu0 }
 0x41e   : > { %v1939_v24 = vmul.f32 %v11219_v21, %v11219_v21  ;;  %v11223_v25 = vpop.f32.mrb[9].mxu0 }
 0x41f   : > { %v1925_v26 = vadd.f32 %v11219_v21, %v11223_v25  ;;  %v1938_v27 = vmul.f32 %v11223_v25, %v11223_v25 }
 0x421   : > { %v1946_v28 = vadd.f32 %v1939_v24, %v1938_v27  ;;  %v11229_v29 = vpop.f32.mrb[10].mxu0 }
 0x422   : > { %v11231_v30 = vpop.f32.mrb[11].mxu0  ;;  %v1941_v33 = vmul.f32 %v11229_v29, %v11229_v29 }
 0x423   : > { %v1926_v31 = vadd.f32 %v1925_v26, %v11231_v30  ;;  %v1940_v32 = vmul.f32 %v11231_v30, %v11231_v30 }
 0x425   : > { %v1947_v34 = vadd.f32 %v1946_v28, %v1940_v32  ;;  %v11238_v35 = vpop.f32.mrb[12].mxu0  ;;  %v1927_v36 = vadd.f32 %v11229_v29, %v1926_v31 }
 0x426   : > { %v11241_v37 = vpop.f32.mrb[13].mxu0  ;;  %v1943_v41 = vmul.f32 %v11238_v35, %v11238_v35 }
 0x427   : > { %v1928_v38 = vadd.f32 %v1927_v36, %v11241_v37  ;;  %v1942_v39 = vmul.f32 %v11241_v37, %v11241_v37  ;;  %v1948_v40 = vadd.f32 %v1947_v34, %v1941_v33 }
 0x429   : > { %v1949_v42 = vadd.f32 %v1948_v40, %v1942_v39  ;;  %v11248_v43 = vpop.f32.mrb[14].mxu0  ;;  %v1929_v44 = vadd.f32 %v11238_v35, %v1928_v38 }
 0x42a   : > { %v11251_v45 = vpop.f32.mrb[15].mxu0  ;;  %v1945_v49 = vmul.f32 %v11248_v43, %v11248_v43 }
 0x42b   : > { %v1930_v46 = vadd.f32 %v1929_v44, %v11251_v45  ;;  %v1944_v47 = vmul.f32 %v11251_v45, %v11251_v45  ;;  %v1950_v48 = vadd.f32 %v1949_v42, %v1943_v41 }
 0x42d   : > { %v1931_v50 = vadd.f32 %v11248_v43, %v1930_v46  ;;  %v1951_v51 = vadd.f32 %v1950_v48, %v1944_v47 }
 0x42f   : > { %v1932_v52 = vrot.slane %v1931_v50, 4  ;;  %v1952_v53 = vadd.f32 %v1951_v51, %v1945_v49 }
 0x431   : > { %v1933_v54 = vadd.f32 %v1932_v52, %v1931_v50  ;;  %v1953_v59 = vrot.slane %v1952_v53, 4 }
 0x433   : > { %v1934_v55 = vrot.slane %v1933_v54, 2  ;;  %v1954_v60 = vadd.f32 %v1953_v59, %v1952_v53  ;;  %v2289_v59 = vld [vmem:[#allocation9 + $0x28] sm:$0xff] }
 0x435   : > { %v1935_v56 = vadd.f32 %v1934_v55, %v1933_v54 }
 0x437   : > { %v1936_v57 = vrot.slane %v1935_v56, 1 }
 0x439   : > { %v1937_v58 = vadd.f32 %v1936_v57, %v1935_v56  ;;  %v2390_v56 = vld [vmem:[#allocation11 + $0x80] sm:$0xff]  ;;  %v2391_v57 = vld [vmem:[#allocation11 + $0x88] sm:$0xff] }
 0x43b   : > { %7387 = vmatmul.mubr.f32.vlgmr.msra.gmra.mrb[24].mxu1 %v1937_v58  ;;  %v8827_v58 = vpack.c.bf16 %v2391_v57, %v2390_v56 }
 0x43c   : > { %8773 = vmatpush3.bf16.msra.mxu1 %v11134_v23  ;;  %7421 = vmatprep.mubr.msk.f32.mxu1 %vm10408_vm0, %v10409_v20  ;;  %v1955_v23 = vrot.slane %v1954_v60, 2 }
 0x43d   : > { %8774 = vmatprep.subr.bf16.mxu1 %v10407_v22 }
 0x43e   : > { %v1956_v61 = vadd.f32 %v1955_v23, %v1954_v60  ;;  %v2170_v60 = vld [vmem:[#allocation9 + $0x8] sm:$0xff]  ;;  %v2290_v23 = vld [vmem:[#allocation9 + $0x30] sm:$0xff] }
 0x440   : > { %8776 = vmatpush3.bf16.msra.mxu1 %v11156_v1  ;;  %v1957_v62 = vrot.slane %v1956_v61, 1  ;;  %v2169_v1 = vld [vmem:[#allocation9] sm:$0xff] }
 0x441   : > { %8777 = vmatprep.subr.bf16.mxu1 %v10407_v22  ;;  %7440 = vmatprep.mubr.msk.f32.mxu0 %vm2173_vm1, %v2169_v1  ;;  %v2172_v1 = vld [vmem:[#allocation9 + $0x18] sm:$0xff] }
 0x442   : > { %v1958_v63 = vadd.f32 %v1957_v62, %v1956_v61  ;;  %v2171_v61 = vld [vmem:[#allocation9 + $0x10] sm:$0xff] }
 0x443   : > { %v2392_v62 = vld [vmem:[#allocation11 + $0x90] sm:$0xff] }
 0x444   : > { %8779 = vmatpush3.bf16.msra.mxu1 %v11166_v5  ;;  %v11277_v5 = vsub.s32 0, %v2120_v3  ;;  %v2395_v3 = vld [vmem:[#allocation11 + $0xa8] sm:$0xff] }
 0x445   : > { %8780 = vmatprep.subr.bf16.mxu1 %v10407_v22 }
 0x448   : > { %8782 = vmatpush3.bf16.msra.mxu1 %v11176_v10 }
 0x449   : > { %8783 = vmatprep.subr.bf16.mxu1 %v10407_v22 }
 0x44c   : > { %8785 = vmatpush3.bf16.msra.mxu1 %v11186_v6 }
 0x44d   : > { %8786 = vmatprep.subr.bf16.mxu1 %v10407_v22 }
 0x450   : > { %8788 = vmatpush3.bf16.msra.mxu1 %v11196_v13 }
 0x451   : > { %8789 = vmatprep.subr.bf16.mxu1 %v10407_v22 }
 0x454   : > { %8791 = vmatpush3.bf16.msra.mxu1 %v11206_v16 }
 0x455   : > { %8792 = vmatprep.subr.bf16.mxu1 %v10407_v22 }
 0x458   : > { %8794 = vmatpush3.bf16.msra.mxu1 %v8769_v19 }
 0x45b   : > { %7422 = vmatmul.mubr.f32.vlgmr.msra.gmra.mrb[26].mxu1 %v1958_v63  ;;  %v2393_v63 = vld [vmem:[#allocation11 + $0x98] sm:$0xff] }
 0x45c   : > { %7462 = vmatprep.mubr.msk.f32.mxu1 %vm2173_vm1, %v2288_v0  ;;  %v2291_v0 = vld [vmem:[#allocation9 + $0x38] sm:$0xff] }
 0x50e   : > { %v2041_v7 = vpop.f32.mrb[24].mxu1 }
 0x50f   : > { %v2045_v8 = vmul.f32 0.00024414063, %v2041_v7  ;;  %v7388_v10 = vpop.f32.mrb[25].mxu1  ;;  %v2577_v7 = vld [vmem:[#allocation9 + $0x40] sm:$0xff] }
 0x510   : > { %v8835_v10 = vpack.c.bf16 %v2395_v3, %v2394_v2 }
 0x511   : > { %v2122_v11 = vrot.slane %v2045_v8, %v11277_v5  ;;  %v2117_v18 = vmul.f32 %v2045_v8, %v2045_v8  ;;  %v8831_v8 = vpack.c.bf16 %v2393_v63, %v2392_v62  ;;  %v2280_v62 = vld [vmem:[#allocation11 + $0x48] sm:$0xff] }
 0x513   : > { %v2123_v4 = vsub.f32 %v11223_v25, %v2122_v11  ;;  %v2124_v6 = vsub.f32 %v11219_v21, %v2122_v11  ;;  %v2125_v9 = vsub.f32 %v11231_v30, %v2122_v11  ;;  %v2126_v12 = vsub.f32 %v11229_v29, %v2122_v11 }
 0x514   : > { %v2127_v13 = vsub.f32 %v11241_v37, %v2122_v11  ;;  %v2128_v14 = vsub.f32 %v11238_v35, %v2122_v11  ;;  %v2129_v15 = vsub.f32 %v11251_v45, %v2122_v11  ;;  %v2130_v16 = vsub.f32 %v11248_v43, %v2122_v11  ;;  %v2396_v11 = vld [vmem:[#allocation11 + $0xb0] sm:$0xff] }
 0x52e   : > { %v2112_v17 = vpop.f32.mrb[26].mxu1 }
 0x52f   : > { %v2116_v19 = vmul.f32 0.00024414063, %v2112_v17  ;;  %v7423_v24 = vpop.f32.mrb[27].mxu1  ;;  %v2579_v17 = vld [vmem:[#allocation9 + $0x50] sm:$0xff] }
 0x530   : > { %v2402_v24 = vld [vmem:[#allocation11 + $0xe0] sm:$0xff] }
 0x531   : > { %v2118_v26 = vsub.f32 %v2116_v19, %v2117_v18  ;;  %v2580_v19 = vld [vmem:[#allocation9 + $0x58] sm:$0xff] }
 0x533   : > { %v2131_v25 = vadd.f32 1e-05, %v2118_v26  ;;  %v2403_v26 = vld [vmem:[#allocation11 + $0xe8] sm:$0xff] }
 0x535   : > { %9825 = vrsqrt.f32 %v2131_v25  ;;  %v2785_v25 = vld [vmem:[#allocation9 + $0x60] sm:$0xff] }
 0x53f   : > { %v9826_v21 = vpop.eup %9825 }
 0x540   : > { %v2136_v27 = vrot.slane %v9826_v21, %v11277_v5  ;;  %v8851_v21 = vpack.c.bf16 %v2403_v26, %v2402_v24 }
 0x542   : > { %v2137_v28 = vmul.f32 %v2136_v27, %v2123_v4  ;;  %v2138_v29 = vmul.f32 %v2136_v27, %v2124_v6  ;;  %v2139_v30 = vmul.f32 %v2136_v27, %v2125_v9  ;;  %v2140_v31 = vmul.f32 %v2136_v27, %v2126_v12  ;;  %v2397_v4 = vld [vmem:[#allocation11 + $0xb8] sm:$0xff]  ;;  %v2398_v9 = vld [vmem:[#allocation11 + $0xc0] sm:$0xff]  ;;  %v2399_v12 = vld [vmem:[#allocation11 + $0xc8] sm:$0xff] }
 0x543   : > { %v2141_v32 = vmul.f32 %v2136_v27, %v2127_v13  ;;  %v2142_v33 = vmul.f32 %v2136_v27, %v2128_v14  ;;  %v2143_v34 = vmul.f32 %v2136_v27, %v2129_v15  ;;  %v2144_v35 = vmul.f32 %v2136_v27, %v2130_v16  ;;  %v2578_v14 = vld [vmem:[#allocation9 + $0x48] sm:$0xff]  ;;  %v2400_v15 = vld [vmem:[#allocation11 + $0xd0] sm:$0xff]  ;;  %v2401_v16 = vld [vmem:[#allocation11 + $0xd8] sm:$0xff] }
 0x544   : > { %vm2145_vm2 = vcmp.gt.f32.partialorder %v2137_v28, 0.0  ;;  %vm2146_vm3 = vcmp.gt.f32.partialorder %v2138_v29, 0.0  ;;  %v2153_v36 = vmul.f32 0.2, %v2137_v28  ;;  %v2154_v37 = vmul.f32 0.2, %v2138_v29 }
 0x545   : > { %vm2147_vm4 = vcmp.gt.f32.partialorder %v2139_v30, 0.0  ;;  %vm2148_vm5 = vcmp.gt.f32.partialorder %v2140_v31, 0.0  ;;  %v2155_v38 = vmul.f32 0.2, %v2139_v30  ;;  %v2156_v39 = vmul.f32 0.2, %v2140_v31 }
 0x546   : > { %v2161_v40 = vsel %vm2145_vm2, %v2137_v28, %v2153_v36  ;;  %v2162_v41 = vsel %vm2146_vm3, %v2138_v29, %v2154_v37  ;;  %vm2149_vm6 = vcmp.gt.f32.partialorder %v2141_v32, 0.0  ;;  %vm2150_vm7 = vcmp.gt.f32.partialorder %v2142_v33, 0.0  ;;  %v2404_v27 = vld [vmem:[#allocation11 + $0xf0] sm:$0xff]  ;;  %v2405_v28 = vld [vmem:[#allocation11 + $0xf8] sm:$0xff]  ;;  %v3014_v36 = vld [vmem:[#allocation12] sm:$0xff] }
 0x547   : > { %v11289_v42 = vpack.c.bf16 %v2162_v41, %v2161_v40  ;;  %v2163_v43 = vsel %vm2147_vm4, %v2139_v30, %v2155_v38  ;;  %v2164_v44 = vsel %vm2148_vm5, %v2140_v31, %v2156_v39  ;;  %v2157_v45 = vmul.f32 0.2, %v2141_v32  ;;  %v2786_v30 = vld [vmem:[#allocation9 + $0x68] sm:$0xff]  ;;  %v2787_v31 = vld [vmem:[#allocation9 + $0x70] sm:$0xff]  ;;  %v3017_v40 = vld [vmem:[#allocation12 + $0x18] sm:$0xff] }
 0x548   : > { %v11291_v46 = vpack.c.bf16 %v2164_v44, %v2163_v43  ;;  %v2158_v47 = vmul.f32 0.2, %v2142_v33  ;;  %vm2151_vm8 = vcmp.gt.f32.partialorder %v2143_v34, 0.0  ;;  %vm2152_vm9 = vcmp.gt.f32.partialorder %v2144_v35, 0.0  ;;  %v3015_v37 = vld [vmem:[#allocation12 + $0x8] sm:$0xff]  ;;  %v3016_v38 = vld [vmem:[#allocation12 + $0x10] sm:$0xff] }
 0x549   : > { %8796 = vmatprep.subr.bf16.mxu0 %v11289_v42  ;;  %8812 = vmatprep.subr.bf16.mxu1 %v11289_v42  ;;  %v2165_v48 = vsel %vm2149_vm6, %v2141_v32, %v2157_v45  ;;  %v2159_v49 = vmul.f32 0.2, %v2143_v34  ;;  %v2160_v50 = vmul.f32 0.2, %v2144_v35  ;;  %v8839_v6 = vpack.c.bf16 %v2397_v4, %v2396_v11  ;;  %v2788_v32 = vld [vmem:[#allocation9 + $0x78] sm:$0xff]  ;;  %v3019_v43 = vld [vmem:[#allocation12 + $0x28] sm:$0xff] }
 0x54a   : > { %8798 = vmatpush3.bf16.msra.mxu0 %v11289_v42  ;;  %8814 = vmatpush3.bf16.msra.mxu1 %v11289_v42  ;;  %v2166_v51 = vsel %vm2150_vm7, %v2142_v33, %v2158_v47  ;;  %v8843_v13 = vpack.c.bf16 %v2399_v12, %v2398_v9  ;;  %v8847_v18 = vpack.c.bf16 %v2401_v16, %v2400_v15  ;;  %v2271_v33 = vld [vmem:[#allocation11] sm:$0xff]  ;;  %v2273_v45 = vld [vmem:[#allocation11 + $0x10] sm:$0xff]  ;;  %v2286_v12 = vld [vmem:[#allocation11 + $0x78] sm:$0xff]  ;;  %vm4108_vm2 = vcmask 130048  }
 0x54b   : > { %8800 = vmatprep.subr.bf16.mxu0 %v11291_v46  ;;  %8816 = vmatprep.subr.bf16.mxu1 %v11291_v46  ;;  %v11300_v52 = vpack.c.bf16 %v2166_v51, %v2165_v48  ;;  %v2167_v53 = vsel %vm2151_vm8, %v2143_v34, %v2159_v49  ;;  %v2168_v54 = vsel %vm2152_vm9, %v2144_v35, %v2160_v50  ;;  %v2272_v34 = vld [vmem:[#allocation11 + $0x8] sm:$0xff]  ;;  %v2285_v9 = vld [vmem:[#allocation11 + $0x70] sm:$0xff]  ;;  %vm4945_vm4 = vcmask 64512  }
 0x54c   : > { %v11302_v55 = vpack.c.bf16 %v2168_v54, %v2167_v53  ;;  %v8855_v29 = vpack.c.bf16 %v2405_v28, %v2404_v27  ;;  %v8859_v35 = vpack.c.bf16 %v2272_v34, %v2271_v33  ;;  %v11347_v39 = vpack.c.bf16 %v3015_v37, %v3014_v36  ;;  %v2276_v53 = vld [vmem:[#allocation11 + $0x28] sm:$0xff]  ;;  %v2687_v33 = vld [vmem:[#allocation11 + $0x140] sm:$0xff]  ;;  %v2689_v36 = vld [vmem:[#allocation11 + $0x150] sm:$0xff] }
 0x54d   : > { %v11350_v41 = vpack.c.bf16 %v3017_v40, %v3016_v38  ;;  %v2680_v15 = vld [vmem:[#allocation11 + $0x108] sm:$0xff]  ;;  %v2690_v37 = vld [vmem:[#allocation11 + $0x158] sm:$0xff]  ;;  %v2691_v40 = vld [vmem:[#allocation11 + $0x160] sm:$0xff]  ;;  %vm5593_vm5 = vcmask 1043456   ;;  %vm5879_vm6 = vcmask 253952  }
 0x54e   : > { %8802 = vmatpush3.bf16.msra.mxu0 %v11291_v46  ;;  %8818 = vmatpush3.bf16.msra.mxu1 %v11291_v46  ;;  %v2688_v34 = vld [vmem:[#allocation11 + $0x148] sm:$0xff]  ;;  %v8927_v38 = vpack.c.bf16 %v2690_v37, %v2689_v36 }
 0x54f   : > { %8804 = vmatprep.subr.bf16.mxu0 %v11300_v52  ;;  %8820 = vmatprep.subr.bf16.mxu1 %v11300_v52 }
 0x552   : > { %8806 = vmatpush3.bf16.msra.mxu0 %v11300_v52  ;;  %8822 = vmatpush3.bf16.msra.mxu1 %v11300_v52 }
 0x553   : > { %8808 = vmatprep.subr.bf16.mxu0 %v11302_v55  ;;  %8824 = vmatprep.subr.bf16.mxu1 %v11302_v55 }
 0x556   : > { %8810 = vmatpush3.bf16.msra.mxu0 %v11302_v55  ;;  %8826 = vmatpush3.bf16.msra.mxu1 %v11302_v55 }
 0x557   : > { %8892 = vmatprep.subr.bf16.mxu1 %v11289_v42  ;;  %8828 = vmatprep.subr.bf16.mxu0 %v8827_v58 }
 0x559   : > { %7463 = vmatmul.mubr.msk.f32.vlgmr.msra.gmra.mrb[28].mxu1 %vm2173_vm1, %v2289_v59  ;;  %7441 = vmatmul.mubr.msk.f32.vlgmr.msra.gmra.mrb[16].mxu0 %vm2173_vm1, %v2170_v60  ;;  %v2277_v59 = vld [vmem:[#allocation11 + $0x30] sm:$0xff]  ;;  %v2278_v60 = vld [vmem:[#allocation11 + $0x38] sm:$0xff] }
 0x55a   : > { %8894 = vmatpush3.bf16.msra.mxu1 %v11289_v42  ;;  %7465 = vmatprep.mubr.msk.f32.mxu1 %vm2173_vm1, %v2290_v23  ;;  %v8871_v23 = vpack.c.bf16 %v2278_v60, %v2277_v59  ;;  %v2895_v60 = vld [vmem:[#allocation11 + $0x1c0] sm:$0xff] }
 0x55b   : > { %8896 = vmatprep.subr.bf16.mxu1 %v11291_v46  ;;  %7443 = vmatprep.mubr.msk.f32.mxu0 %vm2173_vm1, %v2171_v61  ;;  %v2279_v61 = vld [vmem:[#allocation11 + $0x40] sm:$0xff] }
 0x55c   : > { %8830 = vmatpush3.bf16.msra.mxu0 %v8827_v58  ;;  %v8875_v63 = vpack.c.bf16 %v2280_v62, %v2279_v61  ;;  %v2897_v62 = vld [vmem:[#allocation11 + $0x1d0] sm:$0xff] }
 0x55d   : > { %7466 = vmatmul.mubr.msk.f32.gmra.mrb[30].mxu1 %vm2173_vm1, %v2291_v0  ;;  %7444 = vmatmul.mubr.msk.f32.gmra.mrb[18].mxu0 %vm2173_vm1, %v2172_v1  ;;  %v2281_v0 = vld [vmem:[#allocation11 + $0x50] sm:$0xff]  ;;  %v2282_v1 = vld [vmem:[#allocation11 + $0x58] sm:$0xff] }
 0x55e   : > { %8898 = vmatpush3.bf16.msra.mxu1 %v11291_v46  ;;  %7560 = vmatprep.mubr.msk.f32.mxu1 %vm2173_vm1, %v2577_v7  ;;  %v8879_v3 = vpack.c.bf16 %v2282_v1, %v2281_v0  ;;  %v2899_v1 = vld [vmem:[#allocation11 + $0x1e0] sm:$0xff] }
 0x55f   : > { %8900 = vmatprep.subr.bf16.mxu1 %v11300_v52  ;;  %8832 = vmatprep.subr.bf16.mxu0 %v8831_v8 }
 0x560   : > { %8834 = vmatpush3.bf16.msra.mxu0 %v8831_v8  ;;  %v2283_v8 = vld [vmem:[#allocation11 + $0x60] sm:$0xff] }
 0x561   : > { %8836 = vmatprep.subr.bf16.mxu0 %v8835_v10 }
 0x562   : > { %8902 = vmatpush3.bf16.msra.mxu1 %v11300_v52 }
 0x563   : > { %8904 = vmatprep.subr.bf16.mxu1 %v11302_v55 }
 0x564   : > { %8838 = vmatpush3.bf16.msra.mxu0 %v8835_v10  ;;  %v2284_v10 = vld [vmem:[#allocation11 + $0x68] sm:$0xff] }
 0x565   : > { %8840 = vmatprep.subr.bf16.mxu0 %v8839_v6  ;;  %v8883_v4 = vpack.c.bf16 %v2284_v10, %v2283_v8  ;;  %v2902_v8 = vld [vmem:[#allocation11 + $0x1f8] sm:$0xff] }
 0x566   : > { %8906 = vmatpush3.bf16.msra.mxu1 %v11302_v55 }
 0x567   : > { %8940 = vmatprep.subr.bf16.mxu1 %v11289_v42 }
 0x568   : > { %8842 = vmatpush3.bf16.msra.mxu0 %v8839_v6 }
 0x569   : > { %7561 = vmatmul.mubr.msk.f32.vlgmr.msra.gmra.mrb[32].mxu1 %vm2173_vm1, %v2578_v14  ;;  %8844 = vmatprep.subr.bf16.mxu0 %v8843_v13  ;;  %v2679_v14 = vld [vmem:[#allocation11 + $0x100] sm:$0xff] }
 0x56a   : > { %8942 = vmatpush3.bf16.msra.mxu1 %v11289_v42  ;;  %7563 = vmatprep.mubr.msk.f32.mxu1 %vm2173_vm1, %v2579_v17  ;;  %v3018_v42 = vld [vmem:[#allocation12 + $0x20] sm:$0xff]  ;;  %v8907_v16 = vpack.c.bf16 %v2680_v15, %v2679_v14  ;;  %v2681_v17 = vld [vmem:[#allocation11 + $0x110] sm:$0xff]  ;;  %v3025_v15 = vld [vmem:[#allocation12 + $0x58] sm:$0xff] }
 0x56b   : > { %8944 = vmatprep.subr.bf16.mxu1 %v11291_v46  ;;  %v11354_v44 = vpack.c.bf16 %v3019_v43, %v3018_v42  ;;  %v2692_v42 = vld [vmem:[#allocation11 + $0x168] sm:$0xff]  ;;  %v3024_v14 = vld [vmem:[#allocation12 + $0x50] sm:$0xff] }
 0x56c   : > { %8846 = vmatpush3.bf16.msra.mxu0 %v8843_v13  ;;  %v8887_v13 = vpack.c.bf16 %v2286_v12, %v2285_v9  ;;  %v8931_v43 = vpack.c.bf16 %v2692_v42, %v2691_v40  ;;  %v3022_v9 = vld [vmem:[#allocation12 + $0x40] sm:$0xff]  ;;  %v3023_v12 = vld [vmem:[#allocation12 + $0x48] sm:$0xff] }
 0x56d   : > { %7564 = vmatmul.mubr.msk.f32.gmra.mrb[34].mxu1 %vm2173_vm1, %v2580_v19  ;;  %8848 = vmatprep.subr.bf16.mxu0 %v8847_v18 }
 0x56e   : > { %8946 = vmatpush3.bf16.msra.mxu1 %v11291_v46  ;;  %7620 = vmatprep.mubr.msk.f32.mxu1 %vm2173_vm1, %v2785_v25  ;;  %v2274_v46 = vld [vmem:[#allocation11 + $0x18] sm:$0xff]  ;;  %v2683_v25 = vld [vmem:[#allocation11 + $0x120] sm:$0xff] }
 0x56f   : > { %8948 = vmatprep.subr.bf16.mxu1 %v11300_v52  ;;  %v8863_v50 = vpack.c.bf16 %v2274_v46, %v2273_v45  ;;  %v2693_v45 = vld [vmem:[#allocation11 + $0x170] sm:$0xff]  ;;  %v2694_v46 = vld [vmem:[#allocation11 + $0x178] sm:$0xff] }
 0x570   : > { %8850 = vmatpush3.bf16.msra.mxu0 %v8847_v18  ;;  %v2682_v18 = vld [vmem:[#allocation11 + $0x118] sm:$0xff] }
 0x571   : > { %8852 = vmatprep.subr.bf16.mxu0 %v8851_v21  ;;  %v8911_v24 = vpack.c.bf16 %v2682_v18, %v2681_v17  ;;  %v3026_v17 = vld [vmem:[#allocation12 + $0x60] sm:$0xff]  ;;  %v3027_v18 = vld [vmem:[#allocation12 + $0x68] sm:$0xff] }
 0x572   : > { %8950 = vmatpush3.bf16.msra.mxu1 %v11300_v52  ;;  %v2275_v52 = vld [vmem:[#allocation11 + $0x20] sm:$0xff] }
 0x573   : > { %8952 = vmatprep.subr.bf16.mxu1 %v11302_v55  ;;  %v8867_v56 = vpack.c.bf16 %v2276_v53, %v2275_v52  ;;  %v2890_v52 = vld [vmem:[#allocation11 + $0x198] sm:$0xff] }
 0x574   : > { %8854 = vmatpush3.bf16.msra.mxu0 %v8851_v21  ;;  %v2684_v21 = vld [vmem:[#allocation11 + $0x128] sm:$0xff] }
 0x575   : > { %8856 = vmatprep.subr.bf16.mxu0 %v8855_v29  ;;  %v8915_v28 = vpack.c.bf16 %v2684_v21, %v2683_v25 }
 0x576   : > { %8954 = vmatpush3.bf16.msra.mxu1 %v11302_v55 }
 0x577   : > { %8987 = vmatprep.subr.bf16.mxu1 %v10407_v22 }
 0x578   : > { %8858 = vmatpush3.bf16.msra.mxu0 %v8855_v29 }
 0x579   : > { %7621 = vmatmul.mubr.msk.f32.vlgmr.msra.gmra.mrb[36].mxu1 %vm2173_vm1, %v2786_v30  ;;  %8860 = vmatprep.subr.bf16.mxu0 %v8859_v35  ;;  %v2685_v30 = vld [vmem:[#allocation11 + $0x130] sm:$0xff] }
 0x57a   : > { %7623 = vmatprep.mubr.msk.f32.mxu1 %vm2173_vm1, %v2787_v31  ;;  %8989 = vmatpush3.bf16.msra.mxu1 %v11347_v39  ;;  %v2686_v31 = vld [vmem:[#allocation11 + $0x138] sm:$0xff] }
 0x57b   : > { %8990 = vmatprep.subr.bf16.mxu1 %v10407_v22 }
 0x57d   : > { %7624 = vmatmul.mubr.msk.f32.gmra.mrb[38].mxu1 %vm2173_vm1, %v2788_v32  ;;  %v8919_v32 = vpack.c.bf16 %v2686_v31, %v2685_v30 }
 0x57e   : > { %7696 = vmatprep.mubr.msk.f32.mxu1 %vm10408_vm0, %v10409_v20  ;;  %8992 = vmatpush3.bf16.msra.mxu1 %v11350_v41 }
 0x57f   : > { %8993 = vmatprep.subr.bf16.mxu1 %v10407_v22 }
 0x582   : > { %8995 = vmatpush3.bf16.msra.mxu1 %v11354_v44 }
 0x583   : > { %8996 = vmatprep.subr.bf16.mxu1 %v10407_v22 }
 0x62c   : > { %v7464_v47 = vpop.f32.mrb[28].mxu1  ;;  %v7442_v48 = vpop.f32.mrb[16].mxu0 }
 0x62d   : > { %v2370_v49 = vpop.f32.mrb[29].mxu1  ;;  %v2252_v51 = vpop.f32.mrb[17].mxu0 }
 0x62e   : > { %7500 = vmatprep.mubr.f32.mxu0 %v2370_v49  ;;  %v2888_v49 = vld [vmem:[#allocation11 + $0x188] sm:$0xff] }
 0x62f   : > { %7501 = vmatmul.mubr.f32.vlgmr.msra.gmra.mrb[20].mxu0 %v7464_v47  ;;  %v8935_v47 = vpack.c.bf16 %v2694_v46, %v2693_v45 }
 0x630   : > { %8862 = vmatpush3.bf16.msra.mxu0 %v8859_v35  ;;  %v7467_v54 = vpop.f32.mrb[30].mxu1  ;;  %v7445_v55 = vpop.f32.mrb[18].mxu0  ;;  %v8923_v35 = vpack.c.bf16 %v2688_v34, %v2687_v33 }
 0x631   : > { %8864 = vmatprep.subr.bf16.mxu0 %v8863_v50  ;;  %v2380_v57 = vpop.f32.mrb[31].mxu1  ;;  %v2262_v58 = vpop.f32.mrb[19].mxu0 }
 0x632   : > { %7503 = vmatprep.mubr.f32.mxu0 %v2380_v57  ;;  %v2893_v57 = vld [vmem:[#allocation11 + $0x1b0] sm:$0xff] }
 0x633   : > { %7504 = vmatmul.mubr.f32.gmra.mrb[22].mxu0 %v7467_v54  ;;  %v2891_v54 = vld [vmem:[#allocation11 + $0x1a0] sm:$0xff] }
 0x634   : > { %8866 = vmatpush3.bf16.msra.mxu0 %v8863_v50  ;;  %7538 = vmatprep.mubr.f32.mxu0 %v2252_v51  ;;  %v2889_v51 = vld [vmem:[#allocation11 + $0x190] sm:$0xff] }
 0x635   : > { %8868 = vmatprep.subr.bf16.mxu0 %v8867_v56  ;;  %v8959_v53 = vpack.c.bf16 %v2890_v52, %v2889_v51  ;;  %v3204_v52 = vld [vmem:[%s11948_s3] sm:$0xff] }
 0x638   : > { %8870 = vmatpush3.bf16.msra.mxu0 %v8867_v56 }
 0x639   : > { %8872 = vmatprep.subr.bf16.mxu0 %v8871_v23 }
 0x63c   : > { %8874 = vmatpush3.bf16.msra.mxu0 %v8871_v23  ;;  %v11359_v2 = vpop.f32.mrb[32].mxu1  ;;  %v2896_v23 = vld [vmem:[#allocation11 + $0x1c8] sm:$0xff] }
 0x63d   : > { %8876 = vmatprep.subr.bf16.mxu0 %v8875_v63  ;;  %v2659_v7 = vpop.f32.mrb[33].mxu1  ;;  %v8971_v61 = vpack.c.bf16 %v2896_v23, %v2895_v60 }
 0x640   : > { %8878 = vmatpush3.bf16.msra.mxu0 %v8875_v63  ;;  %v11361_v11 = vpop.f32.mrb[34].mxu1  ;;  %v2898_v63 = vld [vmem:[#allocation11 + $0x1d8] sm:$0xff] }
 0x641   : > { %8880 = vmatprep.subr.bf16.mxu0 %v8879_v3  ;;  %v11363_v6 = vpop.f32.mrb[35].mxu1  ;;  %v8975_v0 = vpack.c.bf16 %v2898_v63, %v2897_v62 }
 0x644   : > { %8882 = vmatpush3.bf16.msra.mxu0 %v8879_v3 }
 0x645   : > { %8884 = vmatprep.subr.bf16.mxu0 %v8883_v4 }
 0x648   : > { %8886 = vmatpush3.bf16.msra.mxu0 %v8883_v4  ;;  %v3021_v4 = vld [vmem:[#allocation12 + $0x38] sm:$0xff] }
 0x649   : > { %8888 = vmatprep.subr.bf16.mxu0 %v8887_v13 }
 0x64c   : > { %8890 = vmatpush3.bf16.msra.mxu0 %v8887_v13  ;;  %v11365_v19 = vpop.f32.mrb[36].mxu1  ;;  %v9000_v13 = vpack.c.bf16 %v3023_v12, %v3022_v9 }
 0x64d   : > { %8908 = vmatprep.subr.bf16.mxu0 %v8907_v16  ;;  %v2867_v26 = vpop.f32.mrb[37].mxu1 }
 0x64f   : > { %7539 = vmatmul.mubr.f32.vlgmr.msra.gmra.mrb[20].mxu0 %v7442_v48  ;;  %v2887_v48 = vld [vmem:[#allocation11 + $0x180] sm:$0xff] }
 0x650   : > { %8910 = vmatpush3.bf16.msra.mxu0 %v8907_v16  ;;  %7541 = vmatprep.mubr.f32.mxu0 %v2262_v58  ;;  %v11367_v27 = vpop.f32.mrb[38].mxu1  ;;  %v8955_v50 = vpack.c.bf16 %v2888_v49, %v2887_v48  ;;  %v2894_v58 = vld [vmem:[#allocation11 + $0x1b8] sm:$0xff]  ;;  %v9003_v16 = vpack.c.bf16 %v3025_v15, %v3024_v14 }
 0x651   : > { %8912 = vmatprep.subr.bf16.mxu0 %v8911_v24  ;;  %v11369_v29 = vpop.f32.mrb[39].mxu1  ;;  %v8967_v59 = vpack.c.bf16 %v2894_v58, %v2893_v57 }
 0x653   : > { %7542 = vmatmul.mubr.f32.gmra.mrb[22].mxu0 %v7445_v55  ;;  %v2892_v55 = vld [vmem:[#allocation11 + $0x1a8] sm:$0xff] }
 0x654   : > { %8914 = vmatpush3.bf16.msra.mxu0 %v8911_v24  ;;  %7598 = vmatprep.mubr.f32.mxu0 %v2659_v7  ;;  %v8963_v56 = vpack.c.bf16 %v2892_v55, %v2891_v54  ;;  %v2901_v7 = vld [vmem:[#allocation11 + $0x1f0] sm:$0xff] }
 0x655   : > { %8916 = vmatprep.subr.bf16.mxu0 %v8915_v28  ;;  %v8983_v10 = vpack.c.bf16 %v2902_v8, %v2901_v7  ;;  %v3028_v24 = vld [vmem:[#allocation12 + $0x70] sm:$0xff] }
 0x658   : > { %8918 = vmatpush3.bf16.msra.mxu0 %v8915_v28 }
 0x659   : > { %8920 = vmatprep.subr.bf16.mxu0 %v8919_v32 }
 0x65c   : > { %8922 = vmatpush3.bf16.msra.mxu0 %v8919_v32 }
 0x65d   : > { %8924 = vmatprep.subr.bf16.mxu0 %v8923_v35 }
 0x660   : > { %8926 = vmatpush3.bf16.msra.mxu0 %v8923_v35 }
 0x661   : > { %8928 = vmatprep.subr.bf16.mxu0 %v8927_v38 }
 0x664   : > { %8930 = vmatpush3.bf16.msra.mxu0 %v8927_v38 }
 0x665   : > { %8932 = vmatprep.subr.bf16.mxu0 %v8931_v43 }
 0x668   : > { %8934 = vmatpush3.bf16.msra.mxu0 %v8931_v43 }
 0x669   : > { %8936 = vmatprep.subr.bf16.mxu0 %v8935_v47 }
 0x66c   : > { %8938 = vmatpush3.bf16.msra.mxu0 %v8935_v47 }
 0x66d   : > { %8956 = vmatprep.subr.bf16.mxu0 %v8955_v50 }
 0x66f   : > { %7599 = vmatmul.mubr.f32.vlgmr.msra.gmra.mrb[20].mxu0 %v11359_v2  ;;  %v2900_v2 = vld [vmem:[#allocation11 + $0x1e8] sm:$0xff] }
 0x670   : > { %8958 = vmatpush3.bf16.msra.mxu0 %v8955_v50  ;;  %7601 = vmatprep.mubr.f32.mxu0 %v11363_v6  ;;  %v8979_v3 = vpack.c.bf16 %v2900_v2, %v2899_v1 }
 0x671   : > { %8960 = vmatprep.subr.bf16.mxu0 %v8959_v53 }
 0x673   : > { %7602 = vmatmul.mubr.f32.gmra.mrb[22].mxu0 %v11361_v11  ;;  %v3020_v11 = vld [vmem:[#allocation12 + $0x30] sm:$0xff] }
 0x674   : > { %8962 = vmatpush3.bf16.msra.mxu0 %v8959_v53  ;;  %7658 = vmatprep.mubr.f32.mxu0 %v2867_v26  ;;  %v8997_v6 = vpack.c.bf16 %v3021_v4, %v3020_v11  ;;  %v3029_v26 = vld [vmem:[#allocation12 + $0x78] sm:$0xff] }
 0x675   : > { %8964 = vmatprep.subr.bf16.mxu0 %v8963_v56  ;;  %v9009_v25 = vpack.c.bf16 %v3029_v26, %v3028_v24  ;;  %v6220_v53 = vld [vmem:[%s11948_s3 + $0x20] sm:$0xff]  ;;  %v3205_v24 = vld [vmem:[%s11948_s3 + $0x8] sm:$0xff] }
 0x676   : > { %8998 = vmatpush3.bf16.msra.mxu1 %v8997_v6  ;;  %v6221_v26 = vld [vmem:[%s11948_s3 + $0x28] sm:$0xff] }
 0x677   : > { %8999 = vmatprep.subr.bf16.mxu1 %v10407_v22 }
 0x678   : > { %8966 = vmatpush3.bf16.msra.mxu0 %v8963_v56 }
 0x679   : > { %8968 = vmatprep.subr.bf16.mxu0 %v8967_v59 }
 0x67a   : > { %9001 = vmatpush3.bf16.msra.mxu1 %v9000_v13 }
 0x67b   : > { %9002 = vmatprep.subr.bf16.mxu1 %v10407_v22 }
 0x67c   : > { %8970 = vmatpush3.bf16.msra.mxu0 %v8967_v59 }
 0x67d   : > { %8972 = vmatprep.subr.bf16.mxu0 %v8971_v61 }
 0x67e   : > { %9004 = vmatpush3.bf16.msra.mxu1 %v9003_v16 }
 0x67f   : > { %9005 = vmatprep.subr.bf16.mxu1 %v10407_v22 }
 0x680   : > { %8974 = vmatpush3.bf16.msra.mxu0 %v8971_v61 }
 0x681   : > { %8976 = vmatprep.subr.bf16.mxu0 %v8975_v0 }
 0x684   : > { %8978 = vmatpush3.bf16.msra.mxu0 %v8975_v0 }
 0x685   : > { %8980 = vmatprep.subr.bf16.mxu0 %v8979_v3 }
 0x688   : > { %8982 = vmatpush3.bf16.msra.mxu0 %v8979_v3 }
 0x689   : > { %8984 = vmatprep.subr.bf16.mxu0 %v8983_v10 }
 0x68c   : > { %8986 = vmatpush3.bf16.msra.mxu0 %v8983_v10 }
 0x68f   : > { %7659 = vmatmul.mubr.f32.vlgmr.msra.gmra.mrb[20].mxu0 %v11365_v19  ;;  %v9006_v19 = vpack.c.bf16 %v3027_v18, %v3026_v17 }
 0x690   : > { %7661 = vmatprep.mubr.f32.mxu0 %v11369_v29 }
 0x691   : > { %9007 = vmatpush3.bf16.msra.mxu1 %v9006_v19 }
 0x692   : > { %9008 = vmatprep.subr.bf16.mxu1 %v10407_v22 }
 0x693   : > { %7662 = vmatmul.mubr.f32.gmra.mrb[22].mxu0 %v11367_v27 }
 0x694   : > { %7834 = vmatprep.mubr.msk.f32.mxu0 %vm3206_vm10, %v6220_v53  ;;  %v3288_v53 = vld [vmem:[#allocation14] sm:$0xff] }
 0x695   : > { %9010 = vmatpush3.bf16.msra.mxu1 %v9009_v25 }
 0x696   : > { %9011 = vmatprep.subr.bf16.mxu1 %v10407_v22 }
 0x762   : > { %v11382_v21 = vpop.f32.mrb[20].mxu0 }
 0x763   : > { %v3002_v27 = vmul.f32 %v11382_v21, %v11382_v21  ;;  %v11386_v28 = vpop.f32.mrb[21].mxu0 }
 0x764   : > { %v2992_v29 = vadd.f32 %v11382_v21, %v11386_v28  ;;  %v3001_v30 = vmul.f32 %v11386_v28, %v11386_v28 }
 0x766   : > { %v3005_v31 = vadd.f32 %v3002_v27, %v3001_v30  ;;  %v11392_v32 = vpop.f32.mrb[22].mxu0  ;;  %v6216_v27 = vld [vmem:[%s11948_s3 + $0x10] sm:$0xff] }
 0x767   : > { %v2979_v33 = vpop.f32.mrb[23].mxu0  ;;  %v3004_v36 = vmul.f32 %v11392_v32, %v11392_v32  ;;  %v3391_v30 = vld [vmem:[#allocation14 + $0x90] sm:$0xff] }
 0x768   : > { %v2993_v34 = vadd.f32 %v2992_v29, %v2979_v33  ;;  %v3003_v35 = vmul.f32 %v2979_v33, %v2979_v33 }
 0x76a   : > { %v2994_v37 = vadd.f32 %v11392_v32, %v2993_v34  ;;  %v3006_v38 = vadd.f32 %v3005_v31, %v3003_v35  ;;  %v3392_v31 = vld [vmem:[#allocation14 + $0x98] sm:$0xff]  ;;  %v3393_v35 = vld [vmem:[#allocation14 + $0xa0] sm:$0xff] }
 0x76b   : > { %v9055_v34 = vpack.c.bf16 %v3392_v31, %v3391_v30  ;;  %v3300_v30 = vld [vmem:[#allocation14 + $0x60] sm:$0xff]  ;;  %v3301_v31 = vld [vmem:[#allocation14 + $0x68] sm:$0xff] }
 0x76c   : > { %v2995_v40 = vrot.slane %v2994_v37, 4  ;;  %v3007_v42 = vadd.f32 %v3006_v38, %v3004_v36  ;;  %v3394_v36 = vld [vmem:[#allocation14 + $0xa8] sm:$0xff]  ;;  %v3395_v38 = vld [vmem:[#allocation14 + $0xb0] sm:$0xff] }
 0x76e   : > { %v2996_v43 = vadd.f32 %v2995_v40, %v2994_v37  ;;  %v3008_v49 = vrot.slane %v3007_v42, 4  ;;  %v9059_v37 = vpack.c.bf16 %v3394_v36, %v3393_v35  ;;  %v3396_v40 = vld [vmem:[#allocation14 + $0xb8] sm:$0xff]  ;;  %v3640_v36 = vld [vmem:[#allocation14 + $0x100] sm:$0xff] }
 0x770   : > { %v2997_v45 = vrot.slane %v2996_v43, 2  ;;  %v3009_v50 = vadd.f32 %v3008_v49, %v3007_v42  ;;  %v9063_v42 = vpack.c.bf16 %v3396_v40, %v3395_v38  ;;  %v3642_v40 = vld [vmem:[#allocation14 + $0x110] sm:$0xff] }
 0x772   : > { %v2998_v46 = vadd.f32 %v2997_v45, %v2996_v43  ;;  %v3397_v43 = vld [vmem:[#allocation14 + $0xc0] sm:$0xff]  ;;  %v3398_v45 = vld [vmem:[#allocation14 + $0xc8] sm:$0xff] }
 0x774   : > { %v2999_v47 = vrot.slane %v2998_v46, 1 }
 0x776   : > { %v3000_v48 = vadd.f32 %v2999_v47, %v2998_v46  ;;  %v9067_v46 = vpack.c.bf16 %v3398_v45, %v3397_v43  ;;  %v3399_v47 = vld [vmem:[#allocation14 + $0xd0] sm:$0xff]  ;;  %v3644_v45 = vld [vmem:[#allocation14 + $0x120] sm:$0xff] }
 0x778   : > { %7697 = vmatmul.mubr.f32.vlgmr.msra.gmra.mrb[40].mxu1 %v3000_v48  ;;  %v3400_v48 = vld [vmem:[#allocation14 + $0xd8] sm:$0xff] }
 0x779   : > { %9013 = vmatpush3.bf16.msra.mxu1 %v11347_v39  ;;  %7731 = vmatprep.mubr.msk.f32.mxu1 %vm10408_vm0, %v10409_v20  ;;  %v3010_v39 = vrot.slane %v3009_v50, 2  ;;  %v9071_v49 = vpack.c.bf16 %v3400_v48, %v3399_v47  ;;  %v3646_v48 = vld [vmem:[#allocation14 + $0x130] sm:$0xff] }
 0x77a   : > { %9014 = vmatprep.subr.bf16.mxu1 %v10407_v22 }
 0x77b   : > { %v3011_v51 = vadd.f32 %v3010_v39, %v3009_v50  ;;  %v3401_v50 = vld [vmem:[#allocation14 + $0xe0] sm:$0xff]  ;;  %v3402_v39 = vld [vmem:[#allocation14 + $0xe8] sm:$0xff] }
 0x77d   : > { %9016 = vmatpush3.bf16.msra.mxu1 %v11350_v41  ;;  %v3012_v41 = vrot.slane %v3011_v51, 1 }
 0x77e   : > { %9017 = vmatprep.subr.bf16.mxu1 %v10407_v22 }
 0x781   : > { %9019 = vmatpush3.bf16.msra.mxu1 %v11354_v44  ;;  %v3013_v44 = vadd.f32 %v3012_v41, %v3011_v51  ;;  %v3403_v51 = vld [vmem:[#allocation14 + $0xf0] sm:$0xff]  ;;  %v9075_v41 = vpack.c.bf16 %v3402_v39, %v3401_v50  ;;  %v3648_v39 = vld [vmem:[#allocation14 + $0x140] sm:$0xff] }
 0x782   : > { %9020 = vmatprep.subr.bf16.mxu1 %v10407_v22 }
 0x785   : > { %9022 = vmatpush3.bf16.msra.mxu1 %v8997_v6 }
 0x786   : > { %9023 = vmatprep.subr.bf16.mxu1 %v10407_v22 }
 0x789   : > { %9025 = vmatpush3.bf16.msra.mxu1 %v9000_v13 }
 0x78a   : > { %9026 = vmatprep.subr.bf16.mxu1 %v10407_v22 }
 0x78d   : > { %9028 = vmatpush3.bf16.msra.mxu1 %v9003_v16 }
 0x78e   : > { %9029 = vmatprep.subr.bf16.mxu1 %v10407_v22 }
 0x791   : > { %9031 = vmatpush3.bf16.msra.mxu1 %v9006_v19 }
 0x792   : > { %9032 = vmatprep.subr.bf16.mxu1 %v10407_v22 }
 0x795   : > { %9034 = vmatpush3.bf16.msra.mxu1 %v9009_v25  ;;  %v3389_v25 = vld [vmem:[#allocation14 + $0x80] sm:$0xff] }
 0x798   : > { %7732 = vmatmul.mubr.f32.vlgmr.msra.gmra.mrb[42].mxu1 %v3013_v44  ;;  %v3404_v44 = vld [vmem:[#allocation14 + $0xf8] sm:$0xff] }
 0x799   : > { %7742 = vmatprep.mubr.msk.f32.mxu1 %vm3206_vm10, %v3204_v52  ;;  %v9079_v52 = vpack.c.bf16 %v3404_v44, %v3403_v51  ;;  %v3649_v51 = vld [vmem:[#allocation14 + $0x148] sm:$0xff]  ;;  %v3650_v44 = vld [vmem:[#allocation14 + $0x150] sm:$0xff] }
 0x84b   : > { %v3096_v54 = vpop.f32.mrb[40].mxu1 }
 0x84c   : > { %v3100_v55 = vmul.f32 0.0009765625, %v3096_v54  ;;  %v7698_v56 = vpop.f32.mrb[41].mxu1  ;;  %v3289_v54 = vld [vmem:[#allocation14 + $0x8] sm:$0xff] }
 0x84d   : > { %v3927_v56 = vld [vmem:[#allocation15] sm:$0xff] }
 0x84e   : > { %v3177_v57 = vrot.slane %v3100_v55, %v11277_v5  ;;  %v3172_v62 = vmul.f32 %v3100_v55, %v3100_v55  ;;  %v9083_v55 = vpack.c.bf16 %v3289_v54, %v3288_v53  ;;  %v3652_v54 = vld [vmem:[#allocation14 + $0x160] sm:$0xff] }
 0x850   : > { %v3178_v58 = vsub.f32 %v11386_v28, %v3177_v57  ;;  %v3179_v59 = vsub.f32 %v11382_v21, %v3177_v57  ;;  %v3180_v60 = vsub.f32 %v2979_v33, %v3177_v57  ;;  %v3181_v23 = vsub.f32 %v11392_v32, %v3177_v57  ;;  %v3390_v21 = vld [vmem:[#allocation14 + $0x88] sm:$0xff]  ;;  %v6217_v32 = vld [vmem:[%s11948_s3 + $0x18] sm:$0xff] }
 0x851   : > { %v6224_v28 = vld [vmem:[%s11948_s3 + $0x30] sm:$0xff]  ;;  %v9051_v29 = vpack.c.bf16 %v3390_v21, %v3389_v25  ;;  %v6225_v33 = vld [vmem:[%s11948_s3 + $0x38] sm:$0xff]  ;;  %s10410_s3 = smov [#allocation29]  }
 0x852   : > { %v3928_v57 = vld [vmem:[#allocation15 + $0x8] sm:$0xff] }
 0x853   : > { %v3297_v25 = vld [vmem:[#allocation14 + $0x48] sm:$0xff] }
 0x86b   : > { %v3167_v61 = vpop.f32.mrb[42].mxu1 }
 0x86c   : > { %v3171_v63 = vmul.f32 0.0009765625, %v3167_v61  ;;  %v7733_v0 = vpop.f32.mrb[43].mxu1  ;;  %v3931_v61 = vld [vmem:[#allocation15 + $0x20] sm:$0xff] }
 0x86d   : > { %v3933_v0 = vld [vmem:[#allocation15 + $0x30] sm:$0xff] }
 0x86e   : > { %v3173_v1 = vsub.f32 %v3171_v63, %v3172_v62  ;;  %v3932_v62 = vld [vmem:[#allocation15 + $0x28] sm:$0xff] }
 0x86f   : > { %v11456_v63 = vpack.c.bf16 %v3932_v62, %v3931_v61  ;;  %v3818_v61 = vld [vmem:[#allocation14 + $0x180] sm:$0xff]  ;;  %v3819_v62 = vld [vmem:[#allocation14 + $0x188] sm:$0xff] }
 0x870   : > { %v3182_v2 = vadd.f32 1e-05, %v3173_v1  ;;  %v3934_v1 = vld [vmem:[#allocation15 + $0x38] sm:$0xff] }
 0x872   : > { %9827 = vrsqrt.f32 %v3182_v2  ;;  %v11460_v2 = vpack.c.bf16 %v3934_v1, %v3933_v0  ;;  %v9163_v0 = vpack.c.bf16 %v3819_v62, %v3818_v61  ;;  %v3820_v1 = vld [vmem:[#allocation14 + $0x190] sm:$0xff] }
 0x87c   : > { %v9828_v3 = vpop.eup %9827 }
 0x87d   : > { %v3187_v7 = vrot.slane %v9828_v3, %v11277_v5 }
 0x87f   : > { %v3188_v8 = vmul.f32 %v3187_v7, %v3178_v58  ;;  %v3189_v10 = vmul.f32 %v3187_v7, %v3179_v59  ;;  %v3190_v11 = vmul.f32 %v3187_v7, %v3180_v60  ;;  %v3191_v4 = vmul.f32 %v3187_v7, %v3181_v23  ;;  %v3929_v58 = vld [vmem:[#allocation15 + $0x10] sm:$0xff]  ;;  %v3930_v60 = vld [vmem:[#allocation15 + $0x18] sm:$0xff] }
 0x880   : > { %v11449_v59 = vpack.c.bf16 %v3928_v57, %v3927_v56  ;;  %v11452_v23 = vpack.c.bf16 %v3930_v60, %v3929_v58  ;;  %v3654_v57 = vld [vmem:[#allocation14 + $0x170] sm:$0xff]  ;;  %v3655_v58 = vld [vmem:[#allocation14 + $0x178] sm:$0xff] }
 0x881   : > { %vm3192_vm11 = vcmp.gt.f32.partialorder %v3188_v8, 0.0  ;;  %vm3193_vm12 = vcmp.gt.f32.partialorder %v3189_v10, 0.0  ;;  %vm3194_vm13 = vcmp.gt.f32.partialorder %v3190_v11, 0.0  ;;  %vm3195_vm14 = vcmp.gt.f32.partialorder %v3191_v4, 0.0 }
 0x882   : > { %v3196_v6 = vmul.f32 0.2, %v3188_v8  ;;  %v3197_v9 = vmul.f32 0.2, %v3189_v10  ;;  %v3198_v12 = vmul.f32 0.2, %v3190_v11  ;;  %v9151_v60 = vpack.c.bf16 %v3655_v58, %v3654_v57 }
 0x883   : > { %v3199_v13 = vmul.f32 0.2, %v3191_v4 }
 0x884   : > { %v3200_v14 = vsel %vm3192_vm11, %v3188_v8, %v3196_v6  ;;  %v3201_v15 = vsel %vm3193_vm12, %v3189_v10, %v3197_v9  ;;  %v3202_v16 = vsel %vm3194_vm13, %v3190_v11, %v3198_v12  ;;  %v3290_v11 = vld [vmem:[#allocation14 + $0x10] sm:$0xff] }
 0x885   : > { %v3203_v17 = vsel %vm3195_vm14, %v3191_v4, %v3199_v13  ;;  %v9035_v18 = vpack.c.bf16 %v3201_v15, %v3200_v14  ;;  %v3291_v4 = vld [vmem:[#allocation14 + $0x18] sm:$0xff]  ;;  %v3292_v15 = vld [vmem:[#allocation14 + $0x20] sm:$0xff] }
 0x886   : > { %v9039_v19 = vpack.c.bf16 %v3203_v17, %v3202_v16  ;;  %v9087_v13 = vpack.c.bf16 %v3291_v4, %v3290_v11  ;;  %v3293_v16 = vld [vmem:[#allocation14 + $0x28] sm:$0xff] }
 0x887   : > { %9036 = vmatprep.subr.bf16.mxu1 %v9035_v18  ;;  %9116 = vmatprep.subr.bf16.mxu0 %v9035_v18  ;;  %v9091_v17 = vpack.c.bf16 %v3293_v16, %v3292_v15  ;;  %v3823_v11 = vld [vmem:[#allocation14 + $0x1a8] sm:$0xff]  ;;  %v3826_v15 = vld [vmem:[#allocation14 + $0x1c0] sm:$0xff] }
 0x888   : > { %9038 = vmatpush3.bf16.msra.mxu1 %v9035_v18  ;;  %9118 = vmatpush3.bf16.msra.mxu0 %v9035_v18  ;;  %v3827_v16 = vld [vmem:[#allocation14 + $0x1c8] sm:$0xff] }
 0x889   : > { %9040 = vmatprep.subr.bf16.mxu1 %v9039_v19  ;;  %9120 = vmatprep.subr.bf16.mxu0 %v9039_v19 }
 0x88c   : > { %9042 = vmatpush3.bf16.msra.mxu1 %v9039_v19  ;;  %9122 = vmatpush3.bf16.msra.mxu0 %v9039_v19 }
 0x88d   : > { %9044 = vmatprep.subr.bf16.mxu1 %v9035_v18  ;;  %9156 = vmatprep.subr.bf16.mxu0 %v9035_v18 }
 0x88f   : > { %7743 = vmatmul.mubr.msk.f32.vlgmr.msra.gmra.mrb[44].mxu1 %vm3206_vm10, %v3205_v24  ;;  %7835 = vmatmul.mubr.msk.f32.vlgmr.msra.gmra.mrb[24].mxu0 %vm3206_vm10, %v6221_v26  ;;  %v3296_v26 = vld [vmem:[#allocation14 + $0x40] sm:$0xff] }
 0x890   : > { %9046 = vmatpush3.bf16.msra.mxu1 %v9035_v18  ;;  %9158 = vmatpush3.bf16.msra.mxu0 %v9035_v18  ;;  %v3294_v18 = vld [vmem:[#allocation14 + $0x30] sm:$0xff]  ;;  %v9099_v21 = vpack.c.bf16 %v3297_v25, %v3296_v26  ;;  %v3831_v26 = vld [vmem:[#allocation14 + $0x1e8] sm:$0xff] }
 0x891   : > { %9048 = vmatprep.subr.bf16.mxu1 %v9039_v19  ;;  %9160 = vmatprep.subr.bf16.mxu0 %v9039_v19  ;;  %v3832_v25 = vld [vmem:[#allocation14 + $0x1f0] sm:$0xff] }
 0x892   : > { %7753 = vmatprep.mubr.msk.f32.mxu1 %vm3206_vm10, %v6216_v27  ;;  %7880 = vmatprep.mubr.msk.f32.mxu0 %vm3206_vm10, %v6224_v28  ;;  %v3298_v27 = vld [vmem:[#allocation14 + $0x50] sm:$0xff]  ;;  %v3299_v28 = vld [vmem:[#allocation14 + $0x58] sm:$0xff] }
 0x894   : > { %9050 = vmatpush3.bf16.msra.mxu1 %v9039_v19  ;;  %9162 = vmatpush3.bf16.msra.mxu0 %v9039_v19  ;;  %v3295_v19 = vld [vmem:[#allocation14 + $0x38] sm:$0xff] }
 0x895   : > { %9052 = vmatprep.subr.bf16.mxu1 %v9051_v29  ;;  %9195 = vmatprep.subr.bf16.mxu0 %v10407_v22  ;;  %v9095_v24 = vpack.c.bf16 %v3295_v19, %v3294_v18  ;;  %v3828_v18 = vld [vmem:[#allocation14 + $0x1d0] sm:$0xff]  ;;  %v3829_v19 = vld [vmem:[#allocation14 + $0x1d8] sm:$0xff] }
 0x897   : > { %7754 = vmatmul.mubr.msk.f32.vlgmr.msra.gmra.mrb[46].mxu1 %vm3206_vm10, %v6217_v32  ;;  %7881 = vmatmul.mubr.msk.f32.vlgmr.msra.gmra.mrb[26].mxu0 %vm3206_vm10, %v6225_v33  ;;  %v9107_v32 = vpack.c.bf16 %v3301_v31, %v3300_v30  ;;  %v3302_v33 = vld [vmem:[#allocation14 + $0x70] sm:$0xff] }
 0x898   : > { %9054 = vmatpush3.bf16.msra.mxu1 %v9051_v29  ;;  %7950 = vmatprep.mubr.msk.f32.mxu0 %vm10408_vm0, %v10409_v20  ;;  %v9103_v29 = vpack.c.bf16 %v3299_v28, %v3298_v27  ;;  %v3935_v28 = vld [vmem:[#allocation15 + $0x40] sm:$0xff]  ;;  %v3937_v31 = vld [vmem:[#allocation15 + $0x50] sm:$0xff] }
 0x899   : > { %9056 = vmatprep.subr.bf16.mxu1 %v9055_v34  ;;  %9197 = vmatpush3.bf16.msra.mxu0 %v11449_v59 }
 0x89a   : > { %9198 = vmatprep.subr.bf16.mxu0 %v10407_v22 }
 0x89c   : > { %9058 = vmatpush3.bf16.msra.mxu1 %v9055_v34  ;;  %v3303_v34 = vld [vmem:[#allocation14 + $0x78] sm:$0xff] }
 0x89d   : > { %9060 = vmatprep.subr.bf16.mxu1 %v9059_v37  ;;  %9200 = vmatpush3.bf16.msra.mxu0 %v11452_v23  ;;  %v9111_v35 = vpack.c.bf16 %v3303_v34, %v3302_v33  ;;  %v3939_v34 = vld [vmem:[#allocation15 + $0x60] sm:$0xff] }
 0x89e   : > { %9201 = vmatprep.subr.bf16.mxu0 %v10407_v22 }
 0x8a0   : > { %9062 = vmatpush3.bf16.msra.mxu1 %v9059_v37  ;;  %v3641_v37 = vld [vmem:[#allocation14 + $0x108] sm:$0xff] }
 0x8a1   : > { %9064 = vmatprep.subr.bf16.mxu1 %v9063_v42  ;;  %9203 = vmatpush3.bf16.msra.mxu0 %v11456_v63  ;;  %v9123_v38 = vpack.c.bf16 %v3641_v37, %v3640_v36  ;;  %v3942_v37 = vld [vmem:[#allocation15 + $0x78] sm:$0xff] }
 0x8a2   : > { %9204 = vmatprep.subr.bf16.mxu0 %v10407_v22 }
 0x8a4   : > { %9066 = vmatpush3.bf16.msra.mxu1 %v9063_v42  ;;  %v3643_v42 = vld [vmem:[#allocation14 + $0x118] sm:$0xff] }
 0x8a5   : > { %9068 = vmatprep.subr.bf16.mxu1 %v9067_v46  ;;  %9206 = vmatpush3.bf16.msra.mxu0 %v11460_v2  ;;  %v9127_v43 = vpack.c.bf16 %v3643_v42, %v3642_v40 }
 0x8a6   : > { %9207 = vmatprep.subr.bf16.mxu0 %v10407_v22 }
 0x8a8   : > { %9070 = vmatpush3.bf16.msra.mxu1 %v9067_v46  ;;  %v3645_v46 = vld [vmem:[#allocation14 + $0x128] sm:$0xff] }
 0x8a9   : > { %9072 = vmatprep.subr.bf16.mxu1 %v9071_v49  ;;  %v9131_v47 = vpack.c.bf16 %v3645_v46, %v3644_v45 }
 0x8ac   : > { %9074 = vmatpush3.bf16.msra.mxu1 %v9071_v49  ;;  %v3647_v49 = vld [vmem:[#allocation14 + $0x138] sm:$0xff] }
 0x8ad   : > { %9076 = vmatprep.subr.bf16.mxu1 %v9075_v41  ;;  %v9135_v50 = vpack.c.bf16 %v3647_v49, %v3646_v48 }
 0x8b0   : > { %9078 = vmatpush3.bf16.msra.mxu1 %v9075_v41  ;;  %v9139_v41 = vpack.c.bf16 %v3649_v51, %v3648_v39 }
 0x8b1   : > { %9080 = vmatprep.subr.bf16.mxu1 %v9079_v52 }
 0x8b4   : > { %9082 = vmatpush3.bf16.msra.mxu1 %v9079_v52  ;;  %v3651_v52 = vld [vmem:[#allocation14 + $0x158] sm:$0xff] }
 0x8b5   : > { %9084 = vmatprep.subr.bf16.mxu1 %v9083_v55  ;;  %v9143_v53 = vpack.c.bf16 %v3651_v52, %v3650_v44 }
 0x962   : > { %v7744_v3 = vpop.f32.mrb[44].mxu1  ;;  %v11465_v7 = vpop.f32.mrb[24].mxu0 }
 0x963   : > { %v3279_v8 = vpop.f32.mrb[45].mxu1  ;;  %v3630_v10 = vpop.f32.mrb[25].mxu0 }
 0x96a   : > { %v7755_v6 = vpop.f32.mrb[46].mxu1  ;;  %v11467_v9 = vpop.f32.mrb[26].mxu0 }
 0x96b   : > { %v3379_v12 = vpop.f32.mrb[47].mxu1  ;;  %v11469_v14 = vpop.f32.mrb[27].mxu0 }
 0x96c   : > { %7788 = vmatprep.mubr.f32.mxu1 %v3379_v12  ;;  %v3825_v12 = vld [vmem:[#allocation14 + $0x1b8] sm:$0xff] }
 0x96d   : > { %7789 = vmatmul.mubr.f32.vlgmr.msra.gmra.mrb[48].mxu1 %v7755_v6  ;;  %v3824_v6 = vld [vmem:[#allocation14 + $0x1b0] sm:$0xff] }
 0x96e   : > { %9086 = vmatpush3.bf16.msra.mxu1 %v9083_v55  ;;  %7823 = vmatprep.mubr.f32.mxu1 %v3279_v8  ;;  %v3653_v55 = vld [vmem:[#allocation14 + $0x168] sm:$0xff] }
 0x96f   : > { %9088 = vmatprep.subr.bf16.mxu1 %v9087_v13  ;;  %v9147_v56 = vpack.c.bf16 %v3653_v55, %v3652_v54 }
 0x972   : > { %9090 = vmatpush3.bf16.msra.mxu1 %v9087_v13  ;;  %v9175_v13 = vpack.c.bf16 %v3825_v12, %v3824_v6 }
 0x973   : > { %9092 = vmatprep.subr.bf16.mxu1 %v9091_v17 }
 0x976   : > { %9094 = vmatpush3.bf16.msra.mxu1 %v9091_v17  ;;  %v9179_v17 = vpack.c.bf16 %v3827_v16, %v3826_v15 }
 0x977   : > { %9096 = vmatprep.subr.bf16.mxu1 %v9095_v24 }
 0x97a   : > { %9098 = vmatpush3.bf16.msra.mxu1 %v9095_v24  ;;  %v3830_v24 = vld [vmem:[#allocation14 + $0x1e0] sm:$0xff] }
 0x97b   : > { %9100 = vmatprep.subr.bf16.mxu1 %v9099_v21 }
 0x97e   : > { %9102 = vmatpush3.bf16.msra.mxu1 %v9099_v21  ;;  %v3833_v21 = vld [vmem:[#allocation14 + $0x1f8] sm:$0xff] }
 0x97f   : > { %9104 = vmatprep.subr.bf16.mxu1 %v9103_v29  ;;  %v9191_v27 = vpack.c.bf16 %v3833_v21, %v3832_v25  ;;  %v4276_v25 = vld [vmem:[#allocation17 + $0x90] sm:$0xff]  ;;  %v4277_v21 = vld [vmem:[#allocation17 + $0x98] sm:$0xff] }
 0x982   : > { %9106 = vmatpush3.bf16.msra.mxu1 %v9103_v29  ;;  %v3936_v29 = vld [vmem:[#allocation15 + $0x48] sm:$0xff] }
 0x983   : > { %9108 = vmatprep.subr.bf16.mxu1 %v9107_v32  ;;  %v9208_v30 = vpack.c.bf16 %v3936_v29, %v3935_v28  ;;  %v4278_v28 = vld [vmem:[#allocation17 + $0xa0] sm:$0xff]  ;;  %v4279_v29 = vld [vmem:[#allocation17 + $0xa8] sm:$0xff] }
 0x985   : > { %9209 = vmatpush3.bf16.msra.mxu0 %v9208_v30 }
 0x986   : > { %9110 = vmatpush3.bf16.msra.mxu1 %v9107_v32  ;;  %9210 = vmatprep.subr.bf16.mxu0 %v10407_v22  ;;  %v3938_v32 = vld [vmem:[#allocation15 + $0x58] sm:$0xff] }
 0x987   : > { %9112 = vmatprep.subr.bf16.mxu1 %v9111_v35  ;;  %v9211_v33 = vpack.c.bf16 %v3938_v32, %v3937_v31  ;;  %v4280_v31 = vld [vmem:[#allocation17 + $0xb0] sm:$0xff]  ;;  %v4281_v32 = vld [vmem:[#allocation17 + $0xb8] sm:$0xff] }
 0x989   : > { %9212 = vmatpush3.bf16.msra.mxu0 %v9211_v33 }
 0x98a   : > { %9114 = vmatpush3.bf16.msra.mxu1 %v9111_v35  ;;  %9213 = vmatprep.subr.bf16.mxu0 %v10407_v22  ;;  %v3940_v35 = vld [vmem:[#allocation15 + $0x68] sm:$0xff] }
 0x98b   : > { %9124 = vmatprep.subr.bf16.mxu1 %v9123_v38  ;;  %v9214_v36 = vpack.c.bf16 %v3940_v35, %v3939_v34  ;;  %v4282_v34 = vld [vmem:[#allocation17 + $0xc0] sm:$0xff]  ;;  %v4283_v35 = vld [vmem:[#allocation17 + $0xc8] sm:$0xff] }
 0x98d   : > { %7824 = vmatmul.mubr.f32.vlgmr.msra.gmra.mrb[48].mxu1 %v7744_v3  ;;  %v3821_v3 = vld [vmem:[#allocation14 + $0x198] sm:$0xff]  ;;  %9215 = vmatpush3.bf16.msra.mxu0 %v9214_v36 }
 0x98e   : > { %9126 = vmatpush3.bf16.msra.mxu1 %v9123_v38  ;;  %7869 = vmatprep.mubr.f32.mxu1 %v3630_v10  ;;  %v9167_v8 = vpack.c.bf16 %v3821_v3, %v3820_v1  ;;  %v3822_v10 = vld [vmem:[#allocation14 + $0x1a0] sm:$0xff] }
 0x98f   : > { %9128 = vmatprep.subr.bf16.mxu1 %v9127_v43  ;;  %v9171_v4 = vpack.c.bf16 %v3823_v11, %v3822_v10  ;;  %9216 = vmatprep.subr.bf16.mxu0 %v10407_v22 }
 0x992   : > { %9130 = vmatpush3.bf16.msra.mxu1 %v9127_v43 }
 0x993   : > { %9132 = vmatprep.subr.bf16.mxu1 %v9131_v47 }
 0x996   : > { %9134 = vmatpush3.bf16.msra.mxu1 %v9131_v47 }
 0x997   : > { %9136 = vmatprep.subr.bf16.mxu1 %v9135_v50 }
 0x99a   : > { %9138 = vmatpush3.bf16.msra.mxu1 %v9135_v50 }
 0x99b   : > { %9140 = vmatprep.subr.bf16.mxu1 %v9139_v41 }
 0x99e   : > { %9142 = vmatpush3.bf16.msra.mxu1 %v9139_v41 }
 0x99f   : > { %9144 = vmatprep.subr.bf16.mxu1 %v9143_v53 }
 0x9a2   : > { %9146 = vmatpush3.bf16.msra.mxu1 %v9143_v53 }
 0x9a3   : > { %9148 = vmatprep.subr.bf16.mxu1 %v9147_v56 }
 0x9a6   : > { %9150 = vmatpush3.bf16.msra.mxu1 %v9147_v56 }
 0x9a7   : > { %9152 = vmatprep.subr.bf16.mxu1 %v9151_v60 }
 0x9aa   : > { %9154 = vmatpush3.bf16.msra.mxu1 %v9151_v60 }
 0x9ab   : > { %9164 = vmatprep.subr.bf16.mxu1 %v9163_v0 }
 0x9ad   : > { %7870 = vmatmul.mubr.f32.vlgmr.msra.gmra.mrb[48].mxu1 %v11465_v7  ;;  %v9183_v7 = vpack.c.bf16 %v3829_v19, %v3828_v18  ;;  %v6231_v18 = vld [vmem:[%s11949_s1 + $0x10] sm:$0xff]  ;;  %v4274_v19 = vld [vmem:[#allocation17 + $0x80] sm:$0xff] }
 0x9ae   : > { %9166 = vmatpush3.bf16.msra.mxu1 %v9163_v0  ;;  %7915 = vmatprep.mubr.f32.mxu1 %v11469_v14  ;;  %v9187_v14 = vpack.c.bf16 %v3831_v26, %v3830_v24  ;;  %v6229_v24 = vld [vmem:[%s11949_s1 + $0x8] sm:$0xff]  ;;  %v6233_v26 = vld [vmem:[%s11949_s1 + $0x18] sm:$0xff] }
 0x9af   : > { %9168 = vmatprep.subr.bf16.mxu1 %v9167_v8 }
 0x9b2   : > { %9170 = vmatpush3.bf16.msra.mxu1 %v9167_v8 }
 0x9b3   : > { %9172 = vmatprep.subr.bf16.mxu1 %v9171_v4 }
 0x9b6   : > { %9174 = vmatpush3.bf16.msra.mxu1 %v9171_v4 }
 0x9b7   : > { %9176 = vmatprep.subr.bf16.mxu1 %v9175_v13 }
 0x9ba   : > { %9178 = vmatpush3.bf16.msra.mxu1 %v9175_v13 }
 0x9bb   : > { %9180 = vmatprep.subr.bf16.mxu1 %v9179_v17 }
 0x9be   : > { %9182 = vmatpush3.bf16.msra.mxu1 %v9179_v17  ;;  %v4107_v17 = vld [vmem:[%s11949_s1] sm:$0xff]  ;;  %s5917_s1 = scalar_lea.sflag [#allocation5], %s10989_s24 }
 0x9bf   : > { %9184 = vmatprep.subr.bf16.mxu1 %v9183_v7 }
 0x9c2   : > { %9186 = vmatpush3.bf16.msra.mxu1 %v9183_v7  ;;  %v4275_v7 = vld [vmem:[#allocation17 + $0x88] sm:$0xff] }
 0x9c3   : > { %9188 = vmatprep.subr.bf16.mxu1 %v9187_v14 }
 0x9c6   : > { %9190 = vmatpush3.bf16.msra.mxu1 %v9187_v14  ;;  %v9250_v14 = vpack.c.bf16 %v4275_v7, %v4274_v19  ;;  %v4190_v19 = vld [vmem:[#allocation17 + $0x40] sm:$0xff]  ;;  %v4191_v7 = vld [vmem:[#allocation17 + $0x48] sm:$0xff] }
 0x9c7   : > { %9192 = vmatprep.subr.bf16.mxu1 %v9191_v27 }
 0x9ca   : > { %9194 = vmatpush3.bf16.msra.mxu1 %v9191_v27  ;;  %v9253_v27 = vpack.c.bf16 %v4277_v21, %v4276_v25  ;;  %v4194_v21 = vld [vmem:[#allocation17 + $0x60] sm:$0xff] }
 0x9cb   : > { %9297 = vmatprep.subr.bf16.mxu1 %v10407_v22 }
 0x9cd   : > { %7916 = vmatmul.mubr.f32.vlgmr.msra.gmra.mrb[48].mxu1 %v11467_v9  ;;  %v3941_v9 = vld [vmem:[#allocation15 + $0x70] sm:$0xff] }
 0x9ce   : > { %8076 = vmatprep.mubr.msk.f32.mxu1 %vm10408_vm0, %v10409_v20  ;;  %v9217_v38 = vpack.c.bf16 %v3942_v37, %v3941_v9  ;;  %v4284_v9 = vld [vmem:[#allocation17 + $0xd0] sm:$0xff]  ;;  %v4285_v37 = vld [vmem:[#allocation17 + $0xd8] sm:$0xff] }
 0x9d0   : > { %9218 = vmatpush3.bf16.msra.mxu0 %v9217_v38 }
 0x9d1   : > { %9219 = vmatprep.subr.bf16.mxu0 %v10407_v22 }
 0xaa0   : > { %v7917_v40 = vpop.f32.mrb[48].mxu1 }
 0xaa1   : > { %v3919_v42 = vmul.f32 %v7917_v40, %v7917_v40  ;;  %v3900_v43 = vpop.f32.mrb[49].mxu1 }
 0xaa2   : > { %v3911_v45 = vadd.f32 %v7917_v40, %v3900_v43  ;;  %v3918_v46 = vmul.f32 %v3900_v43, %v3900_v43 }
 0xaa4   : > { %v3912_v47 = vrot.slane %v3911_v45, 4  ;;  %v3920_v48 = vadd.f32 %v3919_v42, %v3918_v46  ;;  %v4287_v42 = vld [vmem:[#allocation17 + $0xe8] sm:$0xff]  ;;  %v4289_v46 = vld [vmem:[#allocation17 + $0xf8] sm:$0xff] }
 0xaa6   : > { %v3913_v49 = vadd.f32 %v3912_v47, %v3911_v45  ;;  %v3921_v44 = vrot.slane %v3920_v48, 4  ;;  %v4288_v45 = vld [vmem:[#allocation17 + $0xf0] sm:$0xff] }
 0xaa7   : > { %v9271_v47 = vpack.c.bf16 %v4289_v46, %v4288_v45  ;;  %v4514_v46 = vld [vmem:[#allocation17 + $0x140] sm:$0xff] }
 0xaa8   : > { %v3914_v50 = vrot.slane %v3913_v49, 2  ;;  %v3922_v52 = vadd.f32 %v3921_v44, %v3920_v48  ;;  %v4769_v48 = vld [vmem:[#allocation18] sm:$0xff] }
 0xaa9   : > { %v4773_v44 = vld [vmem:[#allocation18 + $0x20] sm:$0xff] }
 0xaaa   : > { %v3915_v39 = vadd.f32 %v3914_v50, %v3913_v49  ;;  %v4770_v49 = vld [vmem:[#allocation18 + $0x8] sm:$0xff]  ;;  %v4771_v50 = vld [vmem:[#allocation18 + $0x10] sm:$0xff] }
 0xaac   : > { %v3916_v51 = vrot.slane %v3915_v39, 1 }
 0xaae   : > { %v3917_v41 = vadd.f32 %v3916_v51, %v3915_v39  ;;  %v11535_v39 = vpack.c.bf16 %v4770_v49, %v4769_v48  ;;  %v4772_v51 = vld [vmem:[#allocation18 + $0x18] sm:$0xff]  ;;  %v4516_v49 = vld [vmem:[#allocation17 + $0x150] sm:$0xff] }
 0xab0   : > { %7951 = vmatmul.mubr.f32.vlgmr.msra.gmra.mrb[28].mxu0 %v3917_v41  ;;  %v11538_v41 = vpack.c.bf16 %v4772_v51, %v4771_v50  ;;  %v4517_v50 = vld [vmem:[#allocation17 + $0x158] sm:$0xff] }
 0xab1   : > { %9221 = vmatpush3.bf16.msra.mxu0 %v11449_v59  ;;  %7985 = vmatprep.mubr.msk.f32.mxu0 %vm10408_vm0, %v10409_v20  ;;  %v3923_v59 = vrot.slane %v3922_v52, 2  ;;  %v9316_v51 = vpack.c.bf16 %v4517_v50, %v4516_v49 }
 0xab2   : > { %9222 = vmatprep.subr.bf16.mxu0 %v10407_v22 }
 0xab5   : > { %9224 = vmatpush3.bf16.msra.mxu0 %v11452_v23  ;;  %v3924_v23 = vadd.f32 %v3923_v59, %v3922_v52  ;;  %v4774_v52 = vld [vmem:[#allocation18 + $0x28] sm:$0xff] }
 0xab6   : > { %9225 = vmatprep.subr.bf16.mxu0 %v10407_v22  ;;  %v11542_v59 = vpack.c.bf16 %v4774_v52, %v4773_v44  ;;  %v4518_v44 = vld [vmem:[#allocation17 + $0x160] sm:$0xff]  ;;  %v4519_v52 = vld [vmem:[#allocation17 + $0x168] sm:$0xff] }
 0xab9   : > { %9227 = vmatpush3.bf16.msra.mxu0 %v11456_v63  ;;  %v3925_v63 = vrot.slane %v3924_v23, 1 }
 0xaba   : > { %9228 = vmatprep.subr.bf16.mxu0 %v10407_v22 }
 0xabb   : > { %v3926_v53 = vadd.f32 %v3925_v63, %v3924_v23  ;;  %v4775_v23 = vld [vmem:[#allocation18 + $0x30] sm:$0xff]  ;;  %v4776_v63 = vld [vmem:[#allocation18 + $0x38] sm:$0xff] }
 0xabd   : > { %9230 = vmatpush3.bf16.msra.mxu0 %v11460_v2 }
 0xabe   : > { %9231 = vmatprep.subr.bf16.mxu0 %v10407_v22 }
 0xac1   : > { %9233 = vmatpush3.bf16.msra.mxu0 %v9208_v30  ;;  %v9256_v30 = vpack.c.bf16 %v4279_v29, %v4278_v28  ;;  %v4196_v29 = vld [vmem:[#allocation17 + $0x70] sm:$0xff] }
 0xac2   : > { %9234 = vmatprep.subr.bf16.mxu0 %v10407_v22 }
 0xac5   : > { %9236 = vmatpush3.bf16.msra.mxu0 %v9211_v33  ;;  %v9259_v33 = vpack.c.bf16 %v4281_v32, %v4280_v31  ;;  %v4506_v32 = vld [vmem:[#allocation17 + $0x100] sm:$0xff] }
 0xac6   : > { %9237 = vmatprep.subr.bf16.mxu0 %v10407_v22 }
 0xac9   : > { %9239 = vmatpush3.bf16.msra.mxu0 %v9214_v36  ;;  %v9262_v36 = vpack.c.bf16 %v4283_v35, %v4282_v34  ;;  %v4508_v35 = vld [vmem:[#allocation17 + $0x110] sm:$0xff] }
 0xaca   : > { %9240 = vmatprep.subr.bf16.mxu0 %v10407_v22 }
 0xacd   : > { %9242 = vmatpush3.bf16.msra.mxu0 %v9217_v38  ;;  %v9265_v38 = vpack.c.bf16 %v4285_v37, %v4284_v9  ;;  %v4510_v37 = vld [vmem:[#allocation17 + $0x120] sm:$0xff] }
 0xace   : > { %9243 = vmatprep.subr.bf16.mxu0 %v10407_v22 }
 0xad0   : > { %7986 = vmatmul.mubr.f32.vlgmr.msra.gmra.mrb[30].mxu0 %v3926_v53  ;;  %v11546_v53 = vpack.c.bf16 %v4776_v63, %v4775_v23  ;;  %v9319_v23 = vpack.c.bf16 %v4519_v52, %v4518_v44  ;;  %v4520_v63 = vld [vmem:[#allocation17 + $0x170] sm:$0xff] }
 0xad1   : > { %7992 = vmatprep.mubr.msk.f32.mxu0 %vm10408_vm0, %v10409_v20 }
 0xb83   : > { %v4009_v2 = vpop.f32.mrb[28].mxu0 }
 0xb84   : > { %v4013_v54 = vmul.f32 0.00390625, %v4009_v2  ;;  %v7952_v55 = vpop.f32.mrb[29].mxu0  ;;  %v4777_v2 = vld [vmem:[#allocation18 + $0x40] sm:$0xff] }
 0xb86   : > { %v4090_v56 = vrot.slane %v4013_v54, %v11277_v5  ;;  %v4085_v61 = vmul.f32 %v4013_v54, %v4013_v54  ;;  %v4778_v54 = vld [vmem:[#allocation18 + $0x48] sm:$0xff] }
 0xb87   : > { %v11550_v55 = vpack.c.bf16 %v4778_v54, %v4777_v2  ;;  %v4521_v2 = vld [vmem:[#allocation17 + $0x178] sm:$0xff] }
 0xb88   : > { %v4091_v57 = vsub.f32 %v3900_v43, %v4090_v56  ;;  %v4092_v58 = vsub.f32 %v7917_v40, %v4090_v56  ;;  %v4286_v40 = vld [vmem:[#allocation17 + $0xe0] sm:$0xff]  ;;  %v9322_v54 = vpack.c.bf16 %v4521_v2, %v4520_v63 }
 0xb89   : > { %v9268_v43 = vpack.c.bf16 %v4287_v42, %v4286_v40  ;;  %v4182_v56 = vld [vmem:[#allocation17] sm:$0xff]  ;;  %v4512_v42 = vld [vmem:[#allocation17 + $0x130] sm:$0xff] }
 0xba3   : > { %v4080_v60 = vpop.f32.mrb[30].mxu0 }
 0xba4   : > { %v4084_v62 = vmul.f32 0.00390625, %v4080_v60  ;;  %v7987_v0 = vpop.f32.mrb[31].mxu0 }
 0xba6   : > { %v4086_v1 = vsub.f32 %v4084_v62, %v4085_v61 }
 0xba8   : > { %v4093_v3 = vadd.f32 1e-05, %v4086_v1  ;;  %v4184_v1 = vld [vmem:[#allocation17 + $0x10] sm:$0xff] }
 0xbaa   : > { %9829 = vrsqrt.f32 %v4093_v3  ;;  %v4185_v3 = vld [vmem:[#allocation17 + $0x18] sm:$0xff] }
 0xbb4   : > { %v9830_v8 = vpop.eup %9829 }
 0xbb5   : > { %v4098_v10 = vrot.slane %v9830_v8, %v11277_v5 }
 0xbb7   : > { %v4099_v11 = vmul.f32 %v4098_v10, %v4091_v57  ;;  %v4100_v4 = vmul.f32 %v4098_v10, %v4092_v58  ;;  %v4183_v57 = vld [vmem:[#allocation17 + $0x8] sm:$0xff] }
 0xbb8   : > { %v9274_v0 = vpack.c.bf16 %v4183_v57, %v4182_v56  ;;  %v4669_v56 = vld [vmem:[#allocation17 + $0x180] sm:$0xff]  ;;  %v4670_v57 = vld [vmem:[#allocation17 + $0x188] sm:$0xff] }
 0xbb9   : > { %vm4101_vm15 = vcmp.gt.f32.partialorder %v4099_v11, 0.0  ;;  %vm4102_vm1 = vcmp.gt.f32.partialorder %v4100_v4, 0.0  ;;  %v4103_v6 = vmul.f32 0.2, %v4099_v11  ;;  %v4104_v12 = vmul.f32 0.2, %v4100_v4 }
 0xbbb   : > { %v4105_v13 = vsel %vm4101_vm15, %v4099_v11, %v4103_v6  ;;  %v4106_v15 = vsel %vm4102_vm1, %v4100_v4, %v4104_v12  ;;  %v9277_v6 = vpack.c.bf16 %v4185_v3, %v4184_v1  ;;  %v4186_v12 = vld [vmem:[#allocation17 + $0x20] sm:$0xff]  ;;  %v4674_v3 = vld [vmem:[#allocation17 + $0x1a8] sm:$0xff] }
 0xbbc   : > { %v9244_v16 = vpack.c.bf16 %v4106_v15, %v4105_v13  ;;  %v4187_v13 = vld [vmem:[#allocation17 + $0x28] sm:$0xff]  ;;  %v4673_v1 = vld [vmem:[#allocation17 + $0x1a0] sm:$0xff] }
 0xbbd   : > { %v9280_v15 = vpack.c.bf16 %v4187_v13, %v4186_v12  ;;  %v4678_v12 = vld [vmem:[#allocation17 + $0x1c8] sm:$0xff] }
 0xbbe   : > { %9245 = vmatpush3.bf16.msra.mxu0 %v9244_v16  ;;  %9299 = vmatpush3.bf16.msra.mxu1 %v9244_v16 }
 0xbbf   : > { %9246 = vmatprep.subr.bf16.mxu0 %v10407_v22  ;;  %9324 = vmatprep.subr.bf16.mxu1 %v10407_v22 }
 0xbc1   : > { %7993 = vmatmul.mubr.msk.f32.vlgmr.msra.gmra.mrb[32].mxu0 %vm4108_vm2, %v4107_v17  ;;  %8077 = vmatmul.mubr.msk.f32.vlgmr.msra.gmra.mrb[50].mxu1 %vm4108_vm2, %v6231_v18  ;;  %v4189_v17 = vld [vmem:[#allocation17 + $0x38] sm:$0xff] }
 0xbc2   : > { %9248 = vmatpush3.bf16.msra.mxu0 %v9244_v16  ;;  %9326 = vmatpush3.bf16.msra.mxu1 %v9244_v16  ;;  %v4188_v16 = vld [vmem:[#allocation17 + $0x30] sm:$0xff] }
 0xbc3   : > { %7999 = vmatprep.mubr.msk.f32.mxu0 %vm10408_vm0, %v10409_v20  ;;  %8118 = vmatprep.mubr.msk.f32.mxu1 %vm10408_vm0, %v10409_v20  ;;  %v9283_v18 = vpack.c.bf16 %v4189_v17, %v4188_v16  ;;  %v4680_v16 = vld [vmem:[#allocation17 + $0x1d8] sm:$0xff] }
 0xbc4   : > { %9249 = vmatprep.subr.bf16.mxu0 %v10407_v22  ;;  %9351 = vmatprep.subr.bf16.mxu1 %v10407_v22 }
 0xbc5   : > { %8000 = vmatmul.mubr.msk.f32.vlgmr.msra.gmra.mrb[34].mxu0 %vm4108_vm2, %v6229_v24  ;;  %8119 = vmatmul.mubr.msk.f32.vlgmr.msra.gmra.mrb[52].mxu1 %vm4108_vm2, %v6233_v26  ;;  %v9286_v24 = vpack.c.bf16 %v4191_v7, %v4190_v19  ;;  %v4192_v26 = vld [vmem:[#allocation17 + $0x50] sm:$0xff]  ;;  %v4682_v19 = vld [vmem:[#allocation17 + $0x1e8] sm:$0xff] }
 0xbc6   : > { %9251 = vmatpush3.bf16.msra.mxu0 %v9250_v14  ;;  %8034 = vmatprep.mubr.msk.f32.mxu0 %vm10408_vm0, %v10409_v20  ;;  %v4193_v14 = vld [vmem:[#allocation17 + $0x58] sm:$0xff] }
 0xbc7   : > { %9252 = vmatprep.subr.bf16.mxu0 %v10407_v22  ;;  %8188 = vmatprep.mubr.msk.f32.mxu1 %vm10408_vm0, %v10409_v20  ;;  %v9289_v25 = vpack.c.bf16 %v4193_v14, %v4192_v26  ;;  %v4684_v26 = vld [vmem:[#allocation17 + $0x1f8] sm:$0xff] }
 0xbc8   : > { %9353 = vmatpush3.bf16.msra.mxu1 %v11535_v39 }
 0xbc9   : > { %9354 = vmatprep.subr.bf16.mxu1 %v10407_v22 }
 0xbca   : > { %9254 = vmatpush3.bf16.msra.mxu0 %v9253_v27  ;;  %v4195_v27 = vld [vmem:[#allocation17 + $0x68] sm:$0xff] }
 0xbcb   : > { %9255 = vmatprep.subr.bf16.mxu0 %v10407_v22  ;;  %v9292_v28 = vpack.c.bf16 %v4195_v27, %v4194_v21  ;;  %v4780_v21 = vld [vmem:[#allocation18 + $0x58] sm:$0xff] }
 0xbcc   : > { %9356 = vmatpush3.bf16.msra.mxu1 %v11538_v41 }
 0xbcd   : > { %9357 = vmatprep.subr.bf16.mxu1 %v10407_v22 }
 0xbce   : > { %9257 = vmatpush3.bf16.msra.mxu0 %v9256_v30  ;;  %v4197_v30 = vld [vmem:[#allocation17 + $0x78] sm:$0xff] }
 0xbcf   : > { %9258 = vmatprep.subr.bf16.mxu0 %v10407_v22  ;;  %v9295_v31 = vpack.c.bf16 %v4197_v30, %v4196_v29  ;;  %v4782_v29 = vld [vmem:[#allocation18 + $0x68] sm:$0xff] }
 0xbd0   : > { %9359 = vmatpush3.bf16.msra.mxu1 %v11542_v59 }
 0xbd1   : > { %9360 = vmatprep.subr.bf16.mxu1 %v10407_v22 }
 0xbd2   : > { %9260 = vmatpush3.bf16.msra.mxu0 %v9259_v33  ;;  %v4507_v33 = vld [vmem:[#allocation17 + $0x108] sm:$0xff] }
 0xbd3   : > { %9261 = vmatprep.subr.bf16.mxu0 %v10407_v22  ;;  %v9301_v34 = vpack.c.bf16 %v4507_v33, %v4506_v32  ;;  %v4784_v32 = vld [vmem:[#allocation18 + $0x78] sm:$0xff] }
 0xbd4   : > { %9362 = vmatpush3.bf16.msra.mxu1 %v11546_v53 }
 0xbd5   : > { %9363 = vmatprep.subr.bf16.mxu1 %v10407_v22 }
 0xbd6   : > { %9263 = vmatpush3.bf16.msra.mxu0 %v9262_v36  ;;  %v4509_v36 = vld [vmem:[#allocation17 + $0x118] sm:$0xff] }
 0xbd7   : > { %9264 = vmatprep.subr.bf16.mxu0 %v10407_v22  ;;  %v9304_v9 = vpack.c.bf16 %v4509_v36, %v4508_v35 }
 0xbd8   : > { %9365 = vmatpush3.bf16.msra.mxu1 %v11550_v55 }
 0xbd9   : > { %9366 = vmatprep.subr.bf16.mxu1 %v10407_v22 }
 0xbda   : > { %9266 = vmatpush3.bf16.msra.mxu0 %v9265_v38  ;;  %v4511_v38 = vld [vmem:[#allocation17 + $0x128] sm:$0xff] }
 0xbdb   : > { %9267 = vmatprep.subr.bf16.mxu0 %v10407_v22  ;;  %v9307_v40 = vpack.c.bf16 %v4511_v38, %v4510_v37 }
 0xbde   : > { %9269 = vmatpush3.bf16.msra.mxu0 %v9268_v43  ;;  %v4513_v43 = vld [vmem:[#allocation17 + $0x138] sm:$0xff] }
 0xbdf   : > { %9270 = vmatprep.subr.bf16.mxu0 %v10407_v22  ;;  %v9310_v45 = vpack.c.bf16 %v4513_v43, %v4512_v42 }
 0xbe2   : > { %9272 = vmatpush3.bf16.msra.mxu0 %v9271_v47  ;;  %v4515_v47 = vld [vmem:[#allocation17 + $0x148] sm:$0xff] }
 0xbe3   : > { %9273 = vmatprep.subr.bf16.mxu0 %v10407_v22  ;;  %v9313_v48 = vpack.c.bf16 %v4515_v47, %v4514_v46 }
 0xc94   : > { %v4178_v58 = vpop.f32.mrb[32].mxu0  ;;  %v11555_v60 = vpop.f32.mrb[50].mxu1 }
 0xc95   : > { %v7994_v61 = vpop.f32.mrb[33].mxu0  ;;  %v8078_v62 = vpop.f32.mrb[51].mxu1 }
 0xc96   : > { %v4671_v61 = vld [vmem:[#allocation17 + $0x190] sm:$0xff]  ;;  %v4672_v62 = vld [vmem:[#allocation17 + $0x198] sm:$0xff] }
 0xc98   : > { %v4269_v8 = vpop.f32.mrb[34].mxu0  ;;  %v11557_v10 = vpop.f32.mrb[52].mxu1 }
 0xc99   : > { %v8001_v11 = vpop.f32.mrb[35].mxu0  ;;  %8035 = vmatmul.mubr.f32.vlgmr.msra.gmra.mrb[36].mxu0 %v4269_v8  ;;  %v8120_v4 = vpop.f32.mrb[53].mxu1  ;;  %v9334_v8 = vpack.c.bf16 %v4674_v3, %v4673_v1  ;;  %v5268_v1 = vld [vmem:[#allocation20 + $0x8] sm:$0xf]  ;;  %v5036_v3 = vld [vmem:[#allocation20 + $0x4] sm:$0xf] }
 0xc9a   : > { %9275 = vmatpush3.bf16.msra.mxu0 %v9274_v0  ;;  %8069 = vmatprep.mubr.msk.f32.mxu0 %vm10408_vm0, %v10409_v20  ;;  %v9331_v0 = vpack.c.bf16 %v4672_v62, %v4671_v61  ;;  %v4675_v11 = vld [vmem:[#allocation17 + $0x1b0] sm:$0xff]  ;;  %v4676_v4 = vld [vmem:[#allocation17 + $0x1b8] sm:$0xff] }
 0xc9b   : > { %9276 = vmatprep.subr.bf16.mxu0 %v10407_v22  ;;  %v5111_v62 = vld [vmem:[#allocation21 + $0x80] sm:$0xff] }
 0xc9e   : > { %9278 = vmatpush3.bf16.msra.mxu0 %v9277_v6  ;;  %v9337_v6 = vpack.c.bf16 %v4676_v4, %v4675_v11  ;;  %v5113_v11 = vld [vmem:[#allocation21 + $0x90] sm:$0xff]  ;;  %v5114_v4 = vld [vmem:[#allocation21 + $0x98] sm:$0xff] }
 0xc9f   : > { %9279 = vmatprep.subr.bf16.mxu0 %v10407_v22 }
 0xca2   : > { %9281 = vmatpush3.bf16.msra.mxu0 %v9280_v15  ;;  %v4679_v15 = vld [vmem:[#allocation17 + $0x1d0] sm:$0xff] }
 0xca3   : > { %9282 = vmatprep.subr.bf16.mxu0 %v10407_v22  ;;  %v9343_v17 = vpack.c.bf16 %v4680_v16, %v4679_v15  ;;  %v5117_v16 = vld [vmem:[#allocation21 + $0xb0] sm:$0xff] }
 0xca6   : > { %9284 = vmatpush3.bf16.msra.mxu0 %v9283_v18  ;;  %v4681_v18 = vld [vmem:[#allocation17 + $0x1e0] sm:$0xff] }
 0xca7   : > { %9285 = vmatprep.subr.bf16.mxu0 %v10407_v22  ;;  %v9346_v7 = vpack.c.bf16 %v4682_v19, %v4681_v18  ;;  %v5119_v19 = vld [vmem:[#allocation21 + $0xc0] sm:$0xff] }
 0xcaa   : > { %9287 = vmatpush3.bf16.msra.mxu0 %v9286_v24  ;;  %v4683_v24 = vld [vmem:[#allocation17 + $0x1f0] sm:$0xff] }
 0xcab   : > { %9288 = vmatprep.subr.bf16.mxu0 %v10407_v22  ;;  %v9349_v14 = vpack.c.bf16 %v4684_v26, %v4683_v24  ;;  %v5121_v26 = vld [vmem:[#allocation21 + $0xd0] sm:$0xff] }
 0xcae   : > { %9290 = vmatpush3.bf16.msra.mxu0 %v9289_v25  ;;  %v4779_v25 = vld [vmem:[#allocation18 + $0x50] sm:$0xff] }
 0xcaf   : > { %9291 = vmatprep.subr.bf16.mxu0 %v10407_v22  ;;  %v9367_v27 = vpack.c.bf16 %v4780_v21, %v4779_v25  ;;  %v5123_v21 = vld [vmem:[#allocation21 + $0xe0] sm:$0xff] }
 0xcb1   : > { %9368 = vmatpush3.bf16.msra.mxu1 %v9367_v27 }
 0xcb2   : > { %9293 = vmatpush3.bf16.msra.mxu0 %v9292_v28  ;;  %9369 = vmatprep.subr.bf16.mxu1 %v10407_v22  ;;  %v4781_v28 = vld [vmem:[#allocation18 + $0x60] sm:$0xff] }
 0xcb3   : > { %9294 = vmatprep.subr.bf16.mxu0 %v10407_v22  ;;  %v9370_v30 = vpack.c.bf16 %v4782_v29, %v4781_v28  ;;  %v5125_v29 = vld [vmem:[#allocation21 + $0xf0] sm:$0xff] }
 0xcb5   : > { %9371 = vmatpush3.bf16.msra.mxu1 %v9370_v30 }
 0xcb6   : > { %9296 = vmatpush3.bf16.msra.mxu0 %v9295_v31  ;;  %9372 = vmatprep.subr.bf16.mxu1 %v10407_v22  ;;  %v4783_v31 = vld [vmem:[#allocation18 + $0x70] sm:$0xff] }
 0xcb7   : > { %9300 = vmatprep.subr.bf16.mxu0 %v10407_v22  ;;  %v9373_v33 = vpack.c.bf16 %v4784_v32, %v4783_v31  ;;  %v5609_v32 = vld [vmem:[#allocation23] sm:$0xff] }
 0xcb9   : > { %8070 = vmatmul.mubr.f32.vlgmr.msra.gmra.mrb[36].mxu0 %v4178_v58  ;;  %v9328_v58 = vpack.c.bf16 %v4670_v57, %v4669_v56  ;;  %9374 = vmatpush3.bf16.msra.mxu1 %v9373_v33 }
 0xcba   : > { %9302 = vmatpush3.bf16.msra.mxu0 %v9301_v34  ;;  %8111 = vmatprep.mubr.msk.f32.mxu0 %vm10408_vm0, %v10409_v20 }
 0xcbb   : > { %9303 = vmatprep.subr.bf16.mxu0 %v10407_v22  ;;  %9375 = vmatprep.subr.bf16.mxu1 %v10407_v22 }
 0xcbe   : > { %9305 = vmatpush3.bf16.msra.mxu0 %v9304_v9 }
 0xcbf   : > { %9306 = vmatprep.subr.bf16.mxu0 %v10407_v22 }
 0xcc2   : > { %9308 = vmatpush3.bf16.msra.mxu0 %v9307_v40 }
 0xcc3   : > { %9309 = vmatprep.subr.bf16.mxu0 %v10407_v22 }
 0xcc6   : > { %9311 = vmatpush3.bf16.msra.mxu0 %v9310_v45 }
 0xcc7   : > { %9312 = vmatprep.subr.bf16.mxu0 %v10407_v22 }
 0xcca   : > { %9314 = vmatpush3.bf16.msra.mxu0 %v9313_v48 }
 0xccb   : > { %9315 = vmatprep.subr.bf16.mxu0 %v10407_v22 }
 0xcce   : > { %9317 = vmatpush3.bf16.msra.mxu0 %v9316_v51 }
 0xccf   : > { %9318 = vmatprep.subr.bf16.mxu0 %v10407_v22 }
 0xcd2   : > { %9320 = vmatpush3.bf16.msra.mxu0 %v9319_v23 }
 0xcd3   : > { %9321 = vmatprep.subr.bf16.mxu0 %v10407_v22 }
 0xcd6   : > { %9323 = vmatpush3.bf16.msra.mxu0 %v9322_v54 }
 0xcd7   : > { %9327 = vmatprep.subr.bf16.mxu0 %v10407_v22 }
 0xcd9   : > { %8112 = vmatmul.mubr.f32.vlgmr.msra.gmra.mrb[36].mxu0 %v11555_v60  ;;  %v4677_v60 = vld [vmem:[#allocation17 + $0x1c0] sm:$0xff] }
 0xcda   : > { %9329 = vmatpush3.bf16.msra.mxu0 %v9328_v58  ;;  %8153 = vmatprep.mubr.msk.f32.mxu0 %vm10408_vm0, %v10409_v20  ;;  %v9340_v13 = vpack.c.bf16 %v4678_v12, %v4677_v60  ;;  %v4944_v58 = vld [vmem:[#allocation20] sm:$0xf]  ;;  %v9403_v60 = vpack.c.bf16 %v5114_v4, %v5113_v11  ;;  %v5115_v12 = vld [vmem:[#allocation21 + $0xa0] sm:$0xff]  ;;  %v5030_v11 = vld [vmem:[#allocation21 + $0x58] sm:$0xff] }
 0xcdb   : > { %9330 = vmatprep.subr.bf16.mxu0 %v10407_v22 }
 0xcde   : > { %9332 = vmatpush3.bf16.msra.mxu0 %v9331_v0  ;;  %v5112_v0 = vld [vmem:[#allocation21 + $0x88] sm:$0xff] }
 0xcdf   : > { %9333 = vmatprep.subr.bf16.mxu0 %v10407_v22 }
 0xce2   : > { %9335 = vmatpush3.bf16.msra.mxu0 %v9334_v8  ;;  %v9400_v8 = vpack.c.bf16 %v5112_v0, %v5111_v62  ;;  %v5027_v0 = vld [vmem:[#allocation21 + $0x40] sm:$0xff] }
 0xce3   : > { %9336 = vmatprep.subr.bf16.mxu0 %v10407_v22 }
 0xce6   : > { %9338 = vmatpush3.bf16.msra.mxu0 %v9337_v6  ;;  %v5431_v6 = vld [vmem:[#allocation20 + $0xc] sm:$0xf] }
 0xce7   : > { %9339 = vmatprep.subr.bf16.mxu0 %v10407_v22 }
 0xcea   : > { %9341 = vmatpush3.bf16.msra.mxu0 %v9340_v13  ;;  %v5116_v13 = vld [vmem:[#allocation21 + $0xa8] sm:$0xff] }
 0xceb   : > { %9342 = vmatprep.subr.bf16.mxu0 %v10407_v22  ;;  %v9406_v15 = vpack.c.bf16 %v5116_v13, %v5115_v12  ;;  %v5033_v13 = vld [vmem:[#allocation21 + $0x70] sm:$0xff] }
 0xcee   : > { %9344 = vmatpush3.bf16.msra.mxu0 %v9343_v17  ;;  %v5118_v17 = vld [vmem:[#allocation21 + $0xb8] sm:$0xff] }
 0xcef   : > { %9345 = vmatprep.subr.bf16.mxu0 %v10407_v22  ;;  %v9409_v18 = vpack.c.bf16 %v5118_v17, %v5117_v16  ;;  %v5343_v17 = vld [vmem:[#allocation21 + $0x100] sm:$0xff] }
 0xcf2   : > { %9347 = vmatpush3.bf16.msra.mxu0 %v9346_v7  ;;  %v5120_v7 = vld [vmem:[#allocation21 + $0xc8] sm:$0xff] }
 0xcf3   : > { %9348 = vmatprep.subr.bf16.mxu0 %v10407_v22  ;;  %v9412_v24 = vpack.c.bf16 %v5120_v7, %v5119_v19  ;;  %v5345_v7 = vld [vmem:[#allocation21 + $0x110] sm:$0xff] }
 0xcf6   : > { %9350 = vmatpush3.bf16.msra.mxu0 %v9349_v14  ;;  %v5122_v14 = vld [vmem:[#allocation21 + $0xd8] sm:$0xff] }
 0xcf7   : > { %8306 = vmatprep.subr.mxu0 %v10409_v20  ;;  %v9415_v25 = vpack.c.bf16 %v5122_v14, %v5121_v26  ;;  %v5347_v14 = vld [vmem:[#allocation21 + $0x120] sm:$0xff] }
 0xcf9   : > { %8154 = vmatmul.mubr.f32.vlgmr.msra.gmra.mrb[36].mxu0 %v11557_v10 }
 0xcfa   : > { %8308 = vmatprep.mubr.msk.f32.mxu0 %vm10408_vm0, %v10409_v20 }
 0xdcc   : > { %v4751_v10 = vpop.f32.mrb[36].mxu0 }
 0xdcd   : > { %v4756_v34 = vrot.slane %v4751_v10, 4  ;;  %v8155_v35 = vpop.f32.mrb[37].mxu0  ;;  %v4762_v42 = vmul.f32 %v4751_v10, %v4751_v10 }
 0xdce   : > { %v5612_v35 = vld [vmem:[#allocation23 + $0x18] sm:$0xff] }
 0xdcf   : > { %v4757_v36 = vadd.f32 %v4756_v34, %v4751_v10  ;;  %v4763_v43 = vrot.slane %v4762_v42, 4 }
 0xdd1   : > { %v4758_v9 = vrot.slane %v4757_v36, 2  ;;  %v4764_v45 = vadd.f32 %v4763_v43, %v4762_v42  ;;  %v5616_v42 = vld [vmem:[#allocation23 + $0x38] sm:$0xff] }
 0xdd3   : > { %v4759_v37 = vadd.f32 %v4758_v9, %v4757_v36  ;;  %v5613_v9 = vld [vmem:[#allocation23 + $0x20] sm:$0xff] }
 0xdd5   : > { %v4760_v38 = vrot.slane %v4759_v37, 1 }
 0xdd7   : > { %v4761_v40 = vadd.f32 %v4760_v38, %v4759_v37  ;;  %v5614_v37 = vld [vmem:[#allocation23 + $0x28] sm:$0xff] }
 0xdd8   : > { %v11646_v38 = vpack.c.bf16 %v5614_v37, %v5613_v9  ;;  %v5355_v9 = vld [vmem:[#allocation21 + $0x160] sm:$0xff]  ;;  %v5356_v37 = vld [vmem:[#allocation21 + $0x168] sm:$0xff] }
 0xdd9   : > { %8189 = vmatmul.mubr.f32.vlgmr.msra.gmra.mrb[54].mxu1 %v4761_v40  ;;  %v5615_v40 = vld [vmem:[#allocation23 + $0x30] sm:$0xff] }
 0xdda   : > { %9377 = vmatpush3.bf16.msra.mxu1 %v11535_v39  ;;  %8223 = vmatprep.mubr.msk.f32.mxu1 %vm10408_vm0, %v10409_v20  ;;  %v4765_v39 = vrot.slane %v4764_v45, 2  ;;  %v11650_v43 = vpack.c.bf16 %v5616_v42, %v5615_v40  ;;  %v9466_v40 = vpack.c.bf16 %v5356_v37, %v5355_v9  ;;  %v5357_v42 = vld [vmem:[#allocation21 + $0x170] sm:$0xff] }
 0xddb   : > { %9378 = vmatprep.subr.bf16.mxu1 %v10407_v22  ;;  %v5797_v9 = vld [vmem:[%s11950_s9 + $0x20] sm:$0xff]  ;;  %v5798_v37 = vld [vmem:[%s11950_s9 + $0x28] sm:$0xff] }
 0xdde   : > { %9380 = vmatpush3.bf16.msra.mxu1 %v11538_v41  ;;  %v4766_v41 = vadd.f32 %v4765_v39, %v4764_v45  ;;  %v5617_v45 = vld [vmem:[#allocation23 + $0x40] sm:$0xff]  ;;  %v5618_v39 = vld [vmem:[#allocation23 + $0x48] sm:$0xff] }
 0xddf   : > { %9381 = vmatprep.subr.bf16.mxu1 %v10407_v22 }
 0xde2   : > { %9383 = vmatpush3.bf16.msra.mxu1 %v11542_v59  ;;  %v4767_v59 = vrot.slane %v4766_v41, 1 }
 0xde3   : > { %9384 = vmatprep.subr.bf16.mxu1 %v10407_v22 }
 0xde4   : > { %v4768_v46 = vadd.f32 %v4767_v59, %v4766_v41  ;;  %v11654_v41 = vpack.c.bf16 %v5618_v39, %v5617_v45  ;;  %v5019_v59 = vld [vmem:[#allocation21] sm:$0xff]  ;;  %v5358_v45 = vld [vmem:[#allocation21 + $0x178] sm:$0xff] }
 0xde5   : > { %v9469_v39 = vpack.c.bf16 %v5358_v45, %v5357_v42  ;;  %v5799_v42 = vld [vmem:[%s11950_s9 + $0x30] sm:$0xff]  ;;  %v5800_v45 = vld [vmem:[%s11950_s9 + $0x38] sm:$0xff] }
 0xde6   : > { %9386 = vmatpush3.bf16.msra.mxu1 %v11546_v53 }
 0xde7   : > { %9387 = vmatprep.subr.bf16.mxu1 %v10407_v22 }
 0xdea   : > { %9389 = vmatpush3.bf16.msra.mxu1 %v11550_v55 }
 0xdeb   : > { %9390 = vmatprep.subr.bf16.mxu1 %v10407_v22 }
 0xdee   : > { %9392 = vmatpush3.bf16.msra.mxu1 %v9367_v27  ;;  %v5124_v27 = vld [vmem:[#allocation21 + $0xe8] sm:$0xff] }
 0xdef   : > { %9393 = vmatprep.subr.bf16.mxu1 %v10407_v22  ;;  %v9418_v28 = vpack.c.bf16 %v5124_v27, %v5123_v21  ;;  %v5349_v27 = vld [vmem:[#allocation21 + $0x130] sm:$0xff] }
 0xdf2   : > { %9395 = vmatpush3.bf16.msra.mxu1 %v9370_v30  ;;  %v5126_v30 = vld [vmem:[#allocation21 + $0xf8] sm:$0xff] }
 0xdf3   : > { %9396 = vmatprep.subr.bf16.mxu1 %v10407_v22  ;;  %v9421_v31 = vpack.c.bf16 %v5126_v30, %v5125_v29  ;;  %v5351_v30 = vld [vmem:[#allocation21 + $0x140] sm:$0xff] }
 0xdf6   : > { %9398 = vmatpush3.bf16.msra.mxu1 %v9373_v33  ;;  %v5610_v33 = vld [vmem:[#allocation23 + $0x8] sm:$0xff] }
 0xdf7   : > { %8226 = vmatprep.subr.mxu1 %v10409_v20  ;;  %v11639_v34 = vpack.c.bf16 %v5610_v33, %v5609_v32  ;;  %v5353_v33 = vld [vmem:[#allocation21 + $0x150] sm:$0xff] }
 0xdf9   : > { %8224 = vmatmul.mubr.f32.vlgmr.msra.gmra.mrb[56].mxu1 %v4768_v46  ;;  %v5020_v46 = vld [vmem:[#allocation21 + $0x8] sm:$0xff] }
 0xdfa   : > { %8228 = vmatprep.mubr.msk.f32.mxu1 %vm10408_vm0, %v10409_v20 }
 0xeac   : > { %v4851_v53 = vpop.f32.mrb[54].mxu1 }
 0xead   : > { %v4855_v55 = vmul.f32 0.015625, %v4851_v53  ;;  %v8190_v47 = vpop.f32.mrb[55].mxu1 }
 0xeae   : > { %v9424_v47 = vpack.c.bf16 %v5020_v46, %v5019_v59  ;;  %v5506_v59 = vld [vmem:[#allocation21 + $0x180] sm:$0xff]  ;;  %v5507_v46 = vld [vmem:[#allocation21 + $0x188] sm:$0xff] }
 0xeaf   : > { %v4932_v48 = vrot.slane %v4855_v55, %v11277_v5  ;;  %v4927_v51 = vmul.f32 %v4855_v55, %v4855_v55 }
 0xeb1   : > { %v4933_v49 = vsub.f32 %v4751_v10, %v4932_v48  ;;  %v5611_v10 = vld [vmem:[#allocation23 + $0x10] sm:$0xff] }
 0xeb2   : > { %v11642_v36 = vpack.c.bf16 %v5612_v35, %v5611_v10  ;;  %v5354_v10 = vld [vmem:[#allocation21 + $0x158] sm:$0xff] }
 0xeb3   : > { %v9463_v35 = vpack.c.bf16 %v5354_v10, %v5353_v33  ;;  %v5795_v10 = vld [vmem:[%s11950_s9 + $0x10] sm:$0xff] }
 0xecc   : > { %v4922_v50 = vpop.f32.mrb[56].mxu1 }
 0xecd   : > { %v4926_v44 = vmul.f32 0.015625, %v4922_v50  ;;  %v8225_v52 = vpop.f32.mrb[57].mxu1  ;;  %v5022_v50 = vld [vmem:[#allocation21 + $0x18] sm:$0xff] }
 0xecf   : > { %v4928_v23 = vsub.f32 %v4926_v44, %v4927_v51 }
 0xed1   : > { %v4934_v63 = vadd.f32 1e-05, %v4928_v23 }
 0xed3   : > { %9831 = vrsqrt.f32 %v4934_v63 }
 0xedd   : > { %v9832_v2 = vpop.eup %9831 }
 0xede   : > { %v4939_v54 = vrot.slane %v9832_v2, %v11277_v5  ;;  %v5023_v2 = vld [vmem:[#allocation21 + $0x20] sm:$0xff] }
 0xee0   : > { %v4940_v56 = vmul.f32 %v4939_v54, %v4933_v49  ;;  %v5021_v49 = vld [vmem:[#allocation21 + $0x10] sm:$0xff]  ;;  %v5024_v54 = vld [vmem:[#allocation21 + $0x28] sm:$0xff] }
 0xee1   : > { %v9427_v23 = vpack.c.bf16 %v5022_v50, %v5021_v49  ;;  %v5510_v50 = vld [vmem:[#allocation21 + $0x1a0] sm:$0xff] }
 0xee2   : > { %vm4941_vm3 = vcmp.gt.f32.partialorder %v4940_v56, 0.0  ;;  %v4942_v57 = vmul.f32 0.2, %v4940_v56 }
 0xee4   : > { %v4943_v61 = vsel %vm4941_vm3, %v4940_v56, %v4942_v57  ;;  %v9430_v57 = vpack.c.bf16 %v5024_v54, %v5023_v2  ;;  %v5515_v54 = vld [vmem:[#allocation21 + $0x1c8] sm:$0xff] }
 0xee5   : > { %8227 = vmatpush3.msra.mxu1 %v4943_v61  ;;  %8307 = vmatpush3.msra.mxu0 %v4943_v61 }
 0xee6   : > { %8229 = vmatmul.mubr.msk.f32.vlgmr.msra.gmra.mrb[58].mxu1 %vm4945_vm4, %v4944_v58  ;;  %8231 = vmatprep.subr.mxu1 %v10409_v20  ;;  %v5025_v58 = vld [vmem:[#allocation21 + $0x30] sm:$0xff] }
 0xee7   : > { %8346 = vmatprep.subr.mxu0 %v10409_v20  ;;  %8232 = vmatpush3.msra.mxu1 %v4943_v61 }
 0xee8   : > { %8309 = vmatmul.mubr.msk.f32.vlgmr.msra.gmra.mrb[38].mxu0 %vm4945_vm4, %v5268_v1  ;;  %8233 = vmatprep.mubr.msk.f32.mxu1 %vm10408_vm0, %v10409_v20  ;;  %v5028_v1 = vld [vmem:[#allocation21 + $0x48] sm:$0xff] }
 0xee9   : > { %8347 = vmatpush3.msra.mxu0 %v4943_v61  ;;  %8348 = vmatprep.mubr.msk.f32.mxu0 %vm10408_vm0, %v10409_v20  ;;  %v5026_v61 = vld [vmem:[#allocation21 + $0x38] sm:$0xff] }
 0xeea   : > { %8234 = vmatmul.mubr.msk.f32.vlgmr.msra.gmra.mrb[60].mxu1 %vm4945_vm4, %v5036_v3  ;;  %9399 = vmatprep.subr.bf16.mxu1 %v10407_v22  ;;  %v9433_v62 = vpack.c.bf16 %v5026_v61, %v5025_v58  ;;  %v9436_v3 = vpack.c.bf16 %v5028_v1, %v5027_v0  ;;  %v5517_v58 = vld [vmem:[#allocation21 + $0x1d8] sm:$0xff]  ;;  %v5519_v0 = vld [vmem:[#allocation21 + $0x1e8] sm:$0xff] }
 0xeeb   : > { %9401 = vmatpush3.bf16.msra.mxu1 %v9400_v8  ;;  %8268 = vmatprep.mubr.msk.f32.mxu1 %vm10408_vm0, %v10409_v20  ;;  %v5029_v8 = vld [vmem:[#allocation21 + $0x50] sm:$0xff] }
 0xeec   : > { %8349 = vmatmul.mubr.msk.f32.vlgmr.msra.gmra.mrb[40].mxu0 %vm4945_vm4, %v5431_v6  ;;  %9402 = vmatprep.subr.bf16.mxu1 %v10407_v22  ;;  %v9439_v4 = vpack.c.bf16 %v5030_v11, %v5029_v8  ;;  %v5031_v6 = vld [vmem:[#allocation21 + $0x60] sm:$0xff]  ;;  %v5521_v8 = vld [vmem:[#allocation21 + $0x1f8] sm:$0xff] }
 0xeed   : > { %9495 = vmatprep.subr.bf16.mxu0 %v10407_v22  ;;  %8418 = vmatprep.mubr.msk.f32.mxu0 %vm10408_vm0, %v10409_v20 }
 0xeee   : > { %9497 = vmatpush3.bf16.msra.mxu0 %v11639_v34 }
 0xeef   : > { %9404 = vmatpush3.bf16.msra.mxu1 %v9403_v60  ;;  %9498 = vmatprep.subr.bf16.mxu0 %v10407_v22  ;;  %v5032_v60 = vld [vmem:[#allocation21 + $0x68] sm:$0xff] }
 0xef0   : > { %9405 = vmatprep.subr.bf16.mxu1 %v10407_v22  ;;  %v9442_v12 = vpack.c.bf16 %v5032_v60, %v5031_v6  ;;  %v5620_v6 = vld [vmem:[#allocation23 + $0x58] sm:$0xff] }
 0xef2   : > { %9500 = vmatpush3.bf16.msra.mxu0 %v11642_v36 }
 0xef3   : > { %9407 = vmatpush3.bf16.msra.mxu1 %v9406_v15  ;;  %9501 = vmatprep.subr.bf16.mxu0 %v10407_v22  ;;  %v5034_v15 = vld [vmem:[#allocation21 + $0x78] sm:$0xff] }
 0xef4   : > { %9408 = vmatprep.subr.bf16.mxu1 %v10407_v22  ;;  %v9445_v16 = vpack.c.bf16 %v5034_v15, %v5033_v13  ;;  %v5622_v13 = vld [vmem:[#allocation23 + $0x68] sm:$0xff] }
 0xef6   : > { %9503 = vmatpush3.bf16.msra.mxu0 %v11646_v38 }
 0xef7   : > { %9410 = vmatpush3.bf16.msra.mxu1 %v9409_v18  ;;  %9504 = vmatprep.subr.bf16.mxu0 %v10407_v22  ;;  %v5344_v18 = vld [vmem:[#allocation21 + $0x108] sm:$0xff] }
 0xef8   : > { %9411 = vmatprep.subr.bf16.mxu1 %v10407_v22  ;;  %v9448_v19 = vpack.c.bf16 %v5344_v18, %v5343_v17  ;;  %v5624_v17 = vld [vmem:[#allocation23 + $0x78] sm:$0xff] }
 0xefa   : > { %9506 = vmatpush3.bf16.msra.mxu0 %v11650_v43 }
 0xefb   : > { %9413 = vmatpush3.bf16.msra.mxu1 %v9412_v24  ;;  %9507 = vmatprep.subr.bf16.mxu0 %v10407_v22  ;;  %v5346_v24 = vld [vmem:[#allocation21 + $0x118] sm:$0xff] }
 0xefc   : > { %9414 = vmatprep.subr.bf16.mxu1 %v10407_v22  ;;  %v9451_v26 = vpack.c.bf16 %v5346_v24, %v5345_v7 }
 0xefe   : > { %9509 = vmatpush3.bf16.msra.mxu0 %v11654_v41 }
 0xeff   : > { %9416 = vmatpush3.bf16.msra.mxu1 %v9415_v25  ;;  %9510 = vmatprep.subr.bf16.mxu0 %v10407_v22  ;;  %v5348_v25 = vld [vmem:[#allocation21 + $0x128] sm:$0xff] }
 0xf00   : > { %9417 = vmatprep.subr.bf16.mxu1 %v10407_v22  ;;  %v9454_v21 = vpack.c.bf16 %v5348_v25, %v5347_v14 }
 0xf03   : > { %9419 = vmatpush3.bf16.msra.mxu1 %v9418_v28  ;;  %v5350_v28 = vld [vmem:[#allocation21 + $0x138] sm:$0xff] }
 0xf04   : > { %9420 = vmatprep.subr.bf16.mxu1 %v10407_v22  ;;  %v9457_v29 = vpack.c.bf16 %v5350_v28, %v5349_v27 }
 0xf07   : > { %9422 = vmatpush3.bf16.msra.mxu1 %v9421_v31  ;;  %v5352_v31 = vld [vmem:[#allocation21 + $0x148] sm:$0xff] }
 0xf08   : > { %9423 = vmatprep.subr.bf16.mxu1 %v10407_v22  ;;  %v9460_v32 = vpack.c.bf16 %v5352_v31, %v5351_v30 }
 0xfb9   : > { %v5015_v53 = vpop.f32.mrb[58].mxu1 }
 0xfba   : > { %v8230_v55 = vpop.f32.mrb[59].mxu1 }
 0xfbb   : > { %v11659_v48 = vpop.f32.mrb[38].mxu0  ;;  %v5508_v55 = vld [vmem:[#allocation21 + $0x190] sm:$0xff] }
 0xfbc   : > { %v8310_v51 = vpop.f32.mrb[39].mxu0 }
 0xfbd   : > { %v5106_v44 = vpop.f32.mrb[60].mxu1  ;;  %v5511_v51 = vld [vmem:[#allocation21 + $0x1a8] sm:$0xff] }
 0xfbe   : > { %8269 = vmatmul.mubr.f32.vlgmr.msra.gmra.mrb[62].mxu1 %v5106_v44  ;;  %v8235_v52 = vpop.f32.mrb[61].mxu1  ;;  %v9478_v44 = vpack.c.bf16 %v5511_v51, %v5510_v50  ;;  %v5805_v50 = vld [vmem:[%s11950_s9 + $0x60] sm:$0xff]  ;;  %v5806_v51 = vld [vmem:[%s11950_s9 + $0x68] sm:$0xff] }
 0xfbf   : > { %9425 = vmatpush3.bf16.msra.mxu1 %v9424_v47  ;;  %8303 = vmatprep.mubr.msk.f32.mxu1 %vm10408_vm0, %v10409_v20  ;;  %v11663_v63 = vpop.f32.mrb[40].mxu0  ;;  %v5509_v47 = vld [vmem:[#allocation21 + $0x198] sm:$0xff]  ;;  %v5512_v52 = vld [vmem:[#allocation21 + $0x1b0] sm:$0xff] }
 0xfc0   : > { %9426 = vmatprep.subr.bf16.mxu1 %v10407_v22  ;;  %v8350_v56 = vpop.f32.mrb[41].mxu0  ;;  %v9475_v49 = vpack.c.bf16 %v5509_v47, %v5508_v55  ;;  %v5803_v55 = vld [vmem:[%s11950_s9 + $0x50] sm:$0xff]  ;;  %v5804_v47 = vld [vmem:[%s11950_s9 + $0x58] sm:$0xff] }
 0xfc3   : > { %9428 = vmatpush3.bf16.msra.mxu1 %v9427_v23  ;;  %v5513_v23 = vld [vmem:[#allocation21 + $0x1b8] sm:$0xff] }
 0xfc4   : > { %9429 = vmatprep.subr.bf16.mxu1 %v10407_v22  ;;  %v9481_v2 = vpack.c.bf16 %v5513_v23, %v5512_v52  ;;  %v5807_v52 = vld [vmem:[%s11950_s9 + $0x70] sm:$0xff]  ;;  %v5808_v23 = vld [vmem:[%s11950_s9 + $0x78] sm:$0xff] }
 0xfc7   : > { %9431 = vmatpush3.bf16.msra.mxu1 %v9430_v57  ;;  %v5516_v57 = vld [vmem:[#allocation21 + $0x1d0] sm:$0xff] }
 0xfc8   : > { %9432 = vmatprep.subr.bf16.mxu1 %v10407_v22  ;;  %v9487_v61 = vpack.c.bf16 %v5517_v58, %v5516_v57 }
 0xfcb   : > { %9434 = vmatpush3.bf16.msra.mxu1 %v9433_v62  ;;  %v5518_v62 = vld [vmem:[#allocation21 + $0x1e0] sm:$0xff] }
 0xfcc   : > { %9435 = vmatprep.subr.bf16.mxu1 %v10407_v22  ;;  %v9490_v1 = vpack.c.bf16 %v5519_v0, %v5518_v62 }
 0xfcf   : > { %9437 = vmatpush3.bf16.msra.mxu1 %v9436_v3  ;;  %v5520_v3 = vld [vmem:[#allocation21 + $0x1f0] sm:$0xff] }
 0xfd0   : > { %9438 = vmatprep.subr.bf16.mxu1 %v10407_v22  ;;  %v9493_v11 = vpack.c.bf16 %v5521_v8, %v5520_v3 }
 0xfd3   : > { %9440 = vmatpush3.bf16.msra.mxu1 %v9439_v4  ;;  %v5619_v4 = vld [vmem:[#allocation23 + $0x50] sm:$0xff] }
 0xfd4   : > { %9441 = vmatprep.subr.bf16.mxu1 %v10407_v22  ;;  %v9511_v60 = vpack.c.bf16 %v5620_v6, %v5619_v4 }
 0xfd6   : > { %9512 = vmatpush3.bf16.msra.mxu0 %v9511_v60 }
 0xfd7   : > { %9443 = vmatpush3.bf16.msra.mxu1 %v9442_v12  ;;  %9513 = vmatprep.subr.bf16.mxu0 %v10407_v22  ;;  %v5621_v12 = vld [vmem:[#allocation23 + $0x60] sm:$0xff] }
 0xfd8   : > { %9444 = vmatprep.subr.bf16.mxu1 %v10407_v22  ;;  %v9514_v15 = vpack.c.bf16 %v5622_v13, %v5621_v12 }
 0xfda   : > { %9515 = vmatpush3.bf16.msra.mxu0 %v9514_v15 }
 0xfdb   : > { %9446 = vmatpush3.bf16.msra.mxu1 %v9445_v16  ;;  %9516 = vmatprep.subr.bf16.mxu0 %v10407_v22  ;;  %v5623_v16 = vld [vmem:[#allocation23 + $0x70] sm:$0xff] }
 0xfdc   : > { %9447 = vmatprep.subr.bf16.mxu1 %v10407_v22  ;;  %v9517_v18 = vpack.c.bf16 %v5624_v17, %v5623_v16 }
 0xfde   : > { %8304 = vmatmul.mubr.f32.vlgmr.msra.gmra.mrb[62].mxu1 %v5015_v53  ;;  %v9472_v53 = vpack.c.bf16 %v5507_v46, %v5506_v59  ;;  %9518 = vmatpush3.bf16.msra.mxu0 %v9517_v18  ;;  %v5801_v59 = vld [vmem:[%s11950_s9 + $0x40] sm:$0xff]  ;;  %v5802_v46 = vld [vmem:[%s11950_s9 + $0x48] sm:$0xff] }
 0xfdf   : > { %9449 = vmatpush3.bf16.msra.mxu1 %v9448_v19  ;;  %8343 = vmatprep.mubr.msk.f32.mxu1 %vm10408_vm0, %v10409_v20 }
 0xfe0   : > { %9450 = vmatprep.subr.bf16.mxu1 %v10407_v22  ;;  %9519 = vmatprep.subr.bf16.mxu0 %v10407_v22 }
 0xfe3   : > { %9452 = vmatpush3.bf16.msra.mxu1 %v9451_v26 }
 0xfe4   : > { %9453 = vmatprep.subr.bf16.mxu1 %v10407_v22 }
 0xfe7   : > { %9455 = vmatpush3.bf16.msra.mxu1 %v9454_v21 }
 0xfe8   : > { %9456 = vmatprep.subr.bf16.mxu1 %v10407_v22 }
 0xfeb   : > { %9458 = vmatpush3.bf16.msra.mxu1 %v9457_v29 }
 0xfec   : > { %9459 = vmatprep.subr.bf16.mxu1 %v10407_v22 }
 0xfef   : > { %9461 = vmatpush3.bf16.msra.mxu1 %v9460_v32 }
 0xff0   : > { %9462 = vmatprep.subr.bf16.mxu1 %v10407_v22 }
 0xff3   : > { %9464 = vmatpush3.bf16.msra.mxu1 %v9463_v35 }
 0xff4   : > { %9465 = vmatprep.subr.bf16.mxu1 %v10407_v22 }
 0xff7   : > { %9467 = vmatpush3.bf16.msra.mxu1 %v9466_v40  ;;  %v9550_v40 = vpack.c.bf16 %v5798_v37, %v5797_v9 }
 0xff8   : > { %9468 = vmatprep.subr.bf16.mxu1 %v10407_v22 }
 0xffb   : > { %9470 = vmatpush3.bf16.msra.mxu1 %v9469_v39  ;;  %v9553_v39 = vpack.c.bf16 %v5800_v45, %v5799_v42 }
 0xffc   : > { %9471 = vmatprep.subr.bf16.mxu1 %v10407_v22 }
 0xffe   : > { %8344 = vmatmul.mubr.f32.vlgmr.msra.gmra.mrb[62].mxu1 %v11659_v48  ;;  %v5514_v48 = vld [vmem:[#allocation21 + $0x1c0] sm:$0xff] }
 0xfff   : > { %9473 = vmatpush3.bf16.msra.mxu1 %v9472_v53  ;;  %8383 = vmatprep.mubr.msk.f32.mxu1 %vm10408_vm0, %v10409_v20  ;;  %v9484_v56 = vpack.c.bf16 %v5515_v54, %v5514_v48  ;;  %v9556_v53 = vpack.c.bf16 %v5802_v46, %v5801_v59 }
0x1000   : > { %9474 = vmatprep.subr.bf16.mxu1 %v10407_v22 }
0x1003   : > { %9476 = vmatpush3.bf16.msra.mxu1 %v9475_v49  ;;  %v9559_v49 = vpack.c.bf16 %v5804_v47, %v5803_v55 }
0x1004   : > { %9477 = vmatprep.subr.bf16.mxu1 %v10407_v22 }
0x1007   : > { %9479 = vmatpush3.bf16.msra.mxu1 %v9478_v44  ;;  %v9562_v44 = vpack.c.bf16 %v5806_v51, %v5805_v50 }
0x1008   : > { %9480 = vmatprep.subr.bf16.mxu1 %v10407_v22 }
0x100b   : > { %9482 = vmatpush3.bf16.msra.mxu1 %v9481_v2  ;;  %v9565_v2 = vpack.c.bf16 %v5808_v23, %v5807_v52 }
0x100c   : > { %9483 = vmatprep.subr.bf16.mxu1 %v10407_v22 }
0x100f   : > { %9485 = vmatpush3.bf16.msra.mxu1 %v9484_v56 }
0x1010   : > { %9486 = vmatprep.subr.bf16.mxu1 %v10407_v22 }
0x1013   : > { %9488 = vmatpush3.bf16.msra.mxu1 %v9487_v61 }
0x1014   : > { %9489 = vmatprep.subr.bf16.mxu1 %v10407_v22 }
0x1017   : > { %9491 = vmatpush3.bf16.msra.mxu1 %v9490_v1 }
0x1018   : > { %9492 = vmatprep.subr.bf16.mxu1 %v10407_v22 }
0x101b   : > { %9494 = vmatpush3.bf16.msra.mxu1 %v9493_v11 }
0x101e   : > { %8384 = vmatmul.mubr.f32.vlgmr.msra.gmra.mrb[62].mxu1 %v11663_v63 }
0x10f1   : > { %v11697_v63 = vpop.f32.mrb[62].mxu1 }
0x10f2   : > { %v5594_v19 = vsel %vm5593_vm5, %v11697_v63, 0.0  ;;  %v8385_v7 = vpop.f32.mrb[63].mxu1  ;;  %v5601_v28 = vmul.f32 %v11697_v63, %v11697_v63 }
0x10f3   : > { %v5595_v24 = vrot.slane %v5594_v19, 4 }
0x10f4   : > { %v5602_v29 = vsel %vm5593_vm5, %v5601_v28, 0.0 }
0x10f5   : > { %v5596_v26 = vadd.f32 %v5595_v24, %v5594_v19  ;;  %v5603_v30 = vrot.slane %v5602_v29, 4 }
0x10f7   : > { %v5597_v14 = vrot.slane %v5596_v26, 2 }
0x10f9   : > { %v5598_v25 = vadd.f32 %v5597_v14, %v5596_v26 }
0x10fb   : > { %v5599_v21 = vrot.slane %v5598_v25, 1 }
0x10fd   : > { %v5600_v27 = vadd.f32 %v5599_v21, %v5598_v25 }
0x10ff   : > { %8419 = vmatmul.mubr.f32.vlgmr.msra.gmra.mrb[42].mxu0 %v5600_v27 }
0x1100   : > { %9521 = vmatpush3.bf16.msra.mxu0 %v11639_v34  ;;  %8453 = vmatprep.mubr.msk.f32.mxu0 %vm10408_vm0, %v10409_v20  ;;  %v5604_v34 = vadd.f32 %v5603_v30, %v5602_v29 }
0x1101   : > { %9522 = vmatprep.subr.bf16.mxu0 %v10407_v22 }
0x1102   : > { %v5605_v31 = vrot.slane %v5604_v34, 2 }
0x1104   : > { %9524 = vmatpush3.bf16.msra.mxu0 %v11642_v36  ;;  %v5606_v36 = vadd.f32 %v5605_v31, %v5604_v34 }
0x1105   : > { %9525 = vmatprep.subr.bf16.mxu0 %v10407_v22 }
0x1108   : > { %9527 = vmatpush3.bf16.msra.mxu0 %v11646_v38  ;;  %v5607_v38 = vrot.slane %v5606_v36, 1 }
0x1109   : > { %9528 = vmatprep.subr.bf16.mxu0 %v10407_v22 }
0x110a   : > { %v5608_v32 = vadd.f32 %v5607_v38, %v5606_v36 }
0x110c   : > { %9530 = vmatpush3.bf16.msra.mxu0 %v11650_v43  ;;  %v5793_v43 = vld [vmem:[%s11950_s9] sm:$0xff] }
0x110d   : > { %9531 = vmatprep.subr.bf16.mxu0 %v10407_v22 }
0x1110   : > { %9533 = vmatpush3.bf16.msra.mxu0 %v11654_v41  ;;  %v5794_v41 = vld [vmem:[%s11950_s9 + $0x8] sm:$0xff] }
0x1111   : > { %9534 = vmatprep.subr.bf16.mxu0 %v10407_v22  ;;  %v9544_v33 = vpack.c.bf16 %v5794_v41, %v5793_v43  ;;  %v5899_v41 = vld [vmem:[#allocation26] sm:$0x1] }
0x1114   : > { %9536 = vmatpush3.bf16.msra.mxu0 %v9511_v60  ;;  %v5784_v60 = vld [vmem:[%s11951_s2] sm:$0xf]  ;;  %s10287_s2 = scalar_lea.vmem %s5933_s29, 16 }
0x1115   : > { %9537 = vmatprep.subr.bf16.mxu0 %v10407_v22  ;;  %p10288_p11 = scmp.ne.s32.totalorder %s5933_s29, %s10287_s2 }
0x1117   : > { %p10289_p5 = pnand %p10288_p11, %p11953_p3 }
0x1118   : > { %9539 = vmatpush3.bf16.msra.mxu0 %v9514_v15 }
0x1119   : > { %9540 = vmatprep.subr.bf16.mxu0 %v10407_v22  ;;  %p10290_p9 = pneg %p10289_p5 }
0x111c   : > { %9542 = vmatpush3.bf16.msra.mxu0 %v9517_v18 }
0x111d   : > { %9543 = vmatprep.subr.bf16.mxu0 %v10407_v22 }
0x111f   : > { %8454 = vmatmul.mubr.f32.vlgmr.msra.gmra.mrb[44].mxu0 %v5608_v32  ;;  %v5897_v32 = vld [vmem:[#allocation24] sm:$0x1] }
0x1120   : > { %8488 = vmatprep.mubr.msk.f32.mxu0 %vm10408_vm0, %v10409_v20  ;;  %9545 = vmatpush3.bf16.msra.mxu0 %v9544_v33  ;;  %v5796_v20 = vld [vmem:[%s11950_s9 + $0x18] sm:$0xff]  ;;  %s10291_s9 = sshll.u32 %s10410_s3, 4  ;;  %s10292_s9 = int_to_ptr.vmem [resolvable:$false] %s10291_s9 }
0x1121   : > { %9546 = vmatprep.subr.bf16.mxu0 %v10407_v22  ;;  %v9547_v35 = vpack.c.bf16 %v5796_v20, %v5795_v10  ;;  %s10293_s11 = scalar_lea.vmem %s10292_s9, 32  ;;  %p10294_p7 = scmp.lt.s32.totalorder %s5933_s29, %s10292_s9 }
0x1122   : > { %p10295_p4 = scmp.lt.s32.totalorder %s10293_s11, %s10287_s2 }
0x1124   : > { %9548 = vmatpush3.bf16.msra.mxu0 %v9547_v35  ;;  %v5904_v35 = vld [vmem:[#allocation27] sm:$0x1]  ;;  %p10296_p12 = por %p10295_p4, %p10294_p7 }
0x1125   : > { %9549 = vmatprep.subr.bf16.mxu0 %v10407_v22 }
0x1126   : > { %p10297_p1 = pnand %p10296_p12, %p10290_p9 }
0x1128   : > { %9551 = vmatpush3.bf16.msra.mxu0 %v9550_v40 }
0x1129   : > { %9552 = vmatprep.subr.bf16.mxu0 %v10407_v22 }
0x112c   : > { %9554 = vmatpush3.bf16.msra.mxu0 %v9553_v39 }
0x112d   : > { %9555 = vmatprep.subr.bf16.mxu0 %v10407_v22 }
0x1130   : > { %9557 = vmatpush3.bf16.msra.mxu0 %v9556_v53 }
0x1131   : > { %9558 = vmatprep.subr.bf16.mxu0 %v10407_v22 }
0x1134   : > { %9560 = vmatpush3.bf16.msra.mxu0 %v9559_v49 }
0x1135   : > { %9561 = vmatprep.subr.bf16.mxu0 %v10407_v22 }
0x1138   : > { %9563 = vmatpush3.bf16.msra.mxu0 %v9562_v44 }
0x1139   : > { %9564 = vmatprep.subr.bf16.mxu0 %v10407_v22 }
0x113c   : > { %9566 = vmatpush3.bf16.msra.mxu0 %v9565_v2 }
0x11d2   : > { %v5691_v48 = vpop.f32.mrb[42].mxu0 }
0x11d3   : > { %v5695_v54 = vmul.f32 0.0625, %v5691_v48  ;;  %v8420_v56 = vpop.f32.mrb[43].mxu0 }
0x11d5   : > { %v5772_v57 = vrot.slane %v5695_v54, %v11277_v5  ;;  %v5767_v62 = vmul.f32 %v5695_v54, %v5695_v54 }
0x11d7   : > { %v5773_v58 = vsub.f32 %v11697_v63, %v5772_v57 }
0x11f2   : > { %v5762_v61 = vpop.f32.mrb[44].mxu0 }
0x11f3   : > { %v5766_v0 = vmul.f32 0.0625, %v5762_v61  ;;  %v8455_v1 = vpop.f32.mrb[45].mxu0 }
0x11f5   : > { %v5768_v3 = vsub.f32 %v5766_v0, %v5767_v62 }
0x11f7   : > { %v5774_v8 = vadd.f32 1e-05, %v5768_v3 }
0x11f9   : > { %9833 = vrsqrt.f32 %v5774_v8 }
0x1203   : > { %v9834_v11 = vpop.eup %9833 }
0x1204   : > { %v5779_v4 = vrot.slane %v9834_v11, %v11277_v5 }
0x1206   : > { %v5780_v6 = vmul.f32 %v5779_v4, %v5773_v58 }
0x1208   : > { %vm5781_vm0 = vcmp.gt.f32.partialorder %v5780_v6, 0.0  ;;  %v5782_v22 = vmul.f32 0.2, %v5780_v6 }
0x120a   : > { %v5783_v12 = vsel %vm5781_vm0, %v5780_v6, %v5782_v22 }
0x120b   : > { %v5785_v13 = vmul.f32 %v5784_v60, %v5783_v12 }
0x120d   : > { %v5786_v15 = vsel %vm5593_vm5, %v5785_v13, 0.0 }
0x120e   : > { %v5787_v16 = vrot.slane %v5786_v15, 4 }
0x1210   : > { %v5788_v17 = vadd.f32 %v5787_v16, %v5786_v15 }
0x1212   : > { %v5789_v18 = vrot.slane %v5788_v17, 2 }
0x1214   : > { %v5790_v63 = vadd.f32 %v5789_v18, %v5788_v17 }
0x1216   : > { %v5791_v19 = vrot.slane %v5790_v63, 1 }
0x1218   : > { %v5792_v7 = vadd.f32 %v5791_v19, %v5790_v63 }
0x121a   : > { %8489 = vmatmul.mubr.f32.vlgmr.msra.gmra.mrb[46].mxu0 %v5792_v7 }
0x12ed   : > { %v5875_v5 = vpop.f32.mrb[46].mxu0 }
0x12ee   : > { %v8490_v24 = vpop.f32.mrb[47].mxu0  ;;  %v5881_v26 = vsel %vm5879_vm6, %v5875_v5, 0.0  ;;  %v5886_v14 = vmul.f32 %v5875_v5, %v5875_v5  ;;  %5880 = vst.msk [vmem:[%s947_s7] sm:$0x1] %vm5879_vm6, %v5875_v5 }
0x12ef   : > { %5882 = vadd.xlane.f32.xlu0 %v5881_v26 }
0x12f0   : > { %v5887_v25 = vsel %vm5879_vm6, %v5886_v14, 0.0 }
0x12f3   : > { %5888 = vadd.xlane.f32.xlu0 %v5887_v25 }
0x137c   : > { %v5883_v21 = vpop.xlane.xlu0 %5882 }
0x137d   : > { %v5885_v27 = vmul.f32 0.03125, %v5883_v21 }
0x137f   : > { %v5892_v29 = vmul.f32 %v5885_v27, %v5885_v27  ;;  %v5891_v36 = vsub.f32 %v5875_v5, %v5885_v27 }
0x1380   : > { %v5889_v28 = vpop.xlane.xlu0 %5888 }
0x1381   : > { %v5890_v30 = vmul.f32 0.03125, %v5889_v28 }
0x1383   : > { %v5893_v34 = vsub.f32 %v5890_v30, %v5892_v29 }
0x1385   : > { %v5894_v31 = vadd.f32 1e-05, %v5893_v34 }
0x1387   : > { %9835 = vrsqrt.f32 %v5894_v31 }
0x1391   : > { %v9836_v38 = vpop.eup %9835 }
0x1392   : > { %v5896_v43 = vmul.f32 %v9836_v38, %v5891_v36 }
0x1394   : > { %v5898_v33 = vmul.f32 %v5897_v32, %v5896_v43 }
0x1396   : > { %v5900_v10 = vadd.f32 %v5899_v41, %v5898_v33 }
0x1398   : > { %vm5901_vm7 = vcmp.gt.f32.partialorder %v5900_v10, 0.0  ;;  %v5902_v20 = vmul.f32 0.2, %v5900_v10 }
0x139a   : > { %v5903_v9 = vsel %vm5901_vm7, %v5900_v10, %v5902_v20 }
0x139b   : > { %v5905_v37 = vmul.f32 %v5904_v35, %v5903_v9 }
0x139d   : > { %v5906_v40 = vsel %vm5879_vm6, %v5905_v37, 0.0 }
0x139e   : > { %5907 = vadd.xlane.f32.xlu1 %v5906_v40 }
0x139f   : > { %10300 = shalt.err (!%p10297_p1)
}
0x13a0   : > { %s10301_s24 = scalar_lea.hbm %s11792_s0, 16  ;;  %s10305_s3 = scalar_lea.hbm %s11952_s6, 32 }
0x13a1   : > { %p10302_p13 = scmp.ne.s32.totalorder %s11792_s0, %s10301_s24  ;;  %p10306_p8 = scmp.lt.u32.totalorder %s11792_s0, %s11952_s6 }
0x13a2   : > { %p10307_p6 = scmp.lt.u32.totalorder %s10305_s3, %s10301_s24  ;;  %p10309_p11 = scmp.lt.u32.totalorder %s10301_s24, %s11792_s0 }
0x13a3   : > { %p10303_p0 = pnand %p10302_p13, %p11953_p3 }
0x13a4   : > { %p10308_p10 = por %p10307_p6, %p10306_p8 }
0x13a5   : > { %p10304_p2 = pneg %p10303_p0 }
0x13a6   : > { %p10310_p5 = por %p10309_p11, %p10308_p10 }
0x13a8   : > { %p10311_p9 = pnand %p10310_p5, %p10304_p2 }
0x13aa   : > { %10314 = shalt.err (!%p10311_p9)
}
0x13ab   : > { %9683 = dma.vmem_to_hbm [thread:$0]  (%p11953_p3), %s5933_s29, 16, %s11792_s0, %s5917_s1   ;;  %v5909_v42 = vld [vmem:[#allocation2] sm:$0x1]  ;;  %vm5911_vm8 = vcmask 0  }
0x13ac   : > { %p948_p7 = scmp.lt.s32.totalorder %s11930_s10, 1  ;;  %s11954_s2 = sld [smem:[#allocation57_spill]] }
0x13ae   : > { %s11963_s10 = smov (!%p948_p7, %s11930_s10), 1 }
0x13b2   : > { %s950_s7 = scalar_lea.vmem %s11954_s2, %s11963_s10 }
0x142b   : > { %v5908_v45 = vpop.xlane.xlu1 %5907 }
0x142c   : > { %v5910_v39 = vadd.f32 %v5909_v42, %v5908_v45 }
0x142e   : > { %5912 = vst.msk [vmem:[%s950_s7] sm:$0x1] %vm5911_vm8, %v5910_v39 }
0x142f PF: > { %s11955_s24 = sld [smem:[#allocation40_spill]]  ;;  %p11956_p4 = scmp.ne.s32.totalorder %s11925_s4, 0 }
0x1430   : > { %p11957_p12 = scmp.ge.s32.totalorder %s10385_s21, 2 }
0x1432   : > { %p9736_p1 = pnand %p11957_p12, %p11956_p4 }
0x1435   : > { %s5950_s17 = sand.u32 1, %s11955_s24  }
0x1436   : > { %s5951_s29 = scalar_lea.sflag [#allocation5], %s5950_s17 }
0x1437   : > { %10368 = dma.done.wait (!%p9736_p1), %s5951_s29, 16  }
0x1438   : > { %10370 = vsyncadd (!%p9736_p1), %s5951_s29, 4294967280  ;;  %p47_p3 = scmp.ge.s32.totalorder %s10913_s28, 4   ;;  %s11958_s24 = smov %s10377_s25 }
0x1439   : > { %s11959_s25 = smov %s10381_s5  ;;  %s11960_s5 = smov %s10925_s23 }
0x143a   : > { %s11961_s21 = smov %s10913_s28  ;;  %49 = sbr.rel (!%p47_p3) target bundleno = 30 (0x1e), region = 255 }
0x1441   :  { %5955 = vsyncpa [#allocation4], 1 }
0x1442   :  { %5957 = vsyncpa [#allocation4 + $0x1], 1 }
0x1443   :  { %5958 = vsyncpa [#allocation7], 1 }
0x1444   :  { %5959 = vsyncpa [#allocation10], 1 }
0x1445   :  { %5960 = vsyncpa [#allocation13], 1 }
0x1446   :  { %5961 = vsyncpa [#allocation16], 1 }
0x1447   :  { %5962 = vsyncpa [#allocation19], 1 }
0x1448   :  { %5963 = vsyncpa [#allocation22], 1 }
0x1449   :  { %5964 = vsyncpa [#allocation25], 1 }
0x144a   :  { %5965 = vsyncpa [#allocation28], 1 }
0x144b   :  { %5966 = vsyncpa [#allocation5], 1 }
0x144c   :  { %5968 = vsyncpa [#allocation5 + $0x1], 1 }

</bundles_post_ra>
